<compile_context>
chip_gen: v7x
topology: tpu7x:2x2x1
jax: 0.10.0
libtpu: 0.0.40
codegen_flags: <defaults>
</compile_context>

<pallas_src>
import math
from functools import partial

import jax
import jax.numpy as jnp
from jax.experimental import pallas as pl
from jax.experimental.pallas import tpu as pltpu


# ---------------------------------------------------------------------------
# Helpers
# ---------------------------------------------------------------------------
def _round_up(x, m):
    return (x + m - 1) // m * m


def _vmem_capacity_bytes():
    """Per-generation VMEM capacity (128 MiB on v5e/v6e, 64 MiB on v7x)."""
    try:
        cap = getattr(pltpu.get_tpu_info(), "vmem_capacity_bytes", None)
        if cap:
            return int(cap)
    except Exception:
        pass
    return 128 << 20


def _invariant_spec(shape):
    """Grid-invariant (weight) block: full array, single-buffered."""
    idx = lambda b, _z=(0,) * len(shape): _z
    try:
        return pl.BlockSpec(shape, idx, pipeline_mode=pl.Buffered(1))
    except TypeError:  # pipeline_mode kwarg unavailable -> fall back to default buffering
        return pl.BlockSpec(shape, idx)


# ---------------------------------------------------------------------------
# Recurrent kernel: 3-layer GRU + multi-head attention, emits attn_out (T,TB,H)
# ---------------------------------------------------------------------------
def decoder_kernel(emb_ref,               # (T, TB, E)   time-major embeddings (this batch tile)
                   k_ref, v_ref,          # (TB, S, H)   precomputed MHA key / value projections
                   w_ih_ref,              # (L, E, 3H)   GRU input weights, gates packed r|z|n
                   w_hh_ref,              # (L, H, 3H)   GRU hidden weights, packed
                   b_rz_ref,              # (L, 1, 2H)   b_ih+b_hh for r,z gates (pre-summed)
                   b_in_ref, b_hn_ref,    # (L, 1, H)    n-gate input / hidden biases
                   qw_ref, qb_ref,        # (H, H),(1,H) query proj (1/sqrt(hd) folded in)
                   ow_ref, ob_ref,        # (H, H),(1,H) MHA output projection
                   hm_hn_ref,             # (H, NH)      one-hot head mask (column per head)
                   hm_nh_ref,             # (NH, H)      one-hot head mask (row per head)
                   attn_ref,              # (T, TB, H)   output: per-step attention output
                   h_ref,                 # (L, TB, H)   VMEM scratch: GRU hidden state (f32)
                   *, approx_recip):
    TB, S, H = k_ref.shape
    T = emb_ref.shape[0]
    L = w_ih_ref.shape[0]
    NH = hm_nh_ref.shape[0]
    f32 = jnp.float32
    cdt = w_ih_ref.dtype                  # compute dtype feeding the MXU (bf16 or f32)

    # Fresh hidden state per batch tile (init_hidden_gru = zeros).
    h_ref[...] = jnp.zeros_like(h_ref)

    @pl.loop(0, T)
    def _step(t):
        x = emb_ref[t]                                                   # (TB, E) cdt

        # ---- multi-layer GRU cell, packed gates r|z|n (assumes E == H for l>0) ----
        for l in range(L):
            h_prev = h_ref[l]                                            # (TB, H) f32
            gi = jnp.dot(x, w_ih_ref[l], preferred_element_type=f32)
            gh = jnp.dot(h_prev.astype(cdt), w_hh_ref[l], preferred_element_type=f32)
            rz = jax.nn.sigmoid(gi[:, :2 * H] + gh[:, :2 * H] + b_rz_ref[l])
            r = rz[:, :H]
            z = rz[:, H:]
            n = jnp.tanh(gi[:, 2 * H:] + b_in_ref[l] + r * (gh[:, 2 * H:] + b_hn_ref[l]))
            h_new = (1.0 - z) * n + z * h_prev
            h_ref[l] = h_new
            x = h_new.astype(cdt)                                        # input to next layer

        # ---- MultiheadAttention(query = GRU out, key = value = encoder_out) ----
        q = jnp.dot(x, qw_ref[...], preferred_element_type=f32) + qb_ref[...]    # (TB,H), scaled
        e = q.astype(cdt)[:, None, :] * k_ref[...]                                # (TB,S,H)
        sc = jnp.dot(e.reshape(TB * S, H), hm_hn_ref[...],
                     preferred_element_type=f32).reshape(TB, S, NH)               # per-head scores
        sc = sc - jnp.max(sc, axis=1, keepdims=True)
        p = jnp.exp(sc)
        p = p * pl.reciprocal(jnp.sum(p, axis=1, keepdims=True), approx=approx_recip)
        # Broadcast the per-head probabilities back to the H lanes of their head, then
        # contract over S on the VPU/XLU (avoids tiny-M per-head MXU matmuls).
        pf = jnp.dot(p.reshape(TB * S, NH).astype(cdt),
                     hm_nh_ref[...]).reshape(TB, S, H)                            # (TB,S,H)
        ctx = jnp.sum(pf * v_ref[...], axis=1)                                    # (TB,H)
        attn = (jnp.dot(ctx.astype(cdt), ow_ref[...], preferred_element_type=f32)
                + ob_ref[...])
        attn_ref[t] = attn.astype(attn_ref.dtype)


# ---------------------------------------------------------------------------
# Hoisted vocab projection: (M, H) x (H, V) tiled matmul
# ---------------------------------------------------------------------------
def fc_kernel(a_ref, w_ref, b_ref, o_ref):
    o_ref[...] = (jnp.dot(a_ref[...], w_ref[...], preferred_element_type=jnp.float32)
                  + b_ref[...]).astype(o_ref.dtype)


# ---------------------------------------------------------------------------
# Wrapper
# ---------------------------------------------------------------------------
def decoder_forward(params, encoder_out, captions, num_heads, *,
                    batch_tile=128, compute_dtype=jnp.bfloat16):
    f32 = jnp.float32
    cdt = jnp.dtype(compute_dtype)
    approx_recip = bool(cdt != jnp.dtype(jnp.float32))

    B, T = captions.shape
    S = encoder_out.shape[1]
    E = params['embed'].shape[1]
    L = params['w_ih'].shape[0]
    H = params['w_hh'].shape[-1]
    V = params['fc_w'].shape[0]
    NH = num_heads
    assert E == H, "module sets embed_size == hidden_size (GRU layers > 0 take H-dim input)"

    # Large batch tile for MXU row occupancy; clamped so tiny batches stay cheap.
    TB = min(_round_up(batch_tile, 8), _round_up(B, 8))
    B_pad = _round_up(B, TB)

    # Embedding lookup (gather) stays plain-JAX glue; kernel gets time-major embeddings.
    emb = jnp.take(params['embed'].astype(f32), captions, axis=0)        # (B, T, E)
    emb = jnp.transpose(emb, (1, 0, 2))                                  # (T, B, E)
    emb = jnp.pad(emb, ((0, 0), (0, B_pad - B), (0, 0))).astype(cdt)

    enc = jnp.pad(encoder_out.astype(f32), ((0, B_pad - B), (0, 0), (0, 0)))
    enc_c = enc.astype(cdt)

    # Loop-invariant encoder K/V projections precomputed once, outside the kernel.
    k = (jnp.einsum('bsh,ho->bso', enc_c, params['qkv_w'][1].T.astype(cdt),
                    preferred_element_type=f32)
         + params['qkv_b'][1].astype(f32)).astype(cdt)                   # (B_pad, S, H)
    v = (jnp.einsum('bsh,ho->bso', enc_c, params['qkv_w'][2].T.astype(cdt),
                    preferred_element_type=f32)
         + params['qkv_b'][2].astype(f32)).astype(cdt)

    # GRU weights packed r|z|n, pre-transposed to (in, out); r/z biases pre-summed.
    w_ih = jnp.transpose(params['w_ih'], (0, 3, 1, 2)).reshape(L, E, 3 * H).astype(cdt)
    w_hh = jnp.transpose(params['w_hh'], (0, 3, 1, 2)).reshape(L, H, 3 * H).astype(cdt)
    b_ih = params['b_ih'].astype(f32)                                    # (L, 3, 1, H)
    b_hh = params['b_hh'].astype(f32)
    b_rz = jnp.concatenate([b_ih[:, 0] + b_hh[:, 0],
                            b_ih[:, 1] + b_hh[:, 1]], axis=-1)           # (L, 1, 2H)
    b_in = b_ih[:, 2]                                                    # (L, 1, H)
    b_hn = b_hh[:, 2]                                                    # (L, 1, H)

    # MHA query projection with 1/sqrt(head_dim) folded in; out projection; head masks.
    scale = 1.0 / math.sqrt(H // NH)
    q_w = (params['qkv_w'][0].T * scale).astype(cdt)
    q_b = (params['qkv_b'][0] * scale).astype(f32)
    out_w = params['out_w'].T.astype(cdt)
    out_b = params['out_b'].astype(f32)
    hm_nh = (jnp.arange(H)[None, :] // (H // NH)
             == jnp.arange(NH)[:, None]).astype(cdt)                     # (NH, H)
    hm_hn = hm_nh.T                                                      # (H, NH)

    # VMEM budget: weights single-buffered, per-tile blocks double-buffered, plus
    # scratch + in-step f32 transients; clamped to ~80% of per-generation capacity.
    isz = cdt.itemsize
    weight_bytes = ((w_ih.size + w_hh.size + q_w.size + out_w.size
                     + hm_nh.size + hm_hn.size) * isz
                    + (b_rz.size + b_in.size + b_hn.size + q_b.size + out_b.size) * 4)
    block_bytes = (T * TB * E + 2 * TB * S * H + T * TB * H) * isz
    scratch_bytes = L * TB * H * 4
    work_bytes = (4 * TB * S * H + 16 * TB * H) * 4
    needed = weight_bytes + 2 * block_bytes + scratch_bytes + work_bytes + (4 << 20)
    vmem_limit = int(max(min(needed, int(_vmem_capacity_bytes() * 0.8)), 32 << 20))

    in_specs = [
        pl.BlockSpec((T, TB, E), lambda b: (0, b, 0)),     # embeddings (time-major)
        pl.BlockSpec((TB, S, H), lambda b: (b, 0, 0)),     # K
        pl.BlockSpec((TB, S, H), lambda b: (b, 0, 0)),     # V
        _invariant_spec((L, E, 3 * H)),                    # GRU W_ih (packed)
        _invariant_spec((L, H, 3 * H)),                    # GRU W_hh (packed)
        _invariant_spec((L, 1, 2 * H)),                    # b_rz
        _invariant_spec((L, 1, H)),                        # b_in
        _invariant_spec((L, 1, H)),                        # b_hn
        _invariant_spec((H, H)),                           # Wq (scaled)
        _invariant_spec((1, H)),                           # bq (scaled)
        _invariant_spec((H, H)),                           # out_proj W
        _invariant_spec((1, H)),                           # out_proj b
        _invariant_spec((H, NH)),                          # head mask (H, NH)
        _invariant_spec((NH, H)),                          # head mask (NH, H)
    ]

    attn = pl.pallas_call(
        partial(decoder_kernel, approx_recip=approx_recip),
        out_shape=jax.ShapeDtypeStruct((T, B_pad, H), cdt),
        grid=(B_pad // TB,),
        in_specs=in_specs,
        out_specs=pl.BlockSpec((T, TB, H), lambda b: (0, b, 0)),
        scratch_shapes=[pltpu.VMEM((L, TB, H), jnp.float32)],
        compiler_params=pltpu.CompilerParams(
            dimension_semantics=("parallel",),             # batch tiles independent (megacore)
            vmem_limit_bytes=vmem_limit),
    )(emb, k, v, w_ih, w_hh, b_rz, b_in, b_hn,
      q_w, q_b, out_w, out_b, hm_hn, hm_nh)                # (T, B_pad, H) cdt

    # ---- hoisted vocab projection: one large-M, vocab-tiled matmul -----------------
    if V >= 512:
        TV = 512
    else:
        TV = _round_up(V, 128)
    V_pad = _round_up(V, TV)
    fc_w = jnp.pad(params['fc_w'].T.astype(cdt), ((0, 0), (0, V_pad - V)))   # (H, V_pad)
    fc_b = jnp.pad(params['fc_b'].astype(f32), ((0, 0), (0, V_pad - V)))     # (1, V_pad)

    M = T * B_pad
    TM = 256 if M >= 256 else M
    M_pad = _round_up(M, TM)
    a = attn.reshape(M, H)
    if M_pad != M:
        a = jnp.pad(a, ((0, M_pad - M), (0, 0)))

    logits = pl.pallas_call(
        fc_kernel,
        out_shape=jax.ShapeDtypeStruct((M_pad, V_pad), f32),
        grid=(M_pad // TM, V_pad // TV),
        in_specs=[pl.BlockSpec((TM, H), lambda i, j: (i, 0)),
                  pl.BlockSpec((H, TV), lambda i, j: (0, j)),
                  pl.BlockSpec((1, TV), lambda i, j: (0, j))],
        out_specs=pl.BlockSpec((TM, TV), lambda i, j: (i, j)),
        compiler_params=pltpu.CompilerParams(
            dimension_semantics=("parallel", "parallel")),
    )(a, fc_w, fc_b)                                                         # (M_pad, V_pad)

    logits = logits[:M].reshape(T, B_pad, V_pad)
    return jnp.transpose(logits, (1, 0, 2))[:B, :, :V]                       # (B, T, V)


# ---------------------------------------------------------------------------
# Pure-JAX reference (mirrors PyTorch GRU + MultiheadAttention + Linear math)
# ---------------------------------------------------------------------------
def decoder_reference(params, encoder_out, captions, num_heads):
    emb = jnp.take(params['embed'], captions, axis=0)
    B, T = captions.shape
    L = params['w_ih'].shape[0]
    H = params['w_hh'].shape[-1]
    hd = H // num_heads

    def aff(v, w, b):
        return v @ w.T + b

    h = jnp.zeros((L, B, H), jnp.float32)
    outs = []
    for t in range(T):
        x = emb[:, t]
        new_h = []
        for l in range(L):
            hp = h[l]
            r = jax.nn.sigmoid(aff(x, params['w_ih'][l, 0], params['b_ih'][l, 0]) +
                               aff(hp, params['w_hh'][l, 0], params['b_hh'][l, 0]))
            z = jax.nn.sigmoid(aff(x, params['w_ih'][l, 1], params['b_ih'][l, 1]) +
                               aff(hp, params['w_hh'][l, 1], params['b_hh'][l, 1]))
            n = jnp.tanh(aff(x, params['w_ih'][l, 2], params['b_ih'][l, 2]) +
                         r * aff(hp, params['w_hh'][l, 2], params['b_hh'][l, 2]))
            hn = (1.0 - z) * n + z * hp
            new_h.append(hn)
            x = hn
        h = jnp.stack(new_h)
        q = x @ params['qkv_w'][0].T + params['qkv_b'][0]
        k = jnp.einsum('bsh,oh->bso', encoder_out, params['qkv_w'][1]) + params['qkv_b'][1]
        v = jnp.einsum('bsh,oh->bso', encoder_out, params['qkv_w'][2]) + params['qkv_b'][2]
        qh = q.reshape(B, num_heads, hd)
        kh = k.reshape(B, -1, num_heads, hd)
        vh = v.reshape(B, -1, num_heads, hd)
        sc = jnp.einsum('bnd,bsnd->bns', qh, kh) / math.sqrt(hd)
        p = jax.nn.softmax(sc, axis=-1)
        ctx = jnp.einsum('bns,bsnd->bnd', p, vh).reshape(B, H)
        attn_out = ctx @ params['out_w'].T + params['out_b']
        outs.append(attn_out @ params['fc_w'].T + params['fc_b'])
    return jnp.stack(outs, axis=1)


def init_params(key, V, E, H, L):
    ks = jax.random.split(key, 11)
    f32 = jnp.float32
    return {
        'embed':  jax.random.normal(ks[0], (V, E), f32) * 0.1,
        'w_ih':   jax.random.normal(ks[1], (L, 3, H, E), f32) * (1.0 / math.sqrt(E)),
        'w_hh':   jax.random.normal(ks[2], (L, 3, H, H), f32) * (1.0 / math.sqrt(H)),
        'b_ih':   jax.random.normal(ks[3], (L, 3, 1, H), f32) * 0.1,
        'b_hh':   jax.random.normal(ks[4], (L, 3, 1, H), f32) * 0.1,
        'qkv_w':  jax.random.normal(ks[5], (3, H, H), f32) * (1.0 / math.sqrt(H)),
        'qkv_b':  jax.random.normal(ks[6], (3, 1, H), f32) * 0.1,
        'out_w':  jax.random.normal(ks[7], (H, H), f32) * (1.0 / math.sqrt(H)),
        'out_b':  jax.random.normal(ks[8], (1, H), f32) * 0.1,
        'fc_w':   jax.random.normal(ks[9], (V, H), f32) * (1.0 / math.sqrt(H)),
        'fc_b':   jax.random.normal(ks[10], (1, V), f32) * 0.1,
    }


if __name__ == "__main__":
    # Small shapes consistent with the module (embed_size == hidden_size, 3 GRU layers).
    B, T, S = 2, 6, 5          # batch, caption length, encoder frames
    E = H = 32                 # embed_size == hidden_size
    V = 16                     # vocab_size
    L = 3                      # num_layers
    NH = 4                     # num_heads (divides hidden_size)

    key = jax.random.PRNGKey(0)
    kp, ke, kc = jax.random.split(key, 3)
    params = init_params(kp, V, E, H, L)
    encoder_out = jax.random.normal(ke, (B, S, H), jnp.float32)
    captions = jax.random.randint(kc, (B, T), 0, V, dtype=jnp.int32)

    ref = decoder_reference(params, encoder_out, captions, NH)

    # f32 compute path: tight numerical validation of the kernel math.
    out_f32 = decoder_forward(params, encoder_out, captions, NH,
                              compute_dtype=jnp.float32)
    out_f32 = jax.block_until_ready(out_f32)
    assert out_f32.shape == (B, T, V), out_f32.shape
    err32 = float(jnp.max(jnp.abs(out_f32 - ref)))
    assert jnp.allclose(out_f32, ref, atol=2e-3, rtol=2e-3), f"f32 max_err={err32}"

    # bf16 compute path (production default): loose check vs the f32 reference.
    out_bf16 = decoder_forward(params, encoder_out, captions, NH)
    out_bf16 = jax.block_until_ready(out_bf16)
    assert out_bf16.shape == (B, T, V), out_bf16.shape
    assert bool(jnp.all(jnp.isfinite(out_bf16)))
    errbf = float(jnp.max(jnp.abs(out_bf16 - ref)))
    assert jnp.allclose(out_bf16, ref, atol=2.5e-1, rtol=1e-1), f"bf16 max_err={errbf}"

    print("KERNEL_OK")
</pallas_src>

<mosaic_0001>
module attributes {stable_mosaic.version = 11 : i64} {
  func.func @decoder_kernel(%arg0: i32, %arg1: memref<6x8x32xf32, #tpu.memory_space<vmem>>, %arg2: memref<8x5x32xf32, #tpu.memory_space<vmem>>, %arg3: memref<8x5x32xf32, #tpu.memory_space<vmem>>, %arg4: memref<3x32x96xf32, #tpu.memory_space<vmem>>, %arg5: memref<3x32x96xf32, #tpu.memory_space<vmem>>, %arg6: memref<3x1x64xf32, #tpu.memory_space<vmem>>, %arg7: memref<3x1x32xf32, #tpu.memory_space<vmem>>, %arg8: memref<3x1x32xf32, #tpu.memory_space<vmem>>, %arg9: memref<32x32xf32, #tpu.memory_space<vmem>>, %arg10: memref<1x32xf32, #tpu.memory_space<vmem>>, %arg11: memref<32x32xf32, #tpu.memory_space<vmem>>, %arg12: memref<1x32xf32, #tpu.memory_space<vmem>>, %arg13: memref<32x4xf32, #tpu.memory_space<vmem>>, %arg14: memref<4x32xf32, #tpu.memory_space<vmem>>, %arg15: memref<6x8x32xf32, #tpu.memory_space<vmem>>, %arg16: memref<3x8x32xf32, #tpu.memory_space<vmem>>) attributes {dimension_semantics = [#tpu.dimension_semantics<parallel>], iteration_bounds = array<i64: 1>, scalar_prefetch = 0 : i64, scratch_operands = 1 : i64, tpu.core_type = #tpu.core_type<tc>, window_params = [{transform_indices = @transform_0, window_bounds = array<i64: 6, 8, 32>}, {transform_indices = @transform_1, window_bounds = array<i64: 8, 5, 32>}, {transform_indices = @transform_2, window_bounds = array<i64: 8, 5, 32>}, {pipeline_mode = #tpu.pipeline_mode<synchronous>, transform_indices = @transform_3, window_bounds = array<i64: 3, 32, 96>}, {pipeline_mode = #tpu.pipeline_mode<synchronous>, transform_indices = @transform_4, window_bounds = array<i64: 3, 32, 96>}, {pipeline_mode = #tpu.pipeline_mode<synchronous>, transform_indices = @transform_5, window_bounds = array<i64: 3, 1, 64>}, {pipeline_mode = #tpu.pipeline_mode<synchronous>, transform_indices = @transform_6, window_bounds = array<i64: 3, 1, 32>}, {pipeline_mode = #tpu.pipeline_mode<synchronous>, transform_indices = @transform_7, window_bounds = array<i64: 3, 1, 32>}, {pipeline_mode = #tpu.pipeline_mode<synchronous>, transform_indices = @transform_8, window_bounds = array<i64: 32, 32>}, {pipeline_mode = #tpu.pipeline_mode<synchronous>, transform_indices = @transform_9, window_bounds = array<i64: 1, 32>}, {pipeline_mode = #tpu.pipeline_mode<synchronous>, transform_indices = @transform_10, window_bounds = array<i64: 32, 32>}, {pipeline_mode = #tpu.pipeline_mode<synchronous>, transform_indices = @transform_11, window_bounds = array<i64: 1, 32>}, {pipeline_mode = #tpu.pipeline_mode<synchronous>, transform_indices = @transform_12, window_bounds = array<i64: 32, 4>}, {pipeline_mode = #tpu.pipeline_mode<synchronous>, transform_indices = @transform_13, window_bounds = array<i64: 4, 32>}, {transform_indices = @transform_14, window_bounds = array<i64: 6, 8, 32>}]} {
    %cst = arith.constant 0.000000e+00 : f32
    %0 = vector.broadcast %cst : f32 to vector<3x8x32xf32>
    %c0 = arith.constant 0 : index
    %c0_0 = arith.constant 0 : index
    %c0_1 = arith.constant 0 : index
    %1 = vector.load %arg16[%c0, %c0_0, %c0_1] : memref<3x8x32xf32, #tpu.memory_space<vmem>>, vector<3x8x32xf32>
    tpu.vector_store %arg16[%c0, %c0_0, %c0_1], %0 {strides = array<i32>} : memref<3x8x32xf32, #tpu.memory_space<vmem>>, vector<3x8x32xf32>,
    %c0_i32 = arith.constant 0 : i32
    %c6_i32 = arith.constant 6 : i32
    %2 = arith.addi %c0_i32, %c6_i32 : i32
    %c1_i32 = arith.constant 1 : i32
    scf.for %arg17 = %c0_i32 to %2 step %c1_i32  : i32 {
      %c1_i32_3 = arith.constant 1 : i32
      %3 = arith.muli %arg17, %c1_i32_3 : i32
      %c0_i32_4 = arith.constant 0 : i32
      %4 = arith.addi %c0_i32_4, %3 : i32
      %5 = arith.index_cast %4 : i32 to index
      %c0_5 = arith.constant 0 : index
      %c0_6 = arith.constant 0 : index
      %6 = vector.load %arg1[%5, %c0_5, %c0_6] : memref<6x8x32xf32, #tpu.memory_space<vmem>>, vector<1x8x32xf32>
      %7 = vector.shape_cast %6 : vector<1x8x32xf32> to vector<8x32xf32>
      %c0_7 = arith.constant 0 : index
      %c0_8 = arith.constant 0 : index
      %c0_9 = arith.constant 0 : index
      %8 = vector.load %arg16[%c0_7, %c0_8, %c0_9] : memref<3x8x32xf32, #tpu.memory_space<vmem>>, vector<1x8x32xf32>
      %9 = vector.shape_cast %8 : vector<1x8x32xf32> to vector<8x32xf32>
      %c0_10 = arith.constant 0 : index
      %c0_11 = arith.constant 0 : index
      %c0_12 = arith.constant 0 : index
      %10 = vector.load %arg4[%c0_10, %c0_11, %c0_12] : memref<3x32x96xf32, #tpu.memory_space<vmem>>, vector<1x32x96xf32>
      %11 = vector.shape_cast %10 : vector<1x32x96xf32> to vector<32x96xf32>
      %cst_13 = arith.constant dense<0.000000e+00> : vector<8x96xf32>
      %12 = tpu.matmul %7, %11, %cst_13 {dimension_numbers = #tpu.dot_dimension_numbers<[1], [0], [0], [1], [0, 0, 1, 1], [], []>} : vector<8x32xf32>, vector<32x96xf32>, vector<8x96xf32> -> vector<8x96xf32>
      %c0_14 = arith.constant 0 : index
      %c0_15 = arith.constant 0 : index
      %c0_16 = arith.constant 0 : index
      %13 = vector.load %arg5[%c0_14, %c0_15, %c0_16] : memref<3x32x96xf32, #tpu.memory_space<vmem>>, vector<1x32x96xf32>
      %14 = vector.shape_cast %13 : vector<1x32x96xf32> to vector<32x96xf32>
      %cst_17 = arith.constant dense<0.000000e+00> : vector<8x96xf32>
      %15 = tpu.matmul %9, %14, %cst_17 {dimension_numbers = #tpu.dot_dimension_numbers<[1], [0], [0], [1], [0, 0, 1, 1], [], []>} : vector<8x32xf32>, vector<32x96xf32>, vector<8x96xf32> -> vector<8x96xf32>
      %16 = vector.extract_strided_slice %12 {offsets = [0, 0], sizes = [8, 64], strides = [1, 1]} : vector<8x96xf32> to vector<8x64xf32>
      %17 = vector.extract_strided_slice %15 {offsets = [0, 0], sizes = [8, 64], strides = [1, 1]} : vector<8x96xf32> to vector<8x64xf32>
      %18 = arith.addf %16, %17 : vector<8x64xf32>
      %c0_18 = arith.constant 0 : index
      %c0_19 = arith.constant 0 : index
      %c0_20 = arith.constant 0 : index
      %19 = vector.load %arg6[%c0_18, %c0_19, %c0_20] : memref<3x1x64xf32, #tpu.memory_space<vmem>>, vector<1x1x64xf32>
      %20 = vector.shape_cast %19 : vector<1x1x64xf32> to vector<1x64xf32>
      %21 = vector.broadcast %20 : vector<1x64xf32> to vector<8x64xf32>
      %22 = arith.addf %18, %21 : vector<8x64xf32>
      %23 = arith.negf %22 : vector<8x64xf32>
      %24 = math.exp %23 : vector<8x64xf32>
      %cst_21 = arith.constant 1.000000e+00 : f32
      %25 = vector.broadcast %cst_21 : f32 to vector<8x64xf32>
      %26 = arith.addf %25, %24 : vector<8x64xf32>
      %27 = arith.divf %25, %26 : vector<8x64xf32>
      %28 = vector.extract_strided_slice %27 {offsets = [0, 0], sizes = [8, 32], strides = [1, 1]} : vector<8x64xf32> to vector<8x32xf32>
      %29 = vector.extract_strided_slice %27 {offsets = [0, 32], sizes = [8, 32], strides = [1, 1]} : vector<8x64xf32> to vector<8x32xf32>
      %30 = vector.extract_strided_slice %12 {offsets = [0, 64], sizes = [8, 32], strides = [1, 1]} : vector<8x96xf32> to vector<8x32xf32>
      %c0_22 = arith.constant 0 : index
      %c0_23 = arith.constant 0 : index
      %c0_24 = arith.constant 0 : index
      %31 = vector.load %arg7[%c0_22, %c0_23, %c0_24] : memref<3x1x32xf32, #tpu.memory_space<vmem>>, vector<1x1x32xf32>
      %32 = vector.shape_cast %31 : vector<1x1x32xf32> to vector<1x32xf32>
      %33 = vector.broadcast %32 : vector<1x32xf32> to vector<8x32xf32>
      %34 = arith.addf %30, %33 : vector<8x32xf32>
      %35 = vector.extract_strided_slice %15 {offsets = [0, 64], sizes = [8, 32], strides = [1, 1]} : vector<8x96xf32> to vector<8x32xf32>
      %c0_25 = arith.constant 0 : index
      %c0_26 = arith.constant 0 : index
      %c0_27 = arith.constant 0 : index
      %36 = vector.load %arg8[%c0_25, %c0_26, %c0_27] : memref<3x1x32xf32, #tpu.memory_space<vmem>>, vector<1x1x32xf32>
      %37 = vector.shape_cast %36 : vector<1x1x32xf32> to vector<1x32xf32>
      %38 = vector.broadcast %37 : vector<1x32xf32> to vector<8x32xf32>
      %39 = arith.addf %35, %38 : vector<8x32xf32>
      %40 = arith.mulf %28, %39 : vector<8x32xf32>
      %41 = arith.addf %34, %40 : vector<8x32xf32>
      %42 = math.tanh %41 : vector<8x32xf32>
      %cst_28 = arith.constant 1.000000e+00 : f32
      %43 = vector.broadcast %cst_28 : f32 to vector<8x32xf32>
      %44 = arith.subf %43, %29 : vector<8x32xf32>
      %45 = arith.mulf %44, %42 : vector<8x32xf32>
      %46 = arith.mulf %29, %9 : vector<8x32xf32>
      %47 = arith.addf %45, %46 : vector<8x32xf32>
      %c0_29 = arith.constant 0 : index
      %c0_30 = arith.constant 0 : index
      %c0_31 = arith.constant 0 : index
      %48 = vector.load %arg16[%c0_29, %c0_30, %c0_31] : memref<3x8x32xf32, #tpu.memory_space<vmem>>, vector<1x8x32xf32>
      %49 = vector.shape_cast %48 : vector<1x8x32xf32> to vector<8x32xf32>
      %50 = vector.shape_cast %47 : vector<8x32xf32> to vector<1x8x32xf32>
      tpu.vector_store %arg16[%c0_29, %c0_30, %c0_31], %50 {strides = array<i32>} : memref<3x8x32xf32, #tpu.memory_space<vmem>>, vector<1x8x32xf32>,
      %c1 = arith.constant 1 : index
      %c0_32 = arith.constant 0 : index
      %c0_33 = arith.constant 0 : index
      %51 = vector.load %arg16[%c1, %c0_32, %c0_33] : memref<3x8x32xf32, #tpu.memory_space<vmem>>, vector<1x8x32xf32>
      %52 = vector.shape_cast %51 : vector<1x8x32xf32> to vector<8x32xf32>
      %c1_34 = arith.constant 1 : index
      %c0_35 = arith.constant 0 : index
      %c0_36 = arith.constant 0 : index
      %53 = vector.load %arg4[%c1_34, %c0_35, %c0_36] : memref<3x32x96xf32, #tpu.memory_space<vmem>>, vector<1x32x96xf32>
      %54 = vector.shape_cast %53 : vector<1x32x96xf32> to vector<32x96xf32>
      %cst_37 = arith.constant dense<0.000000e+00> : vector<8x96xf32>
      %55 = tpu.matmul %47, %54, %cst_37 {dimension_numbers = #tpu.dot_dimension_numbers<[1], [0], [0], [1], [0, 0, 1, 1], [], []>} : vector<8x32xf32>, vector<32x96xf32>, vector<8x96xf32> -> vector<8x96xf32>
      %c1_38 = arith.constant 1 : index
      %c0_39 = arith.constant 0 : index
      %c0_40 = arith.constant 0 : index
      %56 = vector.load %arg5[%c1_38, %c0_39, %c0_40] : memref<3x32x96xf32, #tpu.memory_space<vmem>>, vector<1x32x96xf32>
      %57 = vector.shape_cast %56 : vector<1x32x96xf32> to vector<32x96xf32>
      %cst_41 = arith.constant dense<0.000000e+00> : vector<8x96xf32>
      %58 = tpu.matmul %52, %57, %cst_41 {dimension_numbers = #tpu.dot_dimension_numbers<[1], [0], [0], [1], [0, 0, 1, 1], [], []>} : vector<8x32xf32>, vector<32x96xf32>, vector<8x96xf32> -> vector<8x96xf32>
      %59 = vector.extract_strided_slice %55 {offsets = [0, 0], sizes = [8, 64], strides = [1, 1]} : vector<8x96xf32> to vector<8x64xf32>
      %60 = vector.extract_strided_slice %58 {offsets = [0, 0], sizes = [8, 64], strides = [1, 1]} : vector<8x96xf32> to vector<8x64xf32>
      %61 = arith.addf %59, %60 : vector<8x64xf32>
      %c1_42 = arith.constant 1 : index
      %c0_43 = arith.constant 0 : index
      %c0_44 = arith.constant 0 : index
      %62 = vector.load %arg6[%c1_42, %c0_43, %c0_44] : memref<3x1x64xf32, #tpu.memory_space<vmem>>, vector<1x1x64xf32>
      %63 = vector.shape_cast %62 : vector<1x1x64xf32> to vector<1x64xf32>
      %64 = vector.broadcast %63 : vector<1x64xf32> to vector<8x64xf32>
      %65 = arith.addf %61, %64 : vector<8x64xf32>
      %66 = arith.negf %65 : vector<8x64xf32>
      %67 = math.exp %66 : vector<8x64xf32>
      %cst_45 = arith.constant 1.000000e+00 : f32
      %68 = vector.broadcast %cst_45 : f32 to vector<8x64xf32>
      %69 = arith.addf %68, %67 : vector<8x64xf32>
      %70 = arith.divf %68, %69 : vector<8x64xf32>
      %71 = vector.extract_strided_slice %70 {offsets = [0, 0], sizes = [8, 32], strides = [1, 1]} : vector<8x64xf32> to vector<8x32xf32>
      %72 = vector.extract_strided_slice %70 {offsets = [0, 32], sizes = [8, 32], strides = [1, 1]} : vector<8x64xf32> to vector<8x32xf32>
      %73 = vector.extract_strided_slice %55 {offsets = [0, 64], sizes = [8, 32], strides = [1, 1]} : vector<8x96xf32> to vector<8x32xf32>
      %c1_46 = arith.constant 1 : index
      %c0_47 = arith.constant 0 : index
      %c0_48 = arith.constant 0 : index
      %74 = vector.load %arg7[%c1_46, %c0_47, %c0_48] : memref<3x1x32xf32, #tpu.memory_space<vmem>>, vector<1x1x32xf32>
      %75 = vector.shape_cast %74 : vector<1x1x32xf32> to vector<1x32xf32>
      %76 = vector.broadcast %75 : vector<1x32xf32> to vector<8x32xf32>
      %77 = arith.addf %73, %76 : vector<8x32xf32>
      %78 = vector.extract_strided_slice %58 {offsets = [0, 64], sizes = [8, 32], strides = [1, 1]} : vector<8x96xf32> to vector<8x32xf32>
      %c1_49 = arith.constant 1 : index
      %c0_50 = arith.constant 0 : index
      %c0_51 = arith.constant 0 : index
      %79 = vector.load %arg8[%c1_49, %c0_50, %c0_51] : memref<3x1x32xf32, #tpu.memory_space<vmem>>, vector<1x1x32xf32>
      %80 = vector.shape_cast %79 : vector<1x1x32xf32> to vector<1x32xf32>
      %81 = vector.broadcast %80 : vector<1x32xf32> to vector<8x32xf32>
      %82 = arith.addf %78, %81 : vector<8x32xf32>
      %83 = arith.mulf %71, %82 : vector<8x32xf32>
      %84 = arith.addf %77, %83 : vector<8x32xf32>
      %85 = math.tanh %84 : vector<8x32xf32>
      %cst_52 = arith.constant 1.000000e+00 : f32
      %86 = vector.broadcast %cst_52 : f32 to vector<8x32xf32>
      %87 = arith.subf %86, %72 : vector<8x32xf32>
      %88 = arith.mulf %87, %85 : vector<8x32xf32>
      %89 = arith.mulf %72, %52 : vector<8x32xf32>
      %90 = arith.addf %88, %89 : vector<8x32xf32>
      %c1_53 = arith.constant 1 : index
      %c0_54 = arith.constant 0 : index
      %c0_55 = arith.constant 0 : index
      %91 = vector.load %arg16[%c1_53, %c0_54, %c0_55] : memref<3x8x32xf32, #tpu.memory_space<vmem>>, vector<1x8x32xf32>
      %92 = vector.shape_cast %91 : vector<1x8x32xf32> to vector<8x32xf32>
      %93 = vector.shape_cast %90 : vector<8x32xf32> to vector<1x8x32xf32>
      tpu.vector_store %arg16[%c1_53, %c0_54, %c0_55], %93 {strides = array<i32>} : memref<3x8x32xf32, #tpu.memory_space<vmem>>, vector<1x8x32xf32>,
      %c2 = arith.constant 2 : index
      %c0_56 = arith.constant 0 : index
      %c0_57 = arith.constant 0 : index
      %94 = vector.load %arg16[%c2, %c0_56, %c0_57] : memref<3x8x32xf32, #tpu.memory_space<vmem>>, vector<1x8x32xf32>
      %95 = vector.shape_cast %94 : vector<1x8x32xf32> to vector<8x32xf32>
      %c2_58 = arith.constant 2 : index
      %c0_59 = arith.constant 0 : index
      %c0_60 = arith.constant 0 : index
      %96 = vector.load %arg4[%c2_58, %c0_59, %c0_60] : memref<3x32x96xf32, #tpu.memory_space<vmem>>, vector<1x32x96xf32>
      %97 = vector.shape_cast %96 : vector<1x32x96xf32> to vector<32x96xf32>
      %cst_61 = arith.constant dense<0.000000e+00> : vector<8x96xf32>
      %98 = tpu.matmul %90, %97, %cst_61 {dimension_numbers = #tpu.dot_dimension_numbers<[1], [0], [0], [1], [0, 0, 1, 1], [], []>} : vector<8x32xf32>, vector<32x96xf32>, vector<8x96xf32> -> vector<8x96xf32>
      %c2_62 = arith.constant 2 : index
      %c0_63 = arith.constant 0 : index
      %c0_64 = arith.constant 0 : index
      %99 = vector.load %arg5[%c2_62, %c0_63, %c0_64] : memref<3x32x96xf32, #tpu.memory_space<vmem>>, vector<1x32x96xf32>
      %100 = vector.shape_cast %99 : vector<1x32x96xf32> to vector<32x96xf32>
      %cst_65 = arith.constant dense<0.000000e+00> : vector<8x96xf32>
      %101 = tpu.matmul %95, %100, %cst_65 {dimension_numbers = #tpu.dot_dimension_numbers<[1], [0], [0], [1], [0, 0, 1, 1], [], []>} : vector<8x32xf32>, vector<32x96xf32>, vector<8x96xf32> -> vector<8x96xf32>
      %102 = vector.extract_strided_slice %98 {offsets = [0, 0], sizes = [8, 64], strides = [1, 1]} : vector<8x96xf32> to vector<8x64xf32>
      %103 = vector.extract_strided_slice %101 {offsets = [0, 0], sizes = [8, 64], strides = [1, 1]} : vector<8x96xf32> to vector<8x64xf32>
      %104 = arith.addf %102, %103 : vector<8x64xf32>
      %c2_66 = arith.constant 2 : index
      %c0_67 = arith.constant 0 : index
      %c0_68 = arith.constant 0 : index
      %105 = vector.load %arg6[%c2_66, %c0_67, %c0_68] : memref<3x1x64xf32, #tpu.memory_space<vmem>>, vector<1x1x64xf32>
      %106 = vector.shape_cast %105 : vector<1x1x64xf32> to vector<1x64xf32>
      %107 = vector.broadcast %106 : vector<1x64xf32> to vector<8x64xf32>
      %108 = arith.addf %104, %107 : vector<8x64xf32>
      %109 = arith.negf %108 : vector<8x64xf32>
      %110 = math.exp %109 : vector<8x64xf32>
      %cst_69 = arith.constant 1.000000e+00 : f32
      %111 = vector.broadcast %cst_69 : f32 to vector<8x64xf32>
      %112 = arith.addf %111, %110 : vector<8x64xf32>
      %113 = arith.divf %111, %112 : vector<8x64xf32>
      %114 = vector.extract_strided_slice %113 {offsets = [0, 0], sizes = [8, 32], strides = [1, 1]} : vector<8x64xf32> to vector<8x32xf32>
      %115 = vector.extract_strided_slice %113 {offsets = [0, 32], sizes = [8, 32], strides = [1, 1]} : vector<8x64xf32> to vector<8x32xf32>
      %116 = vector.extract_strided_slice %98 {offsets = [0, 64], sizes = [8, 32], strides = [1, 1]} : vector<8x96xf32> to vector<8x32xf32>
      %c2_70 = arith.constant 2 : index
      %c0_71 = arith.constant 0 : index
      %c0_72 = arith.constant 0 : index
      %117 = vector.load %arg7[%c2_70, %c0_71, %c0_72] : memref<3x1x32xf32, #tpu.memory_space<vmem>>, vector<1x1x32xf32>
      %118 = vector.shape_cast %117 : vector<1x1x32xf32> to vector<1x32xf32>
      %119 = vector.broadcast %118 : vector<1x32xf32> to vector<8x32xf32>
      %120 = arith.addf %116, %119 : vector<8x32xf32>
      %121 = vector.extract_strided_slice %101 {offsets = [0, 64], sizes = [8, 32], strides = [1, 1]} : vector<8x96xf32> to vector<8x32xf32>
      %c2_73 = arith.constant 2 : index
      %c0_74 = arith.constant 0 : index
      %c0_75 = arith.constant 0 : index
      %122 = vector.load %arg8[%c2_73, %c0_74, %c0_75] : memref<3x1x32xf32, #tpu.memory_space<vmem>>, vector<1x1x32xf32>
      %123 = vector.shape_cast %122 : vector<1x1x32xf32> to vector<1x32xf32>
      %124 = vector.broadcast %123 : vector<1x32xf32> to vector<8x32xf32>
      %125 = arith.addf %121, %124 : vector<8x32xf32>
      %126 = arith.mulf %114, %125 : vector<8x32xf32>
      %127 = arith.addf %120, %126 : vector<8x32xf32>
      %128 = math.tanh %127 : vector<8x32xf32>
      %cst_76 = arith.constant 1.000000e+00 : f32
      %129 = vector.broadcast %cst_76 : f32 to vector<8x32xf32>
      %130 = arith.subf %129, %115 : vector<8x32xf32>
      %131 = arith.mulf %130, %128 : vector<8x32xf32>
      %132 = arith.mulf %115, %95 : vector<8x32xf32>
      %133 = arith.addf %131, %132 : vector<8x32xf32>
      %c2_77 = arith.constant 2 : index
      %c0_78 = arith.constant 0 : index
      %c0_79 = arith.constant 0 : index
      %134 = vector.load %arg16[%c2_77, %c0_78, %c0_79] : memref<3x8x32xf32, #tpu.memory_space<vmem>>, vector<1x8x32xf32>
      %135 = vector.shape_cast %134 : vector<1x8x32xf32> to vector<8x32xf32>
      %136 = vector.shape_cast %133 : vector<8x32xf32> to vector<1x8x32xf32>
      tpu.vector_store %arg16[%c2_77, %c0_78, %c0_79], %136 {strides = array<i32>} : memref<3x8x32xf32, #tpu.memory_space<vmem>>, vector<1x8x32xf32>,
      %c0_80 = arith.constant 0 : index
      %c0_81 = arith.constant 0 : index
      %137 = vector.load %arg9[%c0_80, %c0_81] : memref<32x32xf32, #tpu.memory_space<vmem>>, vector<32x32xf32>
      %cst_82 = arith.constant dense<0.000000e+00> : vector<8x32xf32>
      %138 = tpu.matmul %133, %137, %cst_82 {dimension_numbers = #tpu.dot_dimension_numbers<[1], [0], [0], [1], [0, 0, 1, 1], [], []>} : vector<8x32xf32>, vector<32x32xf32>, vector<8x32xf32> -> vector<8x32xf32>
      %c0_83 = arith.constant 0 : index
      %c0_84 = arith.constant 0 : index
      %139 = vector.load %arg10[%c0_83, %c0_84] : memref<1x32xf32, #tpu.memory_space<vmem>>, vector<1x32xf32>
      %140 = vector.broadcast %139 : vector<1x32xf32> to vector<8x32xf32>
      %141 = arith.addf %138, %140 : vector<8x32xf32>
      %142 = vector.shape_cast %141 : vector<8x32xf32> to vector<8x1x32xf32>
      %c0_85 = arith.constant 0 : index
      %c0_86 = arith.constant 0 : index
      %c0_87 = arith.constant 0 : index
      %143 = vector.load %arg2[%c0_85, %c0_86, %c0_87] : memref<8x5x32xf32, #tpu.memory_space<vmem>>, vector<8x5x32xf32>
      %144 = vector.broadcast %142 : vector<8x1x32xf32> to vector<8x5x32xf32>
      %145 = arith.mulf %144, %143 : vector<8x5x32xf32>
      %146 = vector.shape_cast %145 : vector<8x5x32xf32> to vector<40x32xf32>
      %c0_88 = arith.constant 0 : index
      %c0_89 = arith.constant 0 : index
      %147 = vector.load %arg13[%c0_88, %c0_89] : memref<32x4xf32, #tpu.memory_space<vmem>>, vector<32x4xf32>
      %cst_90 = arith.constant dense<0.000000e+00> : vector<40x4xf32>
      %148 = tpu.matmul %146, %147, %cst_90 {dimension_numbers = #tpu.dot_dimension_numbers<[1], [0], [0], [1], [0, 0, 1, 1], [], []>} : vector<40x32xf32>, vector<32x4xf32>, vector<40x4xf32> -> vector<40x4xf32>
      %149 = vector.shape_cast %148 : vector<40x4xf32> to vector<8x5x4xf32>
      %cst_91 = arith.constant dense<0xFF800000> : vector<8x4xf32>
      %150 = vector.multi_reduction <maximumf>, %149, %cst_91 [1] : vector<8x5x4xf32> to vector<8x4xf32>
      %151 = vector.shape_cast %150 : vector<8x4xf32> to vector<8x1x4xf32>
      %152 = vector.broadcast %151 : vector<8x1x4xf32> to vector<8x5x4xf32>
      %153 = arith.subf %149, %152 : vector<8x5x4xf32>
      %154 = math.exp %153 : vector<8x5x4xf32>
      %cst_92 = arith.constant dense<0.000000e+00> : vector<8x4xf32>
      %155 = vector.multi_reduction <add>, %154, %cst_92 [1] : vector<8x5x4xf32> to vector<8x4xf32>
      %156 = vector.shape_cast %155 : vector<8x4xf32> to vector<8x1x4xf32>
      %157 = tpu.reciprocal %156 : vector<8x1x4xf32> -> vector<8x1x4xf32>
      %158 = vector.broadcast %157 : vector<8x1x4xf32> to vector<8x5x4xf32>
      %159 = arith.mulf %154, %158 : vector<8x5x4xf32>
      %160 = vector.shape_cast %159 : vector<8x5x4xf32> to vector<40x4xf32>
      %c0_93 = arith.constant 0 : index
      %c0_94 = arith.constant 0 : index
      %161 = vector.load %arg14[%c0_93, %c0_94] : memref<4x32xf32, #tpu.memory_space<vmem>>, vector<4x32xf32>
      %cst_95 = arith.constant dense<0.000000e+00> : vector<40x32xf32>
      %162 = tpu.matmul %160, %161, %cst_95 {dimension_numbers = #tpu.dot_dimension_numbers<[1], [0], [0], [1], [0, 0, 1, 1], [], []>} : vector<40x4xf32>, vector<4x32xf32>, vector<40x32xf32> -> vector<40x32xf32>
      %163 = vector.shape_cast %162 : vector<40x32xf32> to vector<8x5x32xf32>
      %c0_96 = arith.constant 0 : index
      %c0_97 = arith.constant 0 : index
      %c0_98 = arith.constant 0 : index
      %164 = vector.load %arg3[%c0_96, %c0_97, %c0_98] : memref<8x5x32xf32, #tpu.memory_space<vmem>>, vector<8x5x32xf32>
      %165 = arith.mulf %163, %164 : vector<8x5x32xf32>
      %cst_99 = arith.constant dense<0.000000e+00> : vector<8x32xf32>
      %166 = vector.multi_reduction <add>, %165, %cst_99 [1] : vector<8x5x32xf32> to vector<8x32xf32>
      %c0_100 = arith.constant 0 : index
      %c0_101 = arith.constant 0 : index
      %167 = vector.load %arg11[%c0_100, %c0_101] : memref<32x32xf32, #tpu.memory_space<vmem>>, vector<32x32xf32>
      %cst_102 = arith.constant dense<0.000000e+00> : vector<8x32xf32>
      %168 = tpu.matmul %166, %167, %cst_102 {dimension_numbers = #tpu.dot_dimension_numbers<[1], [0], [0], [1], [0, 0, 1, 1], [], []>} : vector<8x32xf32>, vector<32x32xf32>, vector<8x32xf32> -> vector<8x32xf32>
      %c0_103 = arith.constant 0 : index
      %c0_104 = arith.constant 0 : index
      %169 = vector.load %arg12[%c0_103, %c0_104] : memref<1x32xf32, #tpu.memory_space<vmem>>, vector<1x32xf32>
      %170 = vector.broadcast %169 : vector<1x32xf32> to vector<8x32xf32>
      %171 = arith.addf %168, %170 : vector<8x32xf32>
      %172 = arith.index_cast %4 : i32 to index
      %c0_105 = arith.constant 0 : index
      %c0_106 = arith.constant 0 : index
      %173 = vector.load %arg15[%172, %c0_105, %c0_106] : memref<6x8x32xf32, #tpu.memory_space<vmem>>, vector<1x8x32xf32>
      %174 = vector.shape_cast %173 : vector<1x8x32xf32> to vector<8x32xf32>
      %175 = vector.shape_cast %171 : vector<8x32xf32> to vector<1x8x32xf32>
      tpu.vector_store %arg15[%172, %c0_105, %c0_106], %175 {strides = array<i32>} : memref<6x8x32xf32, #tpu.memory_space<vmem>>, vector<1x8x32xf32>,
    }
    %c6_i32_2 = arith.constant 6 : i32
    return
  }
  func.func @transform_0(%arg0: i32) -> (i32, i32, i32) {
    %c0_i32 = arith.constant 0 : i32
    %c0_i32_0 = arith.constant 0 : i32
    %c0_i32_1 = arith.constant 0 : i32
    return %c0_i32, %arg0, %c0_i32_0 : i32, i32, i32
  }
  func.func @transform_1(%arg0: i32) -> (i32, i32, i32) {
    %c0_i32 = arith.constant 0 : i32
    %c0_i32_0 = arith.constant 0 : i32
    %c0_i32_1 = arith.constant 0 : i32
    return %arg0, %c0_i32, %c0_i32_0 : i32, i32, i32
  }
  func.func @transform_2(%arg0: i32) -> (i32, i32, i32) {
    %c0_i32 = arith.constant 0 : i32
    %c0_i32_0 = arith.constant 0 : i32
    %c0_i32_1 = arith.constant 0 : i32
    return %arg0, %c0_i32, %c0_i32_0 : i32, i32, i32
  }
  func.func @transform_3(%arg0: i32) -> (i32, i32, i32) {
    %c0_i32 = arith.constant 0 : i32
    %c0_i32_0 = arith.constant 0 : i32
    %c0_i32_1 = arith.constant 0 : i32
    %c0_i32_2 = arith.constant 0 : i32
    return %c0_i32, %c0_i32_0, %c0_i32_1 : i32, i32, i32
  }
  func.func @transform_4(%arg0: i32) -> (i32, i32, i32) {
    %c0_i32 = arith.constant 0 : i32
    %c0_i32_0 = arith.constant 0 : i32
    %c0_i32_1 = arith.constant 0 : i32
    %c0_i32_2 = arith.constant 0 : i32
    return %c0_i32, %c0_i32_0, %c0_i32_1 : i32, i32, i32
  }
  func.func @transform_5(%arg0: i32) -> (i32, i32, i32) {
    %c0_i32 = arith.constant 0 : i32
    %c0_i32_0 = arith.constant 0 : i32
    %c0_i32_1 = arith.constant 0 : i32
    %c0_i32_2 = arith.constant 0 : i32
    return %c0_i32, %c0_i32_0, %c0_i32_1 : i32, i32, i32
  }
  func.func @transform_6(%arg0: i32) -> (i32, i32, i32) {
    %c0_i32 = arith.constant 0 : i32
    %c0_i32_0 = arith.constant 0 : i32
    %c0_i32_1 = arith.constant 0 : i32
    %c0_i32_2 = arith.constant 0 : i32
    return %c0_i32, %c0_i32_0, %c0_i32_1 : i32, i32, i32
  }
  func.func @transform_7(%arg0: i32) -> (i32, i32, i32) {
    %c0_i32 = arith.constant 0 : i32
    %c0_i32_0 = arith.constant 0 : i32
    %c0_i32_1 = arith.constant 0 : i32
    %c0_i32_2 = arith.constant 0 : i32
    return %c0_i32, %c0_i32_0, %c0_i32_1 : i32, i32, i32
  }
  func.func @transform_8(%arg0: i32) -> (i32, i32) {
    %c0_i32 = arith.constant 0 : i32
    %c0_i32_0 = arith.constant 0 : i32
    %c0_i32_1 = arith.constant 0 : i32
    return %c0_i32, %c0_i32_0 : i32, i32
  }
  func.func @transform_9(%arg0: i32) -> (i32, i32) {
    %c0_i32 = arith.constant 0 : i32
    %c0_i32_0 = arith.constant 0 : i32
    %c0_i32_1 = arith.constant 0 : i32
    return %c0_i32, %c0_i32_0 : i32, i32
  }
  func.func @transform_10(%arg0: i32) -> (i32, i32) {
    %c0_i32 = arith.constant 0 : i32
    %c0_i32_0 = arith.constant 0 : i32
    %c0_i32_1 = arith.constant 0 : i32
    return %c0_i32, %c0_i32_0 : i32, i32
  }
  func.func @transform_11(%arg0: i32) -> (i32, i32) {
    %c0_i32 = arith.constant 0 : i32
    %c0_i32_0 = arith.constant 0 : i32
    %c0_i32_1 = arith.constant 0 : i32
    return %c0_i32, %c0_i32_0 : i32, i32
  }
  func.func @transform_12(%arg0: i32) -> (i32, i32) {
    %c0_i32 = arith.constant 0 : i32
    %c0_i32_0 = arith.constant 0 : i32
    %c0_i32_1 = arith.constant 0 : i32
    return %c0_i32, %c0_i32_0 : i32, i32
  }
  func.func @transform_13(%arg0: i32) -> (i32, i32) {
    %c0_i32 = arith.constant 0 : i32
    %c0_i32_0 = arith.constant 0 : i32
    %c0_i32_1 = arith.constant 0 : i32
    return %c0_i32, %c0_i32_0 : i32, i32
  }
  func.func @transform_14(%arg0: i32) -> (i32, i32, i32) {
    %c0_i32 = arith.constant 0 : i32
    %c0_i32_0 = arith.constant 0 : i32
    %c0_i32_1 = arith.constant 0 : i32
    return %c0_i32, %arg0, %c0_i32_0 : i32, i32, i32
  }
}

</mosaic_0001>

<bundles_post_ra>
// kernel: tpu_custom_call.1
= control target key start
LH: loop header
LB: loop body
LE: loop exit
PB: predicated region body
PF: predicated region fallthrough
CT: control target
= control target key end

     0   :  { %19 = vsyncpa [#allocation4], 0  ;;  %s7321_s0 = inlined_call_operand.vmem [shape: f32[6,8,32], index: 0, kind: input, shape index: {}]   ;;  %s7322_s1 = inlined_call_operand.vmem [shape: f32[8,5,32], index: 1, kind: input, shape index: {}]   ;;  %s7323_s2 = inlined_call_operand.vmem [shape: f32[8,5,32], index: 2, kind: input, shape index: {}]   ;;  %s7324_s3 = inlined_call_operand.vmem [shape: f32[3,32,96], index: 3, kind: input, shape index: {}]   ;;  %s7325_s4 = inlined_call_operand.vmem [shape: f32[3,32,96], index: 4, kind: input, shape index: {}]   ;;  %s7326_s5 = inlined_call_operand.hbm [shape: f32[3,1,64], index: 5, kind: input, shape index: {}]   ;;  %s7327_s6 = inlined_call_operand.hbm [shape: f32[3,1,32], index: 6, kind: input, shape index: {}]   ;;  %s7328_s7 = inlined_call_operand.hbm [shape: f32[3,1,32], index: 7, kind: input, shape index: {}]   ;;  %s7329_s8 = inlined_call_operand.vmem [shape: f32[32,32], index: 8, kind: input, shape index: {}]   ;;  %s7330_s9 = inlined_call_operand.vmem [shape: f32[1,32], index: 9, kind: input, shape index: {}]   ;;  %s7331_s10 = inlined_call_operand.hbm [shape: f32[32,32], index: 10, kind: input, shape index: {}]   ;;  %s7332_s11 = inlined_call_operand.vmem [shape: f32[1,32], index: 11, kind: input, shape index: {}]   ;;  %s7333_s12 = inlined_call_operand.vmem [shape: f32[32,4], index: 12, kind: input, shape index: {}]   ;;  %s7334_s13 = inlined_call_operand.vmem [shape: f32[4,32], index: 13, kind: input, shape index: {}]   ;;  %s7335_s14 = inlined_call_operand.hbm [shape: f32[6,8,32], index: 14, kind: output, shape index: {}]  }
   0x1   :  { %20 = vsyncpa [#allocation7], 0 }
   0x2   :  { %21 = vsyncpa [#allocation10], 0 }
   0x3   :  { %22 = vsyncpa [#allocation5], 0  ;;  %s5815_s29 = smov [#allocation6]   ;;  %s5816_s15 = smov [#allocation3]  }
   0x4   :  { %s50_s30 = sshll.u32 %s5815_s29, 4  ;;  %s38_s16 = sshll.u32 %s5816_s15, 4  ;;  %s51_s30 = int_to_ptr.vmem [resolvable:$true] %s50_s30  ;;  %s5907_s16 = int_to_ptr.vmem [resolvable:$true] %s38_s16 }
   0x5   :  { %s5689_s19 = scalar_lea.hbm %s7327_s6, 48 }
   0x6   :  { %p5690_p0 = scmp.ne.s32.totalorder %s7327_s6, %s5689_s19  ;;  %p5693_p1 = scmp.lt.u32.totalorder %s5689_s19, %s7327_s6 }
   0x8   :  { %p5695_p2 = pnand %p5693_p1, %p5690_p0 }
   0xa   :  { %5698 = shalt.err (!%p5695_p2)
}
   0xb   :  { %s5699_s24 = scalar_lea.vmem %s51_s30, 48  ;;  %s5703_s25 = scalar_lea.vmem %s51_s30, 64 }
   0xc   :  { %p5700_p3 = scmp.ne.s32.totalorder %s51_s30, %s5699_s24  ;;  %p5704_p4 = scmp.lt.s32.totalorder %s51_s30, %s51_s30 }
   0xd   :  { %p5705_p5 = scmp.lt.s32.totalorder %s5703_s25, %s5699_s24 }
   0xf   :  { %p5706_p6 = por %p5705_p5, %p5704_p4 }
  0x11   :  { %p5707_p7 = pnand %p5706_p6, %p5700_p3 }
  0x13   :  { %5710 = shalt.err (!%p5707_p7)
}
  0x14   :  { %s5817_s26 = smov 16   ;;  %s5818_s27 = smov 1  }
  0x15   :  { %56 = dma.hbm_to_vmem [thread:$0]  %s7327_s6, 48, %s51_s30, [#allocation7], %s5817_s26, %s5817_s26, %s5818_s27  }
  0x16   :  { %s5711_s18 = scalar_lea.hbm %s7326_s5, 48 }
  0x17   :  { %p5712_p8 = scmp.ne.s32.totalorder %s7326_s5, %s5711_s18  ;;  %p5715_p9 = scmp.lt.u32.totalorder %s5711_s18, %s7326_s5 }
  0x19   :  { %p5717_p10 = pnand %p5715_p9, %p5712_p8 }
  0x1b   :  { %5720 = shalt.err (!%p5717_p10)
}
  0x1c   :  { %s5721_s23 = scalar_lea.vmem %s5907_s16, 48  ;;  %s5725_s6 = scalar_lea.vmem %s5907_s16, 64 }
  0x1d   :  { %p5722_p11 = scmp.ne.s32.totalorder %s5907_s16, %s5721_s23  ;;  %p5726_p12 = scmp.lt.s32.totalorder %s5907_s16, %s5907_s16 }
  0x1e   :  { %p5727_p13 = scmp.lt.s32.totalorder %s5725_s6, %s5721_s23 }
  0x20   :  { %p5728_p0 = por %p5727_p13, %p5726_p12 }
  0x22   :  { %p5729_p1 = pnand %p5728_p0, %p5722_p11 }
  0x24   :  { %5732 = shalt.err (!%p5729_p1)
}
  0x25   :  { %44 = dma.hbm_to_vmem [thread:$0]  %s7326_s5, 48, %s5907_s16, [#allocation4], %s5817_s26, %s5817_s26, %s5818_s27  }
  0x26   :  { %s5819_s25 = smov [#allocation8]   ;;  %s5820_s29 = smov [#allocation9]  }
  0x27   :  { %s62_s28 = sshll.u32 %s5819_s25, 4  ;;  %s78_s15 = sshll.u32 %s5820_s29, 4  ;;  %s63_s28 = int_to_ptr.vmem [resolvable:$true] %s62_s28  ;;  %s5945_s15 = int_to_ptr.vmem [resolvable:$true] %s78_s15 }
  0x28   :  { %s5733_s19 = scalar_lea.hbm %s7328_s7, 48 }
  0x29   :  { %p5734_p2 = scmp.ne.s32.totalorder %s7328_s7, %s5733_s19  ;;  %p5737_p3 = scmp.lt.u32.totalorder %s5733_s19, %s7328_s7 }
  0x2b   :  { %p5739_p4 = pnand %p5737_p3, %p5734_p2 }
  0x2d   :  { %5742 = shalt.err (!%p5739_p4)
}
  0x2e   :  { %s5743_s5 = scalar_lea.vmem %s63_s28, 48  ;;  %s5747_s16 = scalar_lea.vmem %s63_s28, 64 }
  0x2f   :  { %p5744_p5 = scmp.ne.s32.totalorder %s63_s28, %s5743_s5  ;;  %p5748_p6 = scmp.lt.s32.totalorder %s63_s28, %s63_s28 }
  0x30   :  { %p5749_p7 = scmp.lt.s32.totalorder %s5747_s16, %s5743_s5 }
  0x32   :  { %p5750_p8 = por %p5749_p7, %p5748_p6 }
  0x34   :  { %p5751_p9 = pnand %p5750_p8, %p5744_p5 }
  0x36   :  { %5754 = shalt.err (!%p5751_p9)
}
  0x37   :  { %68 = dma.hbm_to_vmem [thread:$0]  %s7328_s7, 48, %s63_s28, [#allocation7], %s5817_s26, %s5817_s26, %s5818_s27  }
  0x38   :  { %s5755_s29 = scalar_lea.hbm %s7331_s10, 512 }
  0x39   :  { %p5756_p10 = scmp.ne.s32.totalorder %s7331_s10, %s5755_s29  ;;  %p5759_p11 = scmp.lt.u32.totalorder %s5755_s29, %s7331_s10 }
  0x3b   :  { %p5761_p12 = pnand %p5759_p11, %p5756_p10 }
  0x3d   :  { %5764 = shalt.err (!%p5761_p12)
}
  0x3e   :  { %s5765_s21 = scalar_lea.vmem %s5945_s15, 512  ;;  %p5770_p0 = scmp.lt.s32.totalorder %s5945_s15, %s5945_s15 }
  0x3f   :  { %p5766_p13 = scmp.ne.s32.totalorder %s5945_s15, %s5765_s21  ;;  %p5771_p1 = scmp.lt.s32.totalorder %s5765_s21, %s5765_s21 }
  0x41   :  { %p5772_p2 = por %p5771_p1, %p5770_p0 }
  0x43   :  { %p5773_p3 = pnand %p5772_p2, %p5766_p13 }
  0x45   :  { %5776 = shalt.err (!%p5773_p3)
}
  0x46   :  { %s5821_s7 = smov 128   ;;  %s5822_s26 = smov 8  }
  0x47   :  { %84 = dma.hbm_to_vmem [thread:$0]  %s7331_s10, 512, %s5945_s15, [#allocation10], %s5821_s7, %s5821_s7, %s5822_s26  }
  0x48   :  { %5803 = dma.done.wait [#allocation4], 48  }
  0x49   :  { %5804 = vsyncadd [#allocation4], 4294967248 }
  0x4a   :  { %5805 = dma.done.wait [#allocation7], 96  }
  0x4b   :  { %5806 = vsyncadd [#allocation7], 4294967200 }
  0x4c   :  { %5807 = dma.done.wait [#allocation10], 512  }
  0x4d   :  { %5808 = vsyncadd [#allocation10], 4294966784  ;;  %vm103_vm0 = vcmask 261120   ;;  %v5823_v0 = vmov 0.0   ;;  %s5985_s22 = smov 0  }
  0x4e   :  { %104 = vst.msk [vmem:[#allocation2] sm:$0xff] %vm103_vm0, %v5823_v0  ;;  %105 = vst.msk [vmem:[#allocation2 + $0x8] sm:$0xff] %vm103_vm0, %v5823_v0 }
  0x4f   :  { %106 = vst.msk [vmem:[#allocation2 + $0x10] sm:$0xff] %vm103_vm0, %v5823_v0 }
  0x50 LB: > { %v117_v1 = vld [vmem:[%s7324_s3] sm:$0xff]  ;;  %v118_v2 = vld [vmem:[%s7324_s3 + $0x8] sm:$0xff]  ;;  %v7336_v4 = vmov 0.0|0.0   ;;  %v119_v7 = vld [vmem:[%s7324_s3 + $0x10] sm:$0xff]  ;;  %vm5825_vm1 = vmmov 0   ;;  %v7337_v12 = vmov 0.0   ;;  %s5813_s22 = sphi %s5985_s22, %s112_s22  }
  0x51   : > { %v194_v3 = vld [vmem:[%s7325_s4] sm:$0xff]  ;;  %5488 = vmatprep.subr.bf16.mxu0 %v7336_v4  ;;  %5494 = vmatprep.subr.bf16.mxu1 %v7336_v4  ;;  %v5489_v5 = vpack.c.bf16 %v118_v2, %v117_v1  ;;  %v195_v6 = vld [vmem:[%s7325_s4 + $0x8] sm:$0xff]  ;;  %v120_v8 = vld [vmem:[%s7324_s3 + $0x18] sm:$0xff]  ;;  %s5247_s28 = sshll.u32 %s5813_s22, 3  ;;  %s5827_s5 = smov 64   ;;  %vm2245_vm2 = vcmask 28672  }
  0x52   : > { %v5495_v9 = vpack.c.bf16 %v195_v6, %v194_v3  ;;  %v196_v10 = vld [vmem:[%s7325_s4 + $0x10] sm:$0xff]  ;;  %v197_v11 = vld [vmem:[%s7325_s4 + $0x18] sm:$0xff]  ;;  %5368 = vmatprep.mubr.msk.f32.mxu0 %vm5825_vm1, %v7337_v12  ;;  %5379 = vmatprep.mubr.msk.f32.mxu1 %vm5825_vm1, %v7337_v12  ;;  %v5492_v13 = vpack.c.bf16 %v120_v8, %v119_v7  ;;  %v5253_v14 = vld [vmem:[#allocation8] ss:$0 sm:$0xff]  ;;  %s114_s23 = scalar_lea.vmem %s7321_s0, %s5247_s28  ;;  %s5828_s16 = smov 32   ;;  %vm3903_vm3 = vcmask 1043456  }
  0x53   : > { %5490 = vmatpush3.bf16.msra.mxu0 %v5489_v5  ;;  %v5252_v15 = vld [vmem:[#allocation6] ss:$0 sm:$0xff]  ;;  %v5498_v16 = vpack.c.bf16 %v197_v11, %v196_v10  ;;  %302 = vrot.lane.b32.xlu0 %v5253_v14, %s5827_s5  ;;  %v115_v17 = vld [vmem:[%s114_s23] sm:$0xff]  ;;  %v5250_v26 = vld [vmem:[#allocation3] ss:$0 sm:$0xff]  ;;  %s5829_s24 = smov 96  }
  0x54   : > { %5496 = vmatpush3.bf16.msra.mxu1 %v5495_v9  ;;  %5491 = vmatprep.subr.bf16.mxu0 %v7336_v4  ;;  %v5259_v38 = vld [vmem:[%s7325_s4 + $0x20] sm:$0xff]  ;;  %v5260_v39 = vld [vmem:[%s7325_s4 + $0x28] sm:$0xff]  ;;  %v5261_v40 = vld [vmem:[%s7325_s4 + $0x30] sm:$0xff]  ;;  %vm3892_vm4 = vcmask 31744   ;;  %vm5055_vm5 = vcmask 258048   ;;  %vm5131_vm6 = vcmask 1041409  }
  0x55   : > { %5497 = vmatprep.subr.bf16.mxu1 %v7336_v4  ;;  %292 = vrot.lane.b32.xlu1 %v5252_v15, %s5827_s5  ;;  %v116_v18 = vld [vmem:[#allocation2] sm:$0xff]  ;;  %v5507_v41 = vpack.c.bf16 %v5260_v39, %v5259_v38  ;;  %v5262_v42 = vld [vmem:[%s7325_s4 + $0x38] sm:$0xff]  ;;  %v5255_v44 = vld [vmem:[%s7324_s3 + $0x28] sm:$0xff]  ;;  %vm5133_vm7 = vcmask 1042434   ;;  %vm5135_vm8 = vcmask 1043459   ;;  %vm5137_vm9 = vcmask 1044484  }
  0x56   : > { %v5254_v43 = vld [vmem:[%s7324_s3 + $0x20] sm:$0xff]  ;;  %v5256_v45 = vld [vmem:[%s7324_s3 + $0x30] sm:$0xff]  ;;  %v5257_v46 = vld [vmem:[%s7324_s3 + $0x38] sm:$0xff]  ;;  %v5510_v47 = vpack.c.bf16 %v5262_v42, %v5261_v40  ;;  %vm5139_vm10 = vcmask 1045509   ;;  %vm5141_vm11 = vcmask 1046534   ;;  %vm5143_vm12 = vcmask 1047559  }
  0x57   : > { %5493 = vmatpush3.bf16.msra.mxu0 %v5492_v13  ;;  %v5501_v48 = vpack.c.bf16 %v5255_v44, %v5254_v43  ;;  %v5504_v49 = vpack.c.bf16 %v5257_v46, %v5256_v45  ;;  %v334_v50 = vld [vmem:[#allocation2 + $0x8] sm:$0xff]  ;;  %v5267_v52 = vld [vmem:[#allocation8 + $0x1] ss:$0 sm:$0xff]  ;;  %v5266_v53 = vld [vmem:[#allocation6 + $0x1] ss:$0 sm:$0xff]  ;;  %s112_s22 = sadd.s32 1, %s5813_s22  }
  0x58   : > { %5499 = vmatpush3.bf16.msra.mxu1 %v5498_v16  ;;  %5500 = vmatprep.subr.bf16.mxu0 %v7336_v4  ;;  %v5264_v2 = vld [vmem:[#allocation3 + $0x1] ss:$0 sm:$0xff]  ;;  %v5278_v46 = vld [vmem:[#allocation3 + $0x2] ss:$0 sm:$0xff]  ;;  %p109_p4 = scmp.ge.s32.totalorder %s112_s22, 6  }
  0x59   : > { %5506 = vmatprep.subr.bf16.mxu1 %v7336_v4 }
  0x5a   : > { %5369 = vmatmul.mubr.msk.f32.vlgmr.msra.gmra.mrb[0].mxu0 %vm103_vm0, %v115_v17 }
  0x5b   : > { %5380 = vmatmul.mubr.msk.f32.vlgmr.msra.gmra.mrb[0].mxu1 %vm103_vm0, %v116_v18  ;;  %5390 = vmatprep.mubr.msk.f32.mxu0 %vm5825_vm1, %v7337_v12 }
  0x5c   : > { %5401 = vmatprep.mubr.msk.f32.mxu1 %vm5825_vm1, %v7337_v12  ;;  %5508 = vmatpush3.bf16.msra.mxu1 %v5507_v41 }
  0x5d   : > { %5509 = vmatprep.subr.bf16.mxu1 %v7336_v4  ;;  %5502 = vmatpush3.bf16.msra.mxu0 %v5501_v48 }
  0x5e   : > { %5503 = vmatprep.subr.bf16.mxu0 %v7336_v4 }
  0x60   : > { %5511 = vmatpush3.bf16.msra.mxu1 %v5510_v47 }
  0x61   : > { %5518 = vmatprep.subr.bf16.mxu1 %v7336_v4  ;;  %5505 = vmatpush3.bf16.msra.mxu0 %v5504_v49 }
  0x62   : > { %5512 = vmatprep.subr.bf16.mxu0 %v7336_v4 }
  0x63   : > { %5402 = vmatmul.mubr.msk.f32.vlgmr.msra.gmra.mrb[2].mxu1 %vm103_vm0, %v334_v50 }
  0x64   : > { %5423 = vmatprep.mubr.msk.f32.mxu1 %vm5825_vm1, %v7337_v12 }
  0xc5   : > { %v303_v19 = vpop.permute.xlu0 %302 }
  0xc7   : > { %v293_v34 = vpop.permute.xlu1 %292 }
 0x12d   : > { %v190_v20 = vpop.f32.mrb[0].mxu0 }
 0x12e   : > { %v267_v21 = vpop.f32.mrb[0].mxu1  ;;  %v5370_v22 = vpop.f32.mrb[1].mxu0  ;;  %v295_v35 = vadd.f32 %v293_v34, %v190_v20 }
 0x12f   : > { %v271_v23 = vadd.f32 %v267_v21, %v190_v20  ;;  %v305_v24 = vadd.f32 %v303_v19, %v267_v21  ;;  %v5381_v25 = vpop.f32.mrb[1].mxu1  ;;  %v5274_v19 = vld [vmem:[%s7325_s4 + $0x48] sm:$0xff]  ;;  %v5275_v20 = vld [vmem:[%s7325_s4 + $0x50] sm:$0xff]  ;;  %v5276_v22 = vld [vmem:[%s7325_s4 + $0x58] sm:$0xff] }
 0x130   : > { %v5270_v25 = vld [vmem:[%s7324_s3 + $0x50] sm:$0xff] }
 0x131   : > { %307 = vrot.lane.b32.xlu0 %v305_v24, %s5827_s5  ;;  %v279_v27 = vadd.f32 %v5250_v26, %v271_v23  ;;  %v5268_v23 = vld [vmem:[%s7324_s3 + $0x40] sm:$0xff]  ;;  %v5269_v24 = vld [vmem:[%s7324_s3 + $0x48] sm:$0xff]  ;;  %v5271_v26 = vld [vmem:[%s7324_s3 + $0x58] sm:$0xff] }
 0x133   : > { %v5251_v28 = vmul.f32 -1.442695, %v279_v27  ;;  %v5522_v27 = vpack.c.bf16 %v5276_v22, %v5275_v20  ;;  %v865_v20 = vlaneseq }
 0x135   : > { %5575 = vpow2.f32 %v5251_v28  ;;  %v5513_v28 = vpack.c.bf16 %v5269_v24, %v5268_v23  ;;  %v866_v22 = vshrl.u32 %v865_v20, 7  ;;  %v5282_v23 = vld [vmem:[%s7330_s9] ss:$0 sm:$0xff] }
 0x136   : > { %v486_v60 = vpop.f32.mrb[2].mxu1 }
 0x137   : > { %v5403_v61 = vpop.f32.mrb[3].mxu1 }
 0x138   : > { %v778_v61 = vld [vmem:[%s7329_s8 + $0x8] sm:$0xff] }
 0x13f   : > { %v5576_v29 = vpop.eup %5575 }
 0x140   : > { %v283_v30 = vadd.f32 1.0, %v5576_v29  ;;  %v5516_v29 = vpack.c.bf16 %v5271_v26, %v5270_v25 }
 0x142   : > { %5577 = vrcp.f32 %v283_v30  ;;  %v556_v30 = vld [vmem:[#allocation2 + $0x10] sm:$0xff] }
 0x14c   : > { %v5578_v31 = vpop.eup %5577 }
 0x14d   : > { %v317_v55 = vsub.f32 1.0, %v5578_v31 }
 0x1a3   : > { %v308_v32 = vpop.permute.xlu0 %307 }
 0x1a4   : > { %v310_v33 = vmul.f32 %v5578_v31, %v308_v32  ;;  %v5281_v32 = vld [vmem:[#allocation8 + $0x2] ss:$0 sm:$0xff] }
 0x1a6   : > { %312 = vrot.lane.b32.xlu1 %v310_v33, %s5827_s5  ;;  %v5280_v33 = vld [vmem:[#allocation6 + $0x2] ss:$0 sm:$0xff] }
 0x1aa   : > { %323 = vrot.lane.b32.xlu1 %v116_v18, %s5828_s16  ;;  %v5273_v18 = vld [vmem:[%s7325_s4 + $0x40] sm:$0xff] }
 0x1ab   : > { %v5519_v21 = vpack.c.bf16 %v5274_v19, %v5273_v18  ;;  %v5830_v18 = vmov 1966171168  }
 0x1ac   : > { %v863_v19 = vunpack.c.l.s4 %v5830_v18 }
 0x1ad   : > { %5520 = vmatpush3.bf16.msra.mxu1 %v5519_v21 }
 0x1ae   : > { %524 = vrot.lane.b32.xlu1 %v5267_v52, %s5827_s5  ;;  %5521 = vmatprep.subr.bf16.mxu1 %v7336_v4  ;;  %v864_v21 = vunpack.c.0.s8 %v863_v19 }
 0x1b0   : > { %v6162_v24 = vsub.s32 %v864_v21, %v866_v22 }
 0x1b1   : > { %5523 = vmatpush3.bf16.msra.mxu1 %v5522_v27 }
 0x1b2   : > { %513 = vrot.lane.b32.xlu1 %v5266_v53, %s5827_s5  ;;  %5530 = vmatprep.subr.bf16.mxu1 %v7336_v4 }
 0x1b4   : > { %5424 = vmatmul.mubr.msk.f32.vlgmr.msra.gmra.mrb[4].mxu1 %vm103_vm0, %v556_v30 }
 0x1b5   : > { %5445 = vmatprep.mubr.msk.f32.mxu1 %vm5825_vm1, %v7337_v12 }
 0x218   : > { %v313_v36 = vpop.permute.xlu1 %312 }
 0x219   : > { %v315_v37 = vadd.f32 %v313_v36, %v295_v35 }
 0x21b   : > { %5579 = vtanh.f32 %v315_v37 }
 0x21c   : > { %v324_v54 = vpop.permute.xlu1 %323 }
 0x21d   : > { %v326_v57 = vmul.f32 %v5578_v31, %v324_v54 }
 0x220   : > { %v525_v62 = vpop.permute.xlu1 %524 }
 0x221   : > { %v527_v63 = vadd.f32 %v525_v62, %v486_v60  ;;  %v779_v62 = vld [vmem:[%s7329_s8 + $0x10] sm:$0xff] }
 0x224   : > { %v514_v14 = vpop.permute.xlu1 %513 }
 0x225   : > { %v5580_v51 = vpop.eup %5579 }
 0x226   : > { %319 = vrot.lane.b32.xlu0 %v5580_v51, %s5829_s24 }
 0x287   : > { %v708_v40 = vpop.f32.mrb[4].mxu1 }
 0x288   : > { %v5425_v41 = vpop.f32.mrb[5].mxu1 }
 0x298   : > { %v320_v56 = vpop.permute.xlu0 %319 }
 0x299   : > { %v322_v58 = vmul.f32 %v320_v56, %v317_v55 }
 0x29b   : > { %v327_v59 = vadd.f32 %v326_v57, %v322_v58 }
 0x29d   : > { %329 = vrot.lane.b32.xlu0 %v327_v59, %s5829_s24 }
 0x2a1   : > { %529 = vrot.lane.b32.xlu0 %v527_v63, %s5827_s5 }
 0x30f   : > { %v330_v0 = vpop.permute.xlu0 %329 }
 0x310   : > { %332 = vst.msk [vmem:[#allocation2] sm:$0xff] %vm103_vm0, %v330_v0  ;;  %5391 = vmatmul.mubr.msk.f32.vlgmr.msra.gmra.mrb[2].mxu0 %vm103_vm0, %v330_v0  ;;  %v780_v0 = vld [vmem:[%s7329_s8 + $0x18] sm:$0xff] }
 0x311   : > { %5412 = vmatprep.mubr.msk.f32.mxu0 %vm5825_vm1, %v7337_v12  ;;  %5514 = vmatpush3.bf16.msra.mxu0 %v5513_v28 }
 0x312   : > { %5515 = vmatprep.subr.bf16.mxu0 %v7336_v4 }
 0x313   : > { %v530_v10 = vpop.permute.xlu0 %529 }
 0x315   : > { %5517 = vmatpush3.bf16.msra.mxu0 %v5516_v29 }
 0x316   : > { %5524 = vmatprep.subr.bf16.mxu0 %v7336_v4 }
 0x3e3   : > { %v408_v1 = vpop.f32.mrb[2].mxu0 }
 0x3e4   : > { %v490_v3 = vadd.f32 %v486_v60, %v408_v1  ;;  %v5392_v5 = vpop.f32.mrb[3].mxu0  ;;  %v516_v15 = vadd.f32 %v514_v14, %v408_v1  ;;  %v777_v60 = vld [vmem:[%s7329_s8] sm:$0xff]  ;;  %v5528_v1 = vpack.c.bf16 %v780_v0, %v779_v62  ;;  %v1288_v14 = vld [vmem:[%s7333_s12 + $0x10] sm:$0xff] }
 0x3e5   : > { %v5525_v63 = vpack.c.bf16 %v778_v61, %v777_v60 }
 0x3e6   : > { %v499_v6 = vadd.f32 %v5264_v2, %v490_v3 }
 0x3e8   : > { %v5265_v7 = vmul.f32 -1.442695, %v499_v6 }
 0x3ea   : > { %5581 = vpow2.f32 %v5265_v7 }
 0x3f4   : > { %v5582_v8 = vpop.eup %5581 }
 0x3f5   : > { %v503_v9 = vadd.f32 1.0, %v5582_v8 }
 0x3f7   : > { %5583 = vrcp.f32 %v503_v9 }
 0x401   : > { %v5584_v11 = vpop.eup %5583 }
 0x402   : > { %v532_v13 = vmul.f32 %v5584_v11, %v530_v10  ;;  %v539_v35 = vsub.f32 1.0, %v5584_v11 }
 0x404   : > { %534 = vrot.lane.b32.xlu0 %v532_v13, %s5827_s5  ;;  %v1287_v13 = vld [vmem:[%s7333_s12 + $0x8] sm:$0xff] }
 0x408   : > { %545 = vrot.lane.b32.xlu0 %v334_v50, %s5828_s16 }
 0x40c   : > { %746 = vrot.lane.b32.xlu0 %v5281_v32, %s5827_s5 }
 0x410   : > { %735 = vrot.lane.b32.xlu0 %v5280_v33, %s5827_s5 }
 0x476   : > { %v535_v16 = vpop.permute.xlu0 %534 }
 0x477   : > { %v537_v17 = vadd.f32 %v535_v16, %v516_v15  ;;  %v1289_v16 = vld [vmem:[%s7333_s12 + $0x18] sm:$0xff] }
 0x479   : > { %5585 = vtanh.f32 %v537_v17  ;;  %v5534_v17 = vpack.c.bf16 %v1289_v16, %v1288_v14 }
 0x47a   : > { %v546_v34 = vpop.permute.xlu0 %545 }
 0x47b   : > { %v548_v37 = vmul.f32 %v5584_v11, %v546_v34  ;;  %v1286_v11 = vld [vmem:[%s7333_s12] sm:$0xff] }
 0x47c   : > { %v5531_v15 = vpack.c.bf16 %v1287_v13, %v1286_v11 }
 0x47e   : > { %v747_v42 = vpop.permute.xlu0 %746  ;;  %5532 = vmatpush3.bf16.msra.mxu1 %v5531_v15 }
 0x47f   : > { %v749_v43 = vadd.f32 %v747_v42, %v708_v40  ;;  %5533 = vmatprep.subr.bf16.mxu1 %v7336_v4 }
 0x482   : > { %v736_v56 = vpop.permute.xlu0 %735  ;;  %5535 = vmatpush3.bf16.msra.mxu1 %v5534_v17 }
 0x483   : > { %v5586_v31 = vpop.eup %5585  ;;  %5536 = vmatprep.subr.bf16.mxu1 %v7336_v4 }
 0x484   : > { %541 = vrot.lane.b32.xlu1 %v5586_v31, %s5829_s24 }
 0x4f6   : > { %v542_v36 = vpop.permute.xlu1 %541 }
 0x4f7   : > { %v544_v38 = vmul.f32 %v542_v36, %v539_v35 }
 0x4f9   : > { %v549_v39 = vadd.f32 %v548_v37, %v544_v38  ;;  %v910_v38 = vld [vmem:[%s7322_s1] sm:$0x1f] }
 0x4fb   : > { %551 = vrot.lane.b32.xlu1 %v549_v39, %s5829_s24 }
 0x4ff   : > { %751 = vrot.lane.b32.xlu1 %v749_v43, %s5827_s5  ;;  %v911_v43 = vld [vmem:[%s7322_s1 + $0x8] sm:$0x1f] }
 0x56d   : > { %v552_v44 = vpop.permute.xlu1 %551 }
 0x56e   : > { %554 = vst.msk [vmem:[#allocation2 + $0x8] sm:$0xff] %vm103_vm0, %v552_v44  ;;  %5413 = vmatmul.mubr.msk.f32.vlgmr.msra.gmra.mrb[4].mxu0 %vm103_vm0, %v552_v44  ;;  %v912_v44 = vld [vmem:[%s7322_s1 + $0x10] sm:$0x1f] }
 0x56f   : > { %5434 = vmatprep.mubr.msk.f32.mxu0 %vm5825_vm1, %v7337_v12  ;;  %5526 = vmatpush3.bf16.msra.mxu0 %v5525_v63 }
 0x570   : > { %5527 = vmatprep.subr.bf16.mxu0 %v7336_v4 }
 0x571   : > { %v752_v53 = vpop.permute.xlu1 %751 }
 0x573   : > { %5529 = vmatpush3.bf16.msra.mxu0 %v5528_v1 }
 0x574   : > { %5460 = vmatprep.subr.mxu0 %v7337_v12 }
 0x641   : > { %v630_v45 = vpop.f32.mrb[4].mxu0 }
 0x642   : > { %v712_v47 = vadd.f32 %v708_v40, %v630_v45  ;;  %v5414_v48 = vpop.f32.mrb[5].mxu0  ;;  %v738_v57 = vadd.f32 %v736_v56, %v630_v45  ;;  %v914_v45 = vld [vmem:[%s7322_s1 + $0x20] sm:$0x1f] }
 0x643   : > { %v915_v48 = vld [vmem:[%s7322_s1 + $0x28] sm:$0x1f] }
 0x644   : > { %v721_v49 = vadd.f32 %v5278_v46, %v712_v47  ;;  %v913_v47 = vld [vmem:[%s7322_s1 + $0x18] sm:$0x1f] }
 0x646   : > { %v5279_v50 = vmul.f32 -1.442695, %v721_v49  ;;  %v916_v49 = vld [vmem:[%s7322_s1 + $0x30] sm:$0x1f] }
 0x648   : > { %5587 = vpow2.f32 %v5279_v50 }
 0x652   : > { %v5588_v51 = vpop.eup %5587 }
 0x653   : > { %v725_v52 = vadd.f32 1.0, %v5588_v51 }
 0x655   : > { %5589 = vrcp.f32 %v725_v52 }
 0x65f   : > { %v5590_v54 = vpop.eup %5589 }
 0x660   : > { %v754_v55 = vmul.f32 %v5590_v54, %v752_v53  ;;  %v761_v5 = vsub.f32 1.0, %v5590_v54 }
 0x662   : > { %756 = vrot.lane.b32.xlu1 %v754_v55, %s5827_s5  ;;  %s5217_s5 = scalar_lea.vmem [#allocation11], %s5247_s28 }
 0x666   : > { %767 = vrot.lane.b32.xlu1 %v556_v30, %s5828_s16  ;;  %v920_v30 = vsub.s32 0, %v866_v22  ;;  %s5831_s16 = smov (%p109_p4), [#allocation11]  }
 0x667   :  { %s5224_s15 = sshll.u32 (%p109_p4), %s5831_s16, 4  ;;  %s5225_s15 = int_to_ptr.vmem [resolvable:$true] %s5224_s15 }
 0x668   :  { %s5777_s23 = scalar_lea.vmem (%p109_p4), %s5225_s15, 768  ;;  %p5782_p6 = scmp.lt.s32.totalorder (%p109_p4), %s5225_s15, %s5225_s15 }
 0x669   :  { %p5778_p5 = scmp.ne.s32.totalorder (%p109_p4), %s5225_s15, %s5777_s23  ;;  %p5783_p7 = scmp.lt.s32.totalorder (%p109_p4), %s5777_s23, %s5777_s23 }
 0x66b   :  { %p5784_p8 = por (%p109_p4), %p5783_p7, %p5782_p6 }
 0x66d   :  { %p5785_p9 = pnand (%p109_p4), %p5784_p8, %p5778_p5 }
 0x6d4   : > { %v757_v58 = vpop.permute.xlu1 %756 }
 0x6d5   : > { %v759_v59 = vadd.f32 %v757_v58, %v738_v57  ;;  %v917_v57 = vld [vmem:[%s7322_s1 + $0x38] sm:$0x1f] }
 0x6d7   : > { %5591 = vtanh.f32 %v759_v59 }
 0x6d8   : > { %v768_v3 = vpop.permute.xlu1 %767 }
 0x6d9   : > { %v770_v7 = vmul.f32 %v5590_v54, %v768_v3 }
 0x6e1   : > { %v5592_v2 = vpop.eup %5591 }
 0x6e2   : > { %763 = vrot.lane.b32.xlu0 %v5592_v2, %s5829_s24 }
 0x754   : > { %v764_v6 = vpop.permute.xlu0 %763 }
 0x755   : > { %v766_v8 = vmul.f32 %v764_v6, %v761_v5 }
 0x757   : > { %v771_v9 = vadd.f32 %v770_v7, %v766_v8 }
 0x759   : > { %773 = vrot.lane.b32.xlu0 %v771_v9, %s5829_s24 }
 0x7cb   : > { %v774_v10 = vpop.permute.xlu0 %773 }
 0x7cc   : > { %776 = vst.msk [vmem:[#allocation2 + $0x10] sm:$0xff] %vm103_vm0, %v774_v10  ;;  %5435 = vmatmul.mubr.msk.f32.vlgmr.msra.gmra.mrb[6].mxu0 %vm103_vm0, %v774_v10 }
 0x7cd   : > { %5462 = vmatprep.mubr.msk.f32.mxu0 %vm5825_vm1, %v7337_v12 }
 0x89f   : > { %v856_v25 = vpop.f32.mrb[6].mxu0 }
 0x8a0   : > { %v857_v26 = vadd.f32 %v5282_v23, %v856_v25  ;;  %v5436_v27 = vpop.f32.mrb[7].mxu0 }
 0x8a2   : > { %v861_v28 = vcombine.high %v857_v26, %v857_v26  ;;  %v868_v29 = vrot.slane %v857_v26, %v6162_v24 }
 0x8a4   : > { %v875_v31 = vrot.slane %v861_v28, %v6162_v24  ;;  %v876_v32 = vcombine.high %v868_v29, %v868_v29  ;;  %v884_v33 = vrot.slane %v868_v29, %v6162_v24 }
 0x8a6   : > { %v877_v34 = vcombine.high %v875_v31, %v875_v31  ;;  %v891_v35 = vrot.slane %v875_v31, %v6162_v24  ;;  %v898_v36 = vrot.slane %v876_v32, %v6162_v24  ;;  %v906_v37 = vcombine.high %v884_v33, %v884_v33 }
 0x8a7   : > { %v921_v39 = vrot.slane %v884_v33, %v920_v30 }
 0x8a8   : > { %v905_v40 = vrot.slane %v877_v34, %v6162_v24  ;;  %v907_v41 = vcombine.high %v891_v35, %v891_v35  ;;  %v908_v42 = vcombine.high %v898_v36, %v898_v36  ;;  %v925_v46 = vrot.slane %v898_v36, %v920_v30 }
 0x8a9   : > { %v929_v50 = vrot.slane %v906_v37, %v920_v30  ;;  %v937_v51 = vrot.slane %v891_v35, %v920_v30  ;;  %v958_v52 = vmul.f32 %v921_v39, %v910_v38 }
 0x8aa   : > { %v909_v53 = vcombine.high %v905_v40, %v905_v40  ;;  %v933_v54 = vrot.slane %v908_v42, %v920_v30  ;;  %v941_v55 = vrot.slane %v905_v40, %v920_v30  ;;  %v945_v56 = vrot.slane %v907_v41, %v920_v30 }
 0x8ab   : > { %v959_v58 = vmul.f32 %v925_v46, %v911_v43  ;;  %v960_v59 = vmul.f32 %v929_v50, %v912_v44  ;;  %v962_v60 = vmul.f32 %v937_v51, %v914_v45  ;;  %v974_v61 = vcombine.high %v958_v52, %v958_v52 }
 0x8ac   : > { %v949_v62 = vrot.slane %v909_v53, %v920_v30  ;;  %v961_v63 = vmul.f32 %v933_v54, %v913_v47  ;;  %v6194_v0 = vmul.f32 %v941_v55, %v915_v48  ;;  %v6196_v1 = vmul.f32 %v945_v56, %v916_v49 }
 0x8ad   : > { %v981_v2 = vrot.slane %v958_v52, %v6162_v24  ;;  %v988_v3 = vrot.slane %v974_v61, %v6162_v24  ;;  %v1013_v5 = vcombine.high %v959_v58, %v959_v58  ;;  %v1020_v6 = vrot.slane %v959_v58, %v6162_v24 }
 0x8ae   : > { %v6201_v7 = vmul.f32 %v949_v62, %v917_v57  ;;  %v1052_v8 = vcombine.high %v960_v59, %v960_v59  ;;  %v1059_v9 = vrot.slane %v960_v59, %v6162_v24  ;;  %v1091_v10 = vcombine.high %v961_v63, %v961_v63 }
 0x8af   : > { %v989_v11 = vcombine.high %v981_v2, %v981_v2  ;;  %v996_v13 = vrot.slane %v981_v2, %v6162_v24  ;;  %v1003_v14 = vrot.slane %v988_v3, %v6162_v24  ;;  %v1027_v15 = vrot.slane %v1013_v5, %v6162_v24 }
 0x8b0   : > { %v1028_v16 = vcombine.high %v1020_v6, %v1020_v6  ;;  %v1035_v17 = vrot.slane %v1020_v6, %v6162_v24  ;;  %v1066_v18 = vrot.slane %v1052_v8, %v6162_v24  ;;  %v1067_v19 = vcombine.high %v1059_v9, %v1059_v9 }
 0x8b1   : > { %v1010_v20 = vrot.slane %v989_v11, %v6162_v24  ;;  %v1098_v21 = vrot.slane %v961_v63, %v6162_v24  ;;  %v1130_v22 = vcombine.high %v962_v60, %v962_v60  ;;  %v1137_v23 = vrot.slane %v962_v60, %v6162_v24 }
 0x8b2   : > { %v1049_v25 = vrot.slane %v1028_v16, %v6162_v24  ;;  %v1050_v26 = vcombine.high %v1035_v17, %v1035_v17  ;;  %v1169_v27 = vcombine.high %v6194_v0, %v6194_v0  ;;  %v1176_v28 = vrot.slane %v6194_v0, %v6162_v24 }
 0x8b3   : > { %v6218_v29 = vrot.slane %v1130_v22, %v6162_v24  ;;  %v1145_v30 = vcombine.high %v1137_v23, %v1137_v23  ;;  %v1208_v31 = vcombine.high %v6196_v1, %v6196_v1  ;;  %v6224_v32 = vrot.slane %v6196_v1, %v6162_v24 }
 0x8b4   : > { %v1247_v33 = vcombine.high %v6201_v7, %v6201_v7  ;;  %v1290_v34 = vcombine.low %v996_v13, %v1010_v20  ;;  %v5284_v35 = vcombine.high %v996_v13, %v1010_v20  ;;  %v1292_v36 = vcombine.low %v1003_v14, %v1035_v17 }
 0x8b5   : > { %v1293_v37 = vcombine.low %v1049_v25, %v1050_v26  ;;  %v1042_v38 = vrot.slane %v1027_v15, %v6162_v24  ;;  %v1051_v39 = vcombine.high %v1049_v25, %v1049_v25  ;;  %v1074_v40 = vrot.slane %v1059_v9, %v6162_v24 }
 0x8b6   : > { %v1300_v41 = vrot.slane %v1290_v34, %v6162_v24  ;;  %v1307_v42 = vrot.slane %v5284_v35, %v6162_v24  ;;  %v1314_v43 = vrot.slane %v1292_v36, %v6162_v24  ;;  %v1081_v44 = vrot.slane %v1066_v18, %v6162_v24 }
 0x8b7   : > { %v1321_v45 = vrot.slane %v1293_v37, %v6162_v24  ;;  %v1088_v46 = vrot.slane %v1067_v19, %v6162_v24  ;;  %v1113_v47 = vrot.slane %v1098_v21, %v6162_v24  ;;  %v1339_v48 = vcombine.low %v1051_v39, %v1042_v38 }
 0x8b8   : > { %v1322_v49 = vcombine.low %v1300_v41, %v1307_v42  ;;  %v1105_v50 = vrot.slane %v1091_v10, %v6162_v24  ;;  %v1106_v51 = vcombine.high %v1098_v21, %v1098_v21  ;;  %v1152_v52 = vrot.slane %v1137_v23, %v6162_v24 }
 0x8b9   : > { %v1323_v53 = vcombine.low %v1314_v43, %v1321_v45  ;;  %v1340_v54 = vcombine.low %v1074_v40, %v1088_v46  ;;  %v5285_v55 = vcombine.high %v1074_v40, %v1088_v46  ;;  %v1342_v56 = vcombine.low %v1081_v44, %v1113_v47 }
 0x8ba   : > { %v1330_v57 = vrot.slane %v1322_v49, %v6162_v24  ;;  %v1349_v58 = vrot.slane %v1339_v48, %v6162_v24  ;;  %v1120_v59 = vrot.slane %v1105_v50, %v6162_v24  ;;  %v1127_v60 = vrot.slane %v1106_v51, %v6162_v24 }
 0x8bb   : > { %v1337_v61 = vrot.slane %v1323_v53, %v6162_v24  ;;  %v1356_v62 = vrot.slane %v1340_v54, %v6162_v24  ;;  %v1363_v63 = vrot.slane %v5285_v55, %v6162_v24  ;;  %v1370_v0 = vrot.slane %v1342_v56, %v6162_v24 }
 0x8bc   : > { %v1128_v2 = vcombine.high %v1113_v47, %v1113_v47  ;;  %v1129_v3 = vcombine.high %v1127_v60, %v1127_v60  ;;  %v1166_v5 = vrot.slane %v1145_v30, %v6162_v24  ;;  %v1159_v6 = vrot.slane %v6218_v29, %v6162_v24 }
 0x8bd   : > { %v1338_v8 = vcombine.low %v1330_v57, %v1337_v61  ;;  %v1371_v9 = vcombine.low %v1349_v58, %v1356_v62  ;;  %v1372_v10 = vcombine.low %v1363_v63, %v1370_v0  ;;  %v1183_v11 = vrot.slane %v1169_v27, %v6162_v24 }
 0x8be   : > { %v1388_v13 = vcombine.low %v1127_v60, %v1128_v2  ;;  %v1389_v14 = vcombine.low %v1129_v3, %v1120_v59  ;;  %v1390_v15 = vcombine.low %v1152_v52, %v1166_v5  ;;  %v5286_v16 = vcombine.high %v1152_v52, %v1166_v5 }
 0x8bf   : > { %5446 = vmatmul.mubr.msk.f32.vlgmr.msra.gmra.mrb[6].mxu1 %vm103_vm0, %v1338_v8  ;;  %v1379_v17 = vrot.slane %v1371_v9, %v6162_v24  ;;  %v1386_v18 = vrot.slane %v1372_v10, %v6162_v24  ;;  %v1184_v19 = vcombine.high %v1176_v28, %v1176_v28  ;;  %v1191_v20 = vrot.slane %v1176_v28, %v6162_v24 }
 0x8c0   : > { %5448 = vmatprep.mubr.msk.f32.mxu1 %vm5825_vm1, %v7337_v12  ;;  %v1398_v21 = vrot.slane %v1388_v13, %v6162_v24  ;;  %v1405_v22 = vrot.slane %v1389_v14, %v6162_v24  ;;  %v1412_v23 = vrot.slane %v1390_v15, %v6162_v24  ;;  %v1419_v25 = vrot.slane %v5286_v16, %v6162_v24 }
 0x8c1   : > { %v1387_v26 = vcombine.low %v1379_v17, %v1386_v18  ;;  %v1198_v27 = vrot.slane %v1183_v11, %v6162_v24  ;;  %v1205_v29 = vrot.slane %v1184_v19, %v6162_v24  ;;  %v1206_v30 = vcombine.high %v1191_v20, %v1191_v20 }
 0x8c2   : > { %v1420_v34 = vcombine.low %v1398_v21, %v1405_v22  ;;  %v1421_v35 = vcombine.low %v1412_v23, %v1419_v25  ;;  %v1223_v28 = vcombine.high %v6224_v32, %v6224_v32  ;;  %v1230_v36 = vrot.slane %v6224_v32, %v6162_v24 }
 0x8c3   : > { %5449 = vmatmul.mubr.msk.f32.gmra.mrb[8].mxu1 %vm103_vm0, %v1387_v26  ;;  %v1207_v37 = vcombine.high %v1205_v29, %v1205_v29  ;;  %v1437_v38 = vcombine.low %v1159_v6, %v1191_v20  ;;  %v1438_v39 = vcombine.low %v1205_v29, %v1206_v30  ;;  %v1222_v40 = vrot.slane %v1208_v31, %v6162_v24 }
 0x8c4   : > { %5451 = vmatprep.mubr.msk.f32.mxu1 %vm5825_vm1, %v7337_v12  ;;  %v1428_v41 = vrot.slane %v1420_v34, %v6162_v24  ;;  %v1435_v42 = vrot.slane %v1421_v35, %v6162_v24  ;;  %v1244_v43 = vrot.slane %v1223_v28, %v6162_v24  ;;  %v1254_v32 = vrot.slane %v6201_v7, %v6162_v24 }
 0x8c5   : > { %v1439_v44 = vcombine.low %v1207_v37, %v1198_v27  ;;  %v1447_v45 = vrot.slane %v1437_v38, %v6162_v24  ;;  %v1454_v46 = vrot.slane %v1438_v39, %v6162_v24  ;;  %v1237_v1 = vrot.slane %v1222_v40, %v6162_v24 }
 0x8c6   : > { %v1436_v31 = vcombine.low %v1428_v41, %v1435_v42  ;;  %v1440_v47 = vcombine.low %v1230_v36, %v1244_v43  ;;  %v1261_v48 = vrot.slane %v1247_v33, %v6162_v24  ;;  %v1262_v49 = vcombine.high %v1254_v32, %v1254_v32 }
 0x8c7   : > { %v1461_v50 = vrot.slane %v1439_v44, %v6162_v24  ;;  %v1269_v51 = vrot.slane %v1254_v32, %v6162_v24  ;;  %v5287_v52 = vcombine.high %v1230_v36, %v1244_v43  ;;  %v1469_v54 = vcombine.low %v1447_v45, %v1454_v46 }
 0x8c8   : > { %5452 = vmatmul.mubr.msk.f32.gmra.mrb[10].mxu1 %vm103_vm0, %v1436_v31  ;;  %v1468_v53 = vrot.slane %v1440_v47, %v6162_v24  ;;  %v1283_v55 = vrot.slane %v1262_v49, %v6162_v24  ;;  %v1276_v33 = vrot.slane %v1261_v48, %v6162_v24 }
 0x8c9   : > { %5454 = vmatprep.mubr.msk.f32.mxu1 %vm5825_vm1, %v7337_v12  ;;  %v1284_v56 = vcombine.high %v1269_v51, %v1269_v51  ;;  %v1487_v57 = vcombine.low %v1237_v1, %v1269_v51  ;;  %v1496_v59 = vrot.slane %v5287_v52, %v6162_v24  ;;  %v1477_v62 = vrot.slane %v1469_v54, %v6162_v24 }
 0x8ca   : > { %v1470_v7 = vcombine.low %v1461_v50, %v1468_v53  ;;  %v1285_v58 = vcombine.high %v1283_v55, %v1283_v55 }
 0x8cb   : > { %v1488_v60 = vcombine.low %v1283_v55, %v1284_v56  ;;  %v1503_v61 = vrot.slane %v1487_v57, %v6162_v24 }
 0x8cc   : > { %v1484_v63 = vrot.slane %v1470_v7, %v6162_v24  ;;  %v1489_v0 = vcombine.low %v1285_v58, %v1276_v33 }
 0x8cd   : > { %v1510_v3 = vrot.slane %v1488_v60, %v6162_v24  ;;  %v1518_v6 = vcombine.low %v1496_v59, %v1503_v61 }
 0x8ce   : > { %v1485_v2 = vcombine.low %v1477_v62, %v1484_v63  ;;  %v1517_v5 = vrot.slane %v1489_v0, %v6162_v24 }
 0x8cf   : > { %v1526_v9 = vrot.slane %v1518_v6, %v6162_v24 }
 0x8d0   : > { %5455 = vmatmul.mubr.msk.f32.gmra.mrb[12].mxu1 %vm103_vm0, %v1485_v2  ;;  %v1519_v8 = vcombine.low %v1510_v3, %v1517_v5 }
 0x8d1   : > { %5457 = vmatprep.mubr.msk.f32.mxu1 %vm5825_vm1, %v7337_v12 }
 0x8d2   : > { %v1533_v10 = vrot.slane %v1519_v8, %v6162_v24 }
 0x8d4   : > { %v1534_v11 = vcombine.low %v1526_v9, %v1533_v10 }
 0x8d6   : > { %5458 = vmatmul.mubr.msk.f32.gmra.mrb[14].mxu1 %vm103_vm0, %v1534_v11 }
 0x8d7   : > { %5485 = vmatprep.mubr.msk.f32.mxu1 %vm5825_vm1, %v7337_v12 }
 0x992   : > { %v1611_v13 = vpop.f32.mrb[6].mxu1 }
 0x993   : > { %v1640_v14 = vcombine.high %v1611_v13, %v1611_v13  ;;  %v1647_v15 = vrot.slane %v1611_v13, %v6162_v24  ;;  %v5447_v16 = vpop.f32.mrb[7].mxu1 }
 0x995   : > { %v1654_v17 = vrot.slane %v1640_v14, %v6162_v24  ;;  %v1655_v18 = vcombine.high %v1647_v15, %v1647_v15  ;;  %v6311_v21 = vrot.slane %v1647_v15, %v6162_v24 }
 0x996   : > { %v1616_v19 = vpop.f32.mrb[8].mxu1 }
 0x997   : > { %v1656_v20 = vcombine.high %v1654_v17, %v1654_v17  ;;  %v6314_v22 = vrot.slane %v1654_v17, %v6162_v24  ;;  %v6317_v23 = vrot.slane %v1655_v18, %v6162_v24  ;;  %v5450_v25 = vpop.f32.mrb[9].mxu1  ;;  %v1689_v26 = vcombine.high %v1616_v19, %v1616_v19 }
 0x998   : > { %v1696_v27 = vrot.slane %v1616_v19, %v6162_v24  ;;  %v1685_v46 = vcombine.high %v6311_v21, %v6311_v21 }
 0x999   : > { %v6321_v29 = vrot.slane %v1656_v20, %v6162_v24  ;;  %v6325_v30 = vcombine.high %v6314_v22, %v6314_v22  ;;  %v1925_v34 = vcombine.low %v6311_v21, %v6317_v23  ;;  %v5293_v35 = vcombine.high %v6311_v21, %v6317_v23 }
 0x99a   : > { %v1703_v28 = vrot.slane %v1689_v26, %v6162_v24  ;;  %v1704_v36 = vcombine.high %v1696_v27, %v1696_v27  ;;  %v6340_v40 = vrot.slane %v1696_v27, %v6162_v24  ;;  %v1947_v43 = vrot.slane %v6314_v22, %v6162_v24 }
 0x99b   : > { %v6334_v37 = vcombine.high %v6321_v29, %v6321_v29  ;;  %v1933_v38 = vrot.slane %v1925_v34, %v6162_v24  ;;  %v1964_v39 = vcombine.low %v6321_v29, %v6325_v30  ;;  %v1621_v41 = vpop.f32.mrb[10].mxu1  ;;  %v1940_v42 = vrot.slane %v5293_v35, %v6162_v24 }
 0x99c   : > { %v1705_v32 = vcombine.high %v1703_v28, %v1703_v28  ;;  %v6346_v44 = vrot.slane %v1703_v28, %v6162_v24  ;;  %v5453_v45 = vpop.f32.mrb[11].mxu1  ;;  %v1687_v1 = vcombine.high %v6317_v23, %v6317_v23  ;;  %v6353_v31 = vrot.slane %v1704_v36, %v6162_v24 }
 0x99d   : > { %v1965_v47 = vcombine.low %v6334_v37, %v6340_v40  ;;  %v1948_v48 = vcombine.low %v1933_v38, %v1940_v42  ;;  %v1738_v51 = vcombine.high %v1621_v41, %v1621_v41  ;;  %v1972_v52 = vrot.slane %v1964_v39, %v6162_v24 }
 0x99e   : > { %v6358_v49 = vrot.slane %v1705_v32, %v6162_v24  ;;  %v6362_v50 = vcombine.high %v6346_v44, %v6346_v44  ;;  %v1986_v54 = vrot.slane %v6353_v31, %v6162_v24  ;;  %v5294_v55 = vcombine.high %v6340_v40, %v6353_v31 }
 0x99f   : > { %v1979_v53 = vrot.slane %v1965_v47, %v6162_v24  ;;  %v1955_v56 = vrot.slane %v1948_v48, %v6162_v24  ;;  %v1962_v57 = vrot.slane %v1947_v43, %v6162_v24  ;;  %v1734_v58 = vcombine.high %v6340_v40, %v6340_v40 }
 0x9a0   : > { %v2004_v7 = vcombine.low %v6346_v44, %v6358_v49  ;;  %v2025_v33 = vrot.slane %v6362_v50, %v6162_v24  ;;  %v6380_v60 = vcombine.high %v6358_v49, %v6358_v49  ;;  %v1745_v61 = vrot.slane %v1621_v41, %v6162_v24 }
 0x9a1   : > { %v1987_v59 = vcombine.low %v1972_v52, %v1979_v53  ;;  %v1963_v62 = vcombine.low %v1955_v56, %v1962_v57  ;;  %v2011_v63 = vrot.slane %v5294_v55, %v6162_v24  ;;  %v1752_v2 = vrot.slane %v1738_v51, %v6162_v24 }
 0x9a2   : > { %v2018_v0 = vrot.slane %v2004_v7, %v6162_v24  ;;  %v2001_v5 = vrot.slane %v1986_v54, %v6162_v24  ;;  %v1753_v6 = vcombine.high %v1745_v61, %v1745_v61  ;;  %v6389_v8 = vrot.slane %v1745_v61, %v6162_v24 }
 0x9a3   : > { %v1994_v3 = vrot.slane %v1987_v59, %v6162_v24  ;;  %v1626_v9 = vpop.f32.mrb[12].mxu1  ;;  %v2246_v10 = vsel %vm2245_vm2, %v1963_v62, -inf  ;;  %v2040_v13 = vrot.slane %v2025_v33, %v6162_v24  ;;  %v1754_v14 = vcombine.high %v1752_v2, %v1752_v2 }
 0x9a4   : > { %v2026_v11 = vcombine.low %v2011_v63, %v2018_v0  ;;  %v5456_v15 = vpop.f32.mrb[13].mxu1  ;;  %v2247_v16 = vrot.slane %v2246_v10, 4  ;;  %v6394_v18 = vrot.slane %v1753_v6, %v6162_v24  ;;  %v6398_v19 = vcombine.high %v6389_v8, %v6389_v8 }
 0x9a5   : > { %v2002_v17 = vcombine.low %v1994_v3, %v2001_v5  ;;  %v6402_v25 = vrot.slane %v1752_v2, %v6162_v24  ;;  %v6405_v26 = vrot.slane %v1754_v14, %v6162_v24  ;;  %v2042_v27 = vcombine.low %v6380_v60, %v6389_v8 }
 0x9a6   : > { %v2033_v20 = vrot.slane %v2026_v11, %v6162_v24  ;;  %v2248_v34 = vmax.f32 %v2246_v10, %v2247_v16  ;;  %v6412_v28 = vcombine.high %v6394_v18, %v6394_v18  ;;  %v2043_v36 = vcombine.low %v6394_v18, %v6398_v19 }
 0x9a7   : > { %v2253_v35 = vsel %vm2245_vm2, %v2002_v17, -inf  ;;  %v1736_v38 = vcombine.high %v6353_v31, %v6353_v31  ;;  %v2050_v42 = vrot.slane %v2042_v27, %v6162_v24  ;;  %v2081_v47 = vcombine.low %v6402_v25, %v6405_v26 }
 0x9a8   : > { %v2041_v39 = vcombine.low %v2033_v20, %v2040_v13  ;;  %v2254_v41 = vrot.slane %v2253_v35, 4  ;;  %v2249_v43 = vrot.slane %v2248_v34, 2  ;;  %v2057_v32 = vrot.slane %v2043_v36, %v6162_v24 }
 0x9a9   : > { %v2064_v45 = vrot.slane %v6412_v28, %v6162_v24  ;;  %v6424_v48 = vpop.f32.mrb[14].mxu1  ;;  %v5295_v53 = vcombine.high %v6402_v25, %v6405_v26  ;;  %v1787_v54 = vcombine.high %v1626_v9, %v1626_v9  ;;  %v6431_v61 = vrot.slane %v2081_v47, %v6162_v24 }
 0x9aa   : > { %v2255_v51 = vmax.f32 %v2253_v35, %v2254_v41  ;;  %v2260_v52 = vsel %vm2245_vm2, %v2041_v39, -inf  ;;  %v5459_v55 = vpop.f32.mrb[15].mxu1  ;;  %v2250_v56 = vmax.f32 %v2248_v34, %v2249_v43  ;;  %v2065_v7 = vcombine.low %v2050_v42, %v2057_v32 }
 0x9ab   : > { %v2261_v57 = vrot.slane %v2260_v52, 4  ;;  %v2079_v33 = vrot.slane %v2064_v45, %v6162_v24  ;;  %v6434_v62 = vrot.slane %v5295_v53, %v6162_v24  ;;  %v1794_v63 = vrot.slane %v1626_v9, %v6162_v24 }
 0x9ac   : > { %v2256_v59 = vrot.slane %v2255_v51, 2  ;;  %v2251_v0 = vrot.slane %v2250_v56, 1  ;;  %v2072_v3 = vrot.slane %v2065_v7, %v6162_v24  ;;  %v1801_v5 = vrot.slane %v1787_v54, %v6162_v24 }
 0x9ad   : > { %v2262_v2 = vmax.f32 %v2260_v52, %v2261_v57  ;;  %v1784_v10 = vcombine.high %v6402_v25, %v6402_v25  ;;  %v1802_v11 = vcombine.high %v1794_v63, %v1794_v63  ;;  %v6442_v13 = vrot.slane %v1794_v63, %v6162_v24 }
 0x9ae   : > { %v2257_v6 = vmax.f32 %v2255_v51, %v2256_v59  ;;  %v2252_v14 = vmax.f32 %v2250_v56, %v2251_v0  ;;  %v1786_v16 = vcombine.high %v6405_v26, %v6405_v26  ;;  %v2080_v9 = vcombine.low %v2072_v3, %v2079_v33 }
 0x9af   : > { %v2263_v15 = vrot.slane %v2262_v2, 2  ;;  %v1803_v20 = vcombine.high %v1801_v5, %v1801_v5  ;;  %v6447_v27 = vrot.slane %v1801_v5, %v6162_v24  ;;  %v2104_v34 = vcombine.low %v6431_v61, %v6434_v62 }
 0x9b0   : > { %v2258_v17 = vrot.slane %v2257_v6, 1  ;;  %v2310_v35 = vcombine.high %v2252_v14, %v2252_v14  ;;  %v2317_v36 = vrot.slane %v2252_v14, %v6162_v24  ;;  %v2267_v41 = vsel %vm2245_vm2, %v2080_v9, -inf }
 0x9b1   : > { %v2264_v39 = vmax.f32 %v2262_v2, %v2263_v15  ;;  %v2268_v43 = vrot.slane %v2267_v41, 4  ;;  %v6454_v32 = vrot.slane %v1802_v11, %v6162_v24  ;;  %v6458_v45 = vcombine.high %v6442_v13, %v6442_v13 }
 0x9b2   : > { %v2259_v42 = vmax.f32 %v2257_v6, %v2258_v17  ;;  %v2324_v47 = vrot.slane %v2310_v35, %v6162_v24  ;;  %v2325_v51 = vcombine.high %v2317_v36, %v2317_v36  ;;  %v2332_v52 = vrot.slane %v2317_v36, %v6162_v24 }
 0x9b3   : > { %v2265_v53 = vrot.slane %v2264_v39, 1  ;;  %v6463_v56 = vmax.f32 %v2267_v41, %v2268_v43  ;;  %v6466_v57 = vrot.slane %v1803_v20, %v6162_v24 }
 0x9b4   : > { %v2349_v54 = vcombine.high %v2259_v42, %v2259_v42  ;;  %v2356_v55 = vrot.slane %v2259_v42, %v6162_v24  ;;  %v2339_v7 = vrot.slane %v2324_v47, %v6162_v24  ;;  %v2346_v33 = vrot.slane %v2325_v51, %v6162_v24 }
 0x9b5   : > { %v2347_v59 = vcombine.high %v2332_v52, %v2332_v52  ;;  %v2662_v63 = vsub.f32 %v6311_v21, %v2332_v52  ;;  %v2266_v0 = vmax.f32 %v2264_v39, %v2265_v53  ;;  %v2142_v62 = vrot.slane %v6466_v57, %v6162_v24 }
 0x9b6   : > { %v2363_v2 = vrot.slane %v2349_v54, %v6162_v24  ;;  %v2364_v3 = vcombine.high %v2356_v55, %v2356_v55  ;;  %v2371_v5 = vrot.slane %v2356_v55, %v6162_v24  ;;  %v2348_v6 = vcombine.high %v2346_v33, %v2346_v33 }
 0x9b7   : > { %v2663_v11 = vsub.f32 %v6317_v23, %v2346_v33  ;;  %v2664_v14 = vsub.f32 %v1685_v46, %v2347_v59  ;;  %v2666_v15 = vsub.f32 %v6314_v22, %v2339_v7  ;;  %v2702_v9 = vmul.f32 1.442695, %v2662_v63 }
 0x9b8   : > { %v2378_v17 = vrot.slane %v2363_v2, %v6162_v24  ;;  %v2385_v20 = vrot.slane %v2364_v3, %v6162_v24  ;;  %v2386_v35 = vcombine.high %v2371_v5, %v2371_v5  ;;  %v2665_v36 = vsub.f32 %v1687_v1, %v2348_v6 }
 0x9b9   : > { %v2704_v39 = vmul.f32 1.442695, %v2663_v11  ;;  %v2706_v41 = vmul.f32 1.442695, %v2664_v14  ;;  %v2710_v42 = vmul.f32 1.442695, %v2666_v15  ;;  %5593 = vpow2.f32 %v2702_v9 }
 0x9ba   : > { %v2387_v43 = vcombine.high %v2385_v20, %v2385_v20  ;;  %v2388_v47 = vcombine.high %v2266_v0, %v2266_v0  ;;  %v2395_v21 = vrot.slane %v2266_v0, %v6162_v24  ;;  %v2708_v22 = vmul.f32 1.442695, %v2665_v36 }
 0x9bb   : > { %5595 = vpow2.f32 %v2704_v39  ;;  %v2667_v46 = vsub.f32 %v6321_v29, %v2371_v5  ;;  %v2668_v51 = vsub.f32 %v6325_v30, %v2385_v20  ;;  %v2669_v1 = vsub.f32 %v6334_v37, %v2386_v35 }
 0x9bc   : > { %5597 = vpow2.f32 %v2706_v41  ;;  %v2402_v52 = vrot.slane %v2388_v47, %v6162_v24  ;;  %v2403_v53 = vcombine.high %v2395_v21, %v2395_v21  ;;  %v2410_v23 = vrot.slane %v2395_v21, %v6162_v24 }
 0x9bd   : > { %5599 = vpow2.f32 %v2708_v22  ;;  %v2670_v54 = vsub.f32 %v6340_v40, %v2387_v43  ;;  %v2671_v55 = vsub.f32 %v6353_v31, %v2378_v17  ;;  %v2712_v59 = vmul.f32 1.442695, %v2667_v46 }
 0x9be   : > { %5601 = vpow2.f32 %v2710_v42  ;;  %v2417_v7 = vrot.slane %v2402_v52, %v6162_v24  ;;  %v2424_v29 = vrot.slane %v2403_v53, %v6162_v24  ;;  %v2425_v33 = vcombine.high %v2410_v23, %v2410_v23 }
 0x9bf   : > { %v2672_v30 = vsub.f32 %v1734_v58, %v2410_v23  ;;  %v2714_v63 = vmul.f32 1.442695, %v2668_v51  ;;  %v2716_v0 = vmul.f32 1.442695, %v2669_v1  ;;  %5603 = vpow2.f32 %v2712_v59 }
 0x9c0   : > { %v2426_v2 = vcombine.high %v2424_v29, %v2424_v29  ;;  %v2673_v37 = vsub.f32 %v1736_v38, %v2424_v29  ;;  %v2674_v3 = vsub.f32 %v6346_v44, %v2425_v33  ;;  %v2676_v5 = vsub.f32 %v6362_v50, %v2417_v7 }
 0x9c1   : > { %v2718_v6 = vmul.f32 1.442695, %v2670_v54  ;;  %v2720_v11 = vmul.f32 1.442695, %v2671_v55  ;;  %v6503_v14 = vcombine.high %v6454_v32, %v6454_v32  ;;  %5605 = vpow2.f32 %v2714_v63 }
 0x9c2   : > { %v2675_v40 = vsub.f32 %v6358_v49, %v2426_v2  ;;  %v2722_v58 = vmul.f32 1.442695, %v2672_v30  ;;  %v2724_v15 = vmul.f32 1.442695, %v2673_v37  ;;  %5607 = vpow2.f32 %v2716_v0 }
 0x9c3   : > { %v2726_v9 = vmul.f32 1.442695, %v2674_v3  ;;  %v2730_v31 = vmul.f32 1.442695, %v2676_v5  ;;  %v2270_v38 = vrot.slane %v6463_v56, 2  ;;  %v6507_v44 = vpop.eup %5593  ;;  %5609 = vpow2.f32 %v2718_v6 }
 0x9c4   : > { %v2728_v50 = vmul.f32 1.442695, %v2675_v40  ;;  %v2103_v17 = vrot.slane %v6442_v13, %v6162_v24  ;;  %v2111_v49 = vrot.slane %v2104_v34, %v6162_v24  ;;  %5611 = vpow2.f32 %v2720_v11 }
 0x9c5   : > { %v6515_v20 = vpop.eup %5595  ;;  %v2271_v35 = vmax.f32 %v6463_v56, %v2270_v38  ;;  %v2120_v36 = vcombine.low %v6454_v32, %v6458_v45  ;;  %v2121_v39 = vcombine.low %v6503_v14, %v6447_v27  ;;  %5613 = vpow2.f32 %v2722_v58 }
 0x9c6   : > { %v6522_v41 = vpop.eup %5597  ;;  %v2822_v42 = vcombine.low %v6507_v44, %v6515_v20  ;;  %v2118_v61 = vrot.slane %v2103_v17, %v6162_v24  ;;  %5615 = vpow2.f32 %v2724_v15  ;;  %v6544_v55 = vrot.slane %v2142_v62, %v6162_v24 }
 0x9c7   : > { %v6529_v34 = vpop.eup %5599  ;;  %v2272_v56 = vrot.slane %v2271_v35, 1  ;;  %v2128_v43 = vrot.slane %v2120_v36, %v6162_v24  ;;  %v2135_v47 = vrot.slane %v2121_v39, %v6162_v24  ;;  %5617 = vpow2.f32 %v2726_v9 }
 0x9c8   : > { %v6533_v21 = vpop.eup %5601  ;;  %v2823_v22 = vcombine.low %v6522_v41, %v6529_v34  ;;  %v2119_v51 = vcombine.low %v2111_v49, %v2118_v61  ;;  %5619 = vpow2.f32 %v2728_v50  ;;  %v2830_v1 = vrot.slane %v2822_v42, %v6162_v24 }
 0x9c9   : > { %v2844_v52 = vrot.slane %v6533_v21, %v6162_v24  ;;  %v2273_v53 = vmax.f32 %v2271_v35, %v2272_v56  ;;  %v2143_v23 = vcombine.low %v2128_v43, %v2135_v47  ;;  %5621 = vpow2.f32 %v2730_v31  ;;  %v6546_v7 = vpop.eup %5603 }
 0x9ca   : > { %v2837_v54 = vrot.slane %v2823_v22, %v6162_v24  ;;  %v2274_v2 = vsel %vm2245_vm2, %v2119_v51, -inf  ;;  %v1836_v37 = vcombine.high %v6424_v48, %v6424_v48  ;;  %v6558_v3 = vrot.slane %v6424_v48, %v6162_v24 }
 0x9cb   : > { %v2859_v29 = vrot.slane %v2844_v52, %v6162_v24  ;;  %v2427_v33 = vcombine.high %v2273_v53, %v2273_v53  ;;  %v2434_v30 = vrot.slane %v2273_v53, %v6162_v24  ;;  %v2150_v59 = vrot.slane %v2143_v23, %v6162_v24  ;;  %v6551_v63 = vpop.eup %5605 }
 0x9cc   : > { %v2845_v0 = vcombine.low %v2830_v1, %v2837_v54  ;;  %v6560_v5 = vpop.eup %5607  ;;  %v2861_v6 = vcombine.low %v6546_v7, %v6551_v63  ;;  %v2275_v38 = vrot.slane %v2274_v2, 4  ;;  %v6571_v48 = vrot.slane %v1836_v37, %v6162_v24 }
 0x9cd   : > { %v2441_v11 = vrot.slane %v2427_v33, %v6162_v24  ;;  %v2442_v40 = vcombine.high %v2434_v30, %v2434_v30  ;;  %v2449_v58 = vrot.slane %v2434_v30, %v6162_v24  ;;  %v6566_v15 = vpop.eup %5609  ;;  %v2158_v31 = vcombine.low %v2150_v59, %v6544_v55 }
 0x9ce   : > { %v2852_v9 = vrot.slane %v2845_v0, %v6162_v24  ;;  %v6573_v50 = vpop.eup %5611  ;;  %v2862_v17 = vcombine.low %v6560_v5, %v6566_v15  ;;  %v2869_v49 = vrot.slane %v2861_v6, %v6162_v24 }
 0x9cf   : > { %v2456_v35 = vrot.slane %v2441_v11, %v6162_v24  ;;  %v2463_v36 = vrot.slane %v2442_v40, %v6162_v24  ;;  %v6580_v39 = vpop.eup %5613  ;;  %v2883_v61 = vrot.slane %v6573_v50, %v6162_v24  ;;  %v2464_v62 = vcombine.high %v2449_v58, %v2449_v58 }
 0x9d0   : > { %v2860_v42 = vcombine.low %v2852_v9, %v2859_v29  ;;  %v2677_v56 = vsub.f32 %v6380_v60, %v2449_v58  ;;  %v6585_v43 = vpop.eup %5615  ;;  %v2876_v47 = vrot.slane %v2862_v17, %v6162_v24 }
 0x9d1   : > { %v2465_v22 = vcombine.high %v2463_v36, %v2463_v36  ;;  %v2678_v51 = vsub.f32 %v6389_v8, %v2463_v36  ;;  %v2681_v52 = vsub.f32 %v6412_v28, %v2456_v35  ;;  %v6590_v53 = vpop.eup %5617  ;;  %v2898_v1 = vrot.slane %v2883_v61, %v6162_v24 }
 0x9d2   : > { %v3142_v23 = vsel %vm2245_vm2, %v2860_v42, 0.0  ;;  %v2900_v54 = vcombine.low %v6580_v39, %v6585_v43  ;;  %v2679_v60 = vsub.f32 %v6394_v18, %v2464_v62  ;;  %v6597_v55 = vpop.eup %5619  ;;  %v2884_v33 = vcombine.low %v2869_v49, %v2876_v47 }
 0x9d3   : > { %v3143_v29 = vrot.slane %v3142_v23, 4  ;;  %v2680_v30 = vsub.f32 %v6398_v19, %v2465_v22  ;;  %v2732_v8 = vmul.f32 1.442695, %v2677_v56  ;;  %v6600_v59 = vpop.eup %5621  ;;  %v2901_v28 = vcombine.low %v6590_v53, %v6597_v55 }
 0x9d4   : > { %v2908_v0 = vrot.slane %v2900_v54, %v6162_v24  ;;  %v2734_v37 = vmul.f32 1.442695, %v2678_v51  ;;  %v2736_v6 = vmul.f32 1.442695, %v2679_v60  ;;  %v2891_v40 = vrot.slane %v2884_v33, %v6162_v24 }
 0x9d5   : > { %v3144_v11 = vadd.f32 %v3143_v29, %v3142_v23  ;;  %v2922_v18 = vrot.slane %v6600_v59, %v6162_v24  ;;  %5623 = vpow2.f32 %v2732_v8  ;;  %v2915_v58 = vrot.slane %v2901_v28, %v6162_v24 }
 0x9d6   : > { %5625 = vpow2.f32 %v2734_v37  ;;  %v2738_v19 = vmul.f32 1.442695, %v2680_v30  ;;  %v2740_v9 = vmul.f32 1.442695, %v2681_v52  ;;  %v2899_v49 = vcombine.low %v2891_v40, %v2898_v1 }
 0x9d7   : > { %v3145_v17 = vrot.slane %v3144_v11, 2  ;;  %v2937_v35 = vrot.slane %v2922_v18, %v6162_v24  ;;  %5627 = vpow2.f32 %v2736_v6  ;;  %v2923_v36 = vcombine.low %v2908_v0, %v2915_v58 }
 0x9d8   : > { %5629 = vpow2.f32 %v2738_v19  ;;  %v2276_v42 = vmax.f32 %v2274_v2, %v2275_v38  ;;  %v2281_v61 = vsel %vm2245_vm2, %v2158_v31, -inf  ;;  %v3149_v56 = vsel %vm2245_vm2, %v2899_v49, 0.0 }
 0x9d9   : > { %v3146_v62 = vadd.f32 %v3145_v17, %v3144_v11  ;;  %5631 = vpow2.f32 %v2740_v9  ;;  %v2282_v47 = vrot.slane %v2281_v61, 4  ;;  %v2930_v22 = vrot.slane %v2923_v36, %v6162_v24 }
 0x9da   : > { %v3150_v51 = vrot.slane %v3149_v56, 4  ;;  %v2277_v23 = vrot.slane %v2276_v42, 2  ;;  %v1851_v52 = vcombine.high %v6558_v3, %v6558_v3  ;;  %v1852_v60 = vcombine.high %v6571_v48, %v6571_v48 }
 0x9db   : > { %v3147_v1 = vrot.slane %v3146_v62, 1  ;;  %v2283_v54 = vmax.f32 %v2281_v61, %v2282_v47  ;;  %v6619_v2 = vrot.slane %v6558_v3, %v6162_v24  ;;  %v2938_v31 = vcombine.low %v2930_v22, %v2937_v35 }
 0x9dc   : > { %v3151_v38 = vadd.f32 %v3150_v51, %v3149_v56  ;;  %v2278_v29 = vmax.f32 %v2276_v42, %v2277_v23  ;;  %v6623_v33 = vrot.slane %v6571_v48, %v6162_v24  ;;  %v6626_v28 = vrot.slane %v1851_v52, %v6162_v24 }
 0x9dd   : > { %v3148_v30 = vadd.f32 %v3147_v1, %v3146_v62  ;;  %v2284_v8 = vrot.slane %v2283_v54, 2  ;;  %v6629_v0 = vrot.slane %v1852_v60, %v6162_v24  ;;  %v3156_v6 = vsel %vm2245_vm2, %v2938_v31, 0.0 }
 0x9de   : > { %v3152_v37 = vrot.slane %v3151_v38, 2  ;;  %v5296_v3 = vcombine.high %v6447_v27, %v6466_v57  ;;  %v2279_v11 = vrot.slane %v2278_v29, 1  ;;  %v3157_v48 = vrot.slane %v3156_v6, 4 }
 0x9df   : > { %v6634_v40 = vpop.eup %5623  ;;  %5633 = vrcp.f32 %v3148_v30  ;;  %v2285_v18 = vmax.f32 %v2283_v54, %v2284_v8  ;;  %v6638_v58 = vcombine.high %v6619_v2, %v6619_v2  ;;  %v6644_v49 = vcombine.high %v6623_v33, %v6623_v33 }
 0x9e0   : > { %v6640_v19 = vpop.eup %5625  ;;  %v3153_v9 = vadd.f32 %v3152_v37, %v3151_v38  ;;  %v2280_v17 = vmax.f32 %v2278_v29, %v2279_v11  ;;  %v6648_v35 = vcombine.high %v6626_v28, %v6626_v28  ;;  %v6652_v42 = vadd.f32 %v3157_v48, %v3156_v6 }
 0x9e1   : > { %v6650_v36 = vpop.eup %5627  ;;  %v2939_v61 = vcombine.low %v6634_v40, %v6640_v19  ;;  %v2286_v62 = vrot.slane %v2285_v18, 1  ;;  %v6658_v56 = vcombine.high %v6629_v0, %v6629_v0  ;;  %v2160_v52 = vcombine.low %v6619_v2, %v6626_v28 }
 0x9e2   : > { %v6660_v47 = vpop.eup %5629  ;;  %v3154_v22 = vrot.slane %v3153_v9, 1  ;;  %v2466_v51 = vcombine.high %v2280_v17, %v2280_v17  ;;  %v2473_v23 = vrot.slane %v2280_v17, %v6162_v24  ;;  %v6671_v38 = vrot.slane %v5296_v3, %v6162_v24 }
 0x9e3   : > { %7343 = vst [vmem:[#allocation16_spill] sm:$0xff] %v6660_v47  ;;  %v6665_v1 = vpop.eup %5631  ;;  %v2940_v60 = vcombine.low %v6650_v36, %v6660_v47  ;;  %v2287_v31 = vmax.f32 %v2285_v18, %v2286_v62  ;;  %v2947_v29 = vrot.slane %v2939_v61, %v6162_v24 }
 0x9e4   : > { %v2961_v30 = vrot.slane %v6665_v1, %v6162_v24  ;;  %v2480_v8 = vrot.slane %v2466_v51, %v6162_v24  ;;  %v2481_v37 = vcombine.high %v2473_v23, %v2473_v23  ;;  %v6677_v6 = vadd.f32 %v3154_v22, %v3153_v9 }
 0x9e5   : > { %v2954_v11 = vrot.slane %v2940_v60, %v6162_v24  ;;  %v2488_v48 = vrot.slane %v2473_v23, %v6162_v24  ;;  %v2505_v17 = vcombine.high %v2287_v31, %v2287_v31  ;;  %v2512_v61 = vrot.slane %v2287_v31, %v6162_v24 }
 0x9e6   : > { %v2976_v18 = vrot.slane %v2961_v30, %v6162_v24  ;;  %v2495_v3 = vrot.slane %v2480_v8, %v6162_v24  ;;  %v2502_v62 = vrot.slane %v2481_v37, %v6162_v24 }
 0x9e7   : > { %v2962_v4 = vcombine.low %v2947_v29, %v2954_v11  ;;  %v2503_v12 = vcombine.high %v2488_v48, %v2488_v48  ;;  %v2519_v51 = vrot.slane %v2505_v17, %v6162_v24  ;;  %v2682_v9 = vsub.f32 %v6402_v25, %v2488_v48 }
 0x9e8   : > { %v2504_v22 = vcombine.high %v2502_v62, %v2502_v62  ;;  %v2520_v46 = vcombine.high %v2512_v61, %v2512_v61  ;;  %v2527_v60 = vrot.slane %v2512_v61, %v6162_v24  ;;  %v2683_v23 = vsub.f32 %v6405_v26, %v2502_v62 }
 0x9e9   : > { %v6689_v54 = vpop.eup %5633  ;;  %v2969_v30 = vrot.slane %v2962_v4, %v6162_v24  ;;  %v2534_v8 = vrot.slane %v2519_v51, %v6162_v24  ;;  %v2684_v31 = vsub.f32 %v1784_v10, %v2503_v12  ;;  %v2686_v29 = vsub.f32 %v6442_v13, %v2495_v3 }
 0x9ea   : > { %v2541_v37 = vrot.slane %v2520_v46, %v6162_v24  ;;  %v2542_v11 = vcombine.high %v2527_v60, %v2527_v60  ;;  %v2685_v48 = vsub.f32 %v1786_v16, %v2504_v22  ;;  %v2687_v17 = vsub.f32 %v6454_v32, %v2527_v60 }
 0x9eb   : > { %v2977_v62 = vcombine.low %v2969_v30, %v2976_v18  ;;  %v2691_v4 = vsub.f32 %v6466_v57, %v2534_v8  ;;  %v2742_v61 = vmul.f32 1.442695, %v2682_v9  ;;  %v2744_v51 = vmul.f32 1.442695, %v2683_v23 }
 0x9ec   : > { %v2543_v47 = vcombine.high %v2541_v37, %v2541_v37  ;;  %v2688_v25 = vsub.f32 %v6458_v45, %v2541_v37  ;;  %v2689_v12 = vsub.f32 %v6503_v14, %v2542_v11  ;;  %v2746_v10 = vmul.f32 1.442695, %v2684_v31 }
 0x9ed   : > { %v3163_v13 = vsel %vm2245_vm2, %v2977_v62, 0.0  ;;  %5635 = vpow2.f32 %v2742_v61  ;;  %v2748_v46 = vmul.f32 1.442695, %v2685_v48  ;;  %v2750_v3 = vmul.f32 1.442695, %v2686_v29 }
 0x9ee   : > { %v3164_v26 = vrot.slane %v3163_v13, 4  ;;  %v2690_v16 = vsub.f32 %v6447_v27, %v2543_v47  ;;  %5637 = vpow2.f32 %v2744_v51  ;;  %v2752_v32 = vmul.f32 1.442695, %v2687_v17  ;;  %v3606_v17 = vld [vmem:[%s7334_s13] sm:$0xf] }
 0x9ef   : > { %5639 = vpow2.f32 %v2746_v10  ;;  %v2754_v18 = vmul.f32 1.442695, %v2688_v25  ;;  %v2756_v9 = vmul.f32 1.442695, %v2689_v12  ;;  %v2760_v22 = vmul.f32 1.442695, %v2691_v4  ;;  %5461 = vmatpush3.msk.msra.mxu0 %vm3903_vm3, %v3606_v17 }
 0x9f0   : > { %v3165_v60 = vadd.f32 %v3164_v26, %v3163_v13  ;;  %5641 = vpow2.f32 %v2748_v46  ;;  %v2758_v45 = vmul.f32 1.442695, %v2690_v16  ;;  %v2174_v14 = vrot.slane %v2160_v52, %v6162_v24 }
 0x9f1   : > { %5643 = vpow2.f32 %v2750_v3  ;;  %v2181_v23 = vrot.slane %v6638_v58, %v6162_v24  ;;  %v2198_v30 = vcombine.low %v6648_v35, %v6623_v33  ;;  %v2199_v47 = vcombine.low %v6629_v0, %v6644_v49 }
 0x9f2   : > { %v3166_v8 = vrot.slane %v3165_v60, 2  ;;  %5645 = vpow2.f32 %v2752_v32  ;;  %v2182_v31 = vcombine.low %v6671_v38, %v2174_v14  ;;  %v2220_v29 = vrot.slane %v6658_v56, %v6162_v24 }
 0x9f3   : > { %v7344_v52 = vrot.slane %v6652_v42, 2  ;;  %5647 = vpow2.f32 %v2754_v18  ;;  %v2206_v11 = vrot.slane %v2198_v30, %v6162_v24  ;;  %v2213_v48 = vrot.slane %v2199_v47, %v6162_v24 }
 0x9f4   : > { %v3167_v62 = vadd.f32 %v3166_v8, %v3165_v60  ;;  %5649 = vpow2.f32 %v2756_v9  ;;  %v2189_v38 = vrot.slane %v2182_v31, %v6162_v24  ;;  %v2196_v4 = vrot.slane %v2181_v23, %v6162_v24 }
 0x9f5   : > { %v3160_v37 = vadd.f32 %v7344_v52, %v6652_v42  ;;  %5651 = vpow2.f32 %v2758_v45  ;;  %v2221_v61 = vcombine.low %v2206_v11, %v2213_v48  ;;  %v3214_v42 = vcombine.high %v6689_v54, %v6689_v54 }
 0x9f6   : > { %5653 = vpow2.f32 %v2760_v22  ;;  %v2197_v51 = vcombine.low %v2189_v38, %v2196_v4  ;;  %v2235_v25 = vrot.slane %v2220_v29, %v6162_v24  ;;  %v3221_v12 = vrot.slane %v6689_v54, %v6162_v24 }
 0x9f7   : > { %v6732_v10 = vpop.eup %5635  ;;  %v2228_v13 = vrot.slane %v2221_v61, %v6162_v24  ;;  %5655 = vrcp.f32 %v6677_v6  ;;  %v3228_v46 = vrot.slane %v3214_v42, %v6162_v24  ;;  %v3161_v3 = vrot.slane %v3160_v37, 1 }
 0x9f8   : > { %v6737_v26 = vpop.eup %5637  ;;  %v1835_v16 = vcombine.high %v6466_v57, %v6466_v57  ;;  %v2288_v32 = vsel %vm2245_vm2, %v2197_v51, -inf  ;;  %v3229_v18 = vcombine.high %v3221_v12, %v3221_v12  ;;  %v3236_v9 = vrot.slane %v3221_v12, %v6162_v24 }
 0x9f9   : > { %v6743_v54 = vpop.eup %5639  ;;  %v2978_v22 = vcombine.low %v6732_v10, %v6737_v26  ;;  %v2236_v60 = vcombine.low %v2228_v13, %v2235_v25  ;;  %v2289_v6 = vrot.slane %v2288_v32, 4  ;;  %v3168_v45 = vrot.slane %v3167_v62, 1 }
 0x9fa   : > { %v6747_v14 = vpop.eup %5641  ;;  %v3243_v23 = vrot.slane %v3228_v46, %v6162_v24  ;;  %v3250_v30 = vrot.slane %v3229_v18, %v6162_v24  ;;  %v3251_v47 = vcombine.high %v3236_v9, %v3236_v9  ;;  %v3566_v8 = vmul.f32 %v6507_v44, %v3236_v9 }
 0x9fb   : > { %v6752_v31 = vpop.eup %5643  ;;  %v2979_v29 = vcombine.low %v6743_v54, %v6747_v14  ;;  %v2290_v52 = vmax.f32 %v2288_v32, %v2289_v6  ;;  %v2295_v11 = vsel %vm2245_vm2, %v2236_v60, -inf  ;;  %v3162_v48 = vadd.f32 %v3161_v3, %v3160_v37 }
 0x9fc   : > { %v6757_v17 = vpop.eup %5645  ;;  %v3000_v38 = vrot.slane %v6752_v31, %v6162_v24  ;;  %v2296_v4 = vrot.slane %v2295_v11, 4  ;;  %v3252_v61 = vcombine.high %v3250_v30, %v3250_v30  ;;  %v3567_v42 = vmul.f32 %v6515_v20, %v3250_v30 }
 0x9fd   : > { %v6762_v51 = vpop.eup %5647  ;;  %v2986_v44 = vrot.slane %v2978_v22, %v6162_v24  ;;  %v2993_v25 = vrot.slane %v2979_v29, %v6162_v24  ;;  %v2291_v12 = vrot.slane %v2290_v52, 2  ;;  %v3568_v13 = vmul.f32 %v6522_v41, %v3251_v47 }
 0x9fe   : > { %v6767_v46 = vpop.eup %5649  ;;  %v3017_v37 = vcombine.low %v6757_v17, %v6762_v51  ;;  %v2297_v3 = vmax.f32 %v2295_v11, %v2296_v4  ;;  %v3569_v32 = vmul.f32 %v6529_v34, %v3252_v61  ;;  %v6773_v18 = vmul.f32 %v6533_v21, %v3243_v23 }
 0x9ff   : > { %7345 = vst [vmem:[#allocation17_spill] sm:$0xff] %v6767_v46  ;;  %v6775_v20 = vpop.eup %5651  ;;  %v3001_v9 = vcombine.low %v2986_v44, %v2993_v25  ;;  %v3015_v22 = vrot.slane %v3000_v38, %v6162_v24  ;;  %v2292_v60 = vmax.f32 %v2290_v52, %v2291_v12  ;;  %v3647_v6 = vcombine.low %v3566_v8, %v3567_v42 }
 0xa00   : > { %7346 = vst [vmem:[#allocation18_spill] sm:$0xff] %v6775_v20  ;;  %v6778_v30 = vpop.eup %5653  ;;  %v3018_v41 = vcombine.low %v6767_v46, %v6775_v20  ;;  %v2298_v47 = vrot.slane %v2297_v3, 2  ;;  %v3648_v29 = vcombine.low %v3568_v13, %v3569_v32  ;;  %v6782_v11 = vadd.f32 %v3168_v45, %v3167_v62 }
 0xa01   : > { %7347 = vst [vmem:[#allocation19_spill] sm:$0xff] %v6778_v30  ;;  %v6784_v34 = vpop.eup %5655  ;;  %v3008_v21 = vrot.slane %v3001_v9, %v6162_v24  ;;  %v3025_v23 = vrot.slane %v3017_v37, %v6162_v24  ;;  %v3039_v38 = vrot.slane %v6778_v30, %v6162_v24  ;;  %v2293_v52 = vrot.slane %v2292_v60, 1 }
 0xa02   : > { %v3032_v8 = vrot.slane %v3018_v41, %v6162_v24  ;;  %v2299_v4 = vmax.f32 %v2297_v3, %v2298_v47  ;;  %v3260_v61 = vrot.slane %v6784_v34, %v6162_v24  ;;  %v6794_v42 = vrot.slane %v3648_v29, %v6162_v24 }
 0xa03   : > { %v3016_v62 = vcombine.low %v3008_v21, %v3015_v22  ;;  %v3054_v45 = vrot.slane %v3039_v38, %v6162_v24  ;;  %v2294_v44 = vmax.f32 %v2292_v60, %v2293_v52  ;;  %v6798_v25 = vrot.slane %v3647_v6, %v6162_v24 }
 0xa04   : > { %v3040_v12 = vcombine.low %v3025_v23, %v3032_v8  ;;  %v2300_v13 = vrot.slane %v2299_v4, 1  ;;  %v3268_v37 = vcombine.high %v3260_v61, %v3260_v61  ;;  %5657 = vrcp.f32 %v3162_v48 }
 0xa05   : > { %v3170_v32 = vsel %vm2245_vm2, %v3016_v62, 0.0  ;;  %v2544_v3 = vcombine.high %v2294_v44, %v2294_v44  ;;  %v2551_v9 = vrot.slane %v2294_v44, %v6162_v24  ;;  %v3275_v41 = vrot.slane %v3260_v61, %v6162_v24 }
 0xa06   : > { %v3047_v47 = vrot.slane %v3040_v12, %v6162_v24  ;;  %v3171_v22 = vrot.slane %v3170_v32, 4  ;;  %v2301_v29 = vmax.f32 %v2299_v4, %v2300_v13  ;;  %v6809_v48 = vrot.slane %v3268_v37, %v6162_v24 }
 0xa07   : > { %v2558_v6 = vrot.slane %v2544_v3, %v6162_v24  ;;  %v2559_v21 = vcombine.high %v2551_v9, %v2551_v9  ;;  %v2566_v23 = vrot.slane %v2551_v9, %v6162_v24  ;;  %v7348_v12 = vcombine.high %v6447_v27, %v6447_v27 }
 0xa08   : > { %v3055_v38 = vcombine.low %v3047_v47, %v3054_v45  ;;  %v3172_v52 = vadd.f32 %v3171_v22, %v3170_v32  ;;  %v2583_v8 = vcombine.high %v2301_v29, %v2301_v29  ;;  %v2590_v61 = vrot.slane %v2301_v29, %v6162_v24 }
 0xa09   : > { %v2573_v62 = vrot.slane %v2558_v6, %v6162_v24  ;;  %v2580_v4 = vrot.slane %v2559_v21, %v6162_v24  ;;  %v2581_v44 = vcombine.high %v2566_v23, %v2566_v23  ;;  %v2692_v13 = vsub.f32 %v7348_v12, %v2566_v23 }
 0xa0a   : > { %v3173_v3 = vrot.slane %v3172_v52, 2  ;;  %v3177_v9 = vsel %vm2245_vm2, %v3055_v38, 0.0  ;;  %v2597_v37 = vrot.slane %v2583_v8, %v6162_v24  ;;  %v2598_v60 = vcombine.high %v2590_v61, %v2590_v61 }
 0xa0b   : > { %v3178_v45 = vrot.slane %v3177_v9, 4  ;;  %v2582_v32 = vcombine.high %v2580_v4, %v2580_v4  ;;  %v2605_v47 = vrot.slane %v2590_v61, %v6162_v24  ;;  %v2693_v22 = vsub.f32 %v1835_v16, %v2580_v4 }
 0xa0c   : > { %v3174_v29 = vadd.f32 %v3173_v3, %v3172_v52  ;;  %v2612_v6 = vrot.slane %v2597_v37, %v6162_v24  ;;  %v2619_v27 = vrot.slane %v2598_v60, %v6162_v24  ;;  %v2694_v21 = vsub.f32 %v6619_v2, %v2581_v44 }
 0xa0d   : > { %v3179_v23 = vadd.f32 %v3178_v45, %v3177_v9  ;;  %v2620_v38 = vcombine.high %v2605_v47, %v2605_v47  ;;  %v2695_v8 = vsub.f32 %v6626_v28, %v2582_v32  ;;  %v2696_v12 = vsub.f32 %v6638_v58, %v2573_v62 }
 0xa0e   : > { %v5658_v30 = vpop.eup %5657  ;;  %v3175_v20 = vrot.slane %v3174_v29, 1  ;;  %v2621_v61 = vcombine.high %v2619_v27, %v2619_v27  ;;  %v2697_v46 = vsub.f32 %v6648_v35, %v2605_v47  ;;  %v2698_v57 = vsub.f32 %v6623_v33, %v2619_v27 }
 0xa0f   : > { %v2699_v16 = vsub.f32 %v6629_v0, %v2620_v38  ;;  %v2701_v52 = vsub.f32 %v6658_v56, %v2612_v6  ;;  %v2762_v60 = vmul.f32 1.442695, %v2692_v13  ;;  %v3290_v4 = vcombine.high %v3275_v41, %v3275_v41 }
 0xa10   : > { %v3176_v2 = vadd.f32 %v3175_v20, %v3174_v29  ;;  %v2700_v44 = vsub.f32 %v6644_v49, %v2621_v61  ;;  %v2764_v3 = vmul.f32 1.442695, %v2693_v22  ;;  %v2766_v28 = vmul.f32 1.442695, %v2694_v21 }
 0xa11   : > { %v3180_v9 = vrot.slane %v3179_v23, 2  ;;  %5659 = vpow2.f32 %v2762_v60  ;;  %v2768_v58 = vmul.f32 1.442695, %v2695_v8  ;;  %v2770_v62 = vmul.f32 1.442695, %v2696_v12 }
 0xa12   : > { %5661 = vrcp.f32 %v3176_v2  ;;  %v2772_v37 = vmul.f32 1.442695, %v2697_v46  ;;  %v2774_v35 = vmul.f32 1.442695, %v2698_v57  ;;  %v2776_v45 = vmul.f32 1.442695, %v2699_v16 }
 0xa13   : > { %5663 = vpow2.f32 %v2764_v3  ;;  %v2778_v33 = vmul.f32 1.442695, %v2700_v44  ;;  %v3571_v0 = vmul.f32 %v6546_v7, %v3275_v41  ;;  %v3572_v56 = vmul.f32 %v6551_v63, %v6809_v48 }
 0xa14   : > { %5665 = vpow2.f32 %v2766_v28  ;;  %v2780_v20 = vmul.f32 1.442695, %v2701_v52  ;;  %v3573_v49 = vmul.f32 %v6560_v5, %v3290_v4  ;;  %v3253_v13 = vcombine.high %v6784_v34, %v6784_v34 }
 0xa15   : > { %5667 = vpow2.f32 %v2768_v58  ;;  %v3649_v32 = vcombine.low %v6773_v18, %v3571_v0  ;;  %v3291_v46 = vcombine.high %v6809_v48, %v6809_v48  ;;  %v3292_v47 = vcombine.high %v5658_v30, %v5658_v30 }
 0xa16   : > { %5669 = vpow2.f32 %v2770_v62  ;;  %v3650_v22 = vcombine.low %v3572_v56, %v3573_v49  ;;  %v3267_v7 = vrot.slane %v3253_v13, %v6162_v24  ;;  %v3299_v63 = vrot.slane %v5658_v30, %v6162_v24 }
 0xa17   : > { %5671 = vpow2.f32 %v2772_v37  ;;  %v3671_v41 = vrot.slane %v3649_v32, %v6162_v24  ;;  %v3306_v5 = vrot.slane %v3292_v47, %v6162_v24  ;;  %v3574_v34 = vmul.f32 %v6566_v15, %v3291_v46 }
 0xa18   : > { %5673 = vpow2.f32 %v2774_v35  ;;  %v3678_v18 = vrot.slane %v3650_v22, %v6162_v24  ;;  %v3282_v29 = vrot.slane %v3267_v7, %v6162_v24  ;;  %v3307_v48 = vcombine.high %v3299_v63, %v3299_v63 }
 0xa19   : > { %5675 = vpow2.f32 %v2776_v45  ;;  %v3314_v6 = vrot.slane %v3299_v63, %v6162_v24  ;;  %v3181_v27 = vadd.f32 %v3180_v9, %v3179_v23  ;;  %v7349_v15 = vcombine.low %v6798_v25, %v6794_v42 }
 0xa1a   : > { %5677 = vpow2.f32 %v2778_v33  ;;  %v3680_v21 = vcombine.low %v3671_v41, %v3678_v18  ;;  %v3328_v30 = vrot.slane %v3307_v48, %v6162_v24  ;;  %v3575_v38 = vmul.f32 %v6573_v50, %v3282_v29 }
 0xa1b   : > { %v6852_v8 = vpop.eup %5659  ;;  %5679 = vpow2.f32 %v2780_v20  ;;  %v3687_v12 = vrot.slane %v7349_v15, %v6162_v24  ;;  %v3321_v61 = vrot.slane %v3306_v5, %v6162_v24  ;;  %v3576_v23 = vmul.f32 %v6580_v39, %v3314_v6 }
 0xa1c   : > { %v5662_v57 = vpop.eup %5661  ;;  %v3694_v16 = vrot.slane %v3680_v21, %v6162_v24  ;;  %5681 = vrcp.f32 %v6782_v11  ;;  %v3577_v52 = vmul.f32 %v6585_v43, %v3328_v30  ;;  %v3696_v60 = vcombine.low %v3574_v34, %v3575_v38 }
 0xa1d   : > { %v6863_v50 = vpop.eup %5663  ;;  %v3377_v4 = vrot.slane %v5662_v57, %v6162_v24  ;;  %v3182_v2 = vrot.slane %v3181_v27, 1  ;;  %v3329_v3 = vcombine.high %v3314_v6, %v3314_v6  ;;  %v3330_v35 = vcombine.high %v3328_v30, %v3328_v30 }
 0xa1e   : > { %v6866_v42 = vpop.eup %5665  ;;  %v3056_v25 = vcombine.low %v6852_v8, %v6863_v50  ;;  %v3695_v44 = vcombine.low %v3687_v12, %v3694_v16  ;;  %v3697_v28 = vcombine.low %v3576_v23, %v3577_v52  ;;  %v6873_v39 = vrot.slane %v3696_v60, %v6162_v24 }
 0xa1f   : > { %v6870_v11 = vpop.eup %5667  ;;  %v3385_v43 = vcombine.high %v3377_v4, %v3377_v4  ;;  %v3392_v9 = vrot.slane %v3377_v4, %v6162_v24  ;;  %v3183_v58 = vadd.f32 %v3182_v2, %v3181_v27  ;;  %v6882_v45 = vmul.f32 %v6600_v59, %v3321_v61 }
 0xa20   : > { %v6876_v62 = vpop.eup %5669  ;;  %v3057_v37 = vcombine.low %v6866_v42, %v6870_v11  ;;  %5463 = vmatmul.mubr.msk.f32.vlgmr.msra.gmra.mrb[8].mxu0 %vm3892_vm4, %v3695_v44  ;;  %v6885_v33 = vrot.slane %v3697_v28, %v6162_v24  ;;  %v7350_v20 = vmov 0.0   ;;  %v3064_v59 = vrot.slane %v3056_v25, %v6162_v24 }
 0xa21   : > { %v6887_v0 = vpop.eup %5671  ;;  %v3078_v56 = vrot.slane %v6876_v62, %v6162_v24  ;;  %5465 = vmatprep.mubr.msk.f32.mxu0 %vm5825_vm1, %v7350_v20  ;;  %v3406_v49 = vrot.slane %v3385_v43, %v6162_v24  ;;  %v3407_v13 = vcombine.high %v3392_v9, %v3392_v9  ;;  %v3586_v32 = vmul.f32 %v6732_v10, %v3392_v9 }
 0xa22   : > { %v6895_v46 = vpop.eup %5673  ;;  %v3071_v47 = vrot.slane %v3057_v37, %v6162_v24  ;;  %v3578_v22 = vmul.f32 %v6590_v53, %v3329_v3  ;;  %v3728_v7 = vcombine.low %v6873_v39, %v6885_v33  ;;  %5683 = vrcp.f32 %v3183_v58 }
 0xa23   : > { %v6902_v63 = vpop.eup %5675  ;;  %v3095_v41 = vcombine.low %v6887_v0, %v6895_v46  ;;  %v3408_v5 = vcombine.high %v3406_v49, %v3406_v49  ;;  %v3587_v34 = vmul.f32 %v6737_v26, %v3406_v49  ;;  %v3579_v29 = vmul.f32 %v6597_v55, %v3330_v35 }
 0xa24   : > { %v6907_v10 = vpop.eup %5677  ;;  %v3079_v18 = vcombine.low %v3064_v59, %v3071_v47  ;;  %v3588_v48 = vmul.f32 %v6743_v54, %v3407_v13  ;;  %v3370_v53 = vcombine.high %v5662_v57, %v5662_v57  ;;  %v3093_v27 = vrot.slane %v3078_v56, %v6162_v24 }
 0xa25   : > { %v6911_v6 = vpop.eup %5679  ;;  %v3096_v21 = vcombine.low %v6902_v63, %v6907_v10  ;;  %v3589_v30 = vmul.f32 %v6747_v14, %v3408_v5  ;;  %v3747_v38 = vcombine.low %v3586_v32, %v3587_v34  ;;  %v3103_v12 = vrot.slane %v3095_v41, %v6162_v24 }
 0xa26   : > { %v5682_v26 = vpop.eup %5681  ;;  %v3086_v15 = vrot.slane %v3079_v18, %v6162_v24  ;;  %v3117_v55 = vrot.slane %v6911_v6, %v6162_v24  ;;  %v3384_v54 = vrot.slane %v3370_v53, %v6162_v24  ;;  %v3698_v60 = vcombine.low %v3578_v22, %v3579_v29 }
 0xa27   : > { %v3110_v61 = vrot.slane %v3096_v21, %v6162_v24  ;;  %v3338_v57 = vrot.slane %v5682_v26, %v6162_v24  ;;  %v3331_v16 = vcombine.high %v5682_v26, %v5682_v26  ;;  %v3748_v23 = vcombine.low %v3588_v48, %v3589_v30  ;;  %v7351_v30 = vld [vmem:[#allocation16_spill] sm:$0xff] }
 0xa28   : > { %v3094_v52 = vcombine.low %v3086_v15, %v3093_v27  ;;  %v3132_v14 = vrot.slane %v3117_v55, %v6162_v24  ;;  %v3399_v4 = vrot.slane %v3384_v54, %v6162_v24  ;;  %v3769_v43 = vrot.slane %v3747_v38, %v6162_v24 }
 0xa29   : > { %v3118_v2 = vcombine.low %v3103_v12, %v3110_v61  ;;  %v3353_v25 = vrot.slane %v3338_v57, %v6162_v24  ;;  %v3345_v44 = vrot.slane %v3331_v16, %v6162_v24  ;;  %v3346_v3 = vcombine.high %v3338_v57, %v3338_v57 }
 0xa2a   : > { %v3184_v28 = vsel %vm2245_vm2, %v3094_v52, 0.0  ;;  %v3776_v9 = vrot.slane %v3748_v23, %v6162_v24  ;;  %v3590_v58 = vmul.f32 %v6752_v31, %v3399_v4  ;;  %v3720_v13 = vrot.slane %v3698_v60, %v6162_v24 }
 0xa2b   : > { %v3125_v37 = vrot.slane %v3118_v2, %v6162_v24  ;;  %v3185_v35 = vrot.slane %v3184_v28, 4  ;;  %v3581_v56 = vmul.f32 %v6634_v40, %v3353_v25  ;;  %v3360_v49 = vrot.slane %v3345_v44, %v6162_v24 }
 0xa2c   : > { %v3367_v32 = vrot.slane %v3346_v3, %v6162_v24  ;;  %v3368_v59 = vcombine.high %v3353_v25, %v3353_v25  ;;  %v3778_v47 = vcombine.low %v3769_v43, %v3776_v9  ;;  %v5684_v22 = vpop.eup %5683  ;;  %v7352_v3 = vld [vmem:[#allocation17_spill] sm:$0xff] }
 0xa2d   : > { %v3133_v41 = vcombine.low %v3125_v37, %v3132_v14  ;;  %v3186_v5 = vadd.f32 %v3185_v35, %v3184_v28  ;;  %v3699_v34 = vcombine.low %v6882_v45, %v3581_v56  ;;  %v3585_v31 = vmul.f32 %v6665_v1, %v3360_v49 }
 0xa2e   : > { %v3369_v18 = vcombine.high %v3367_v32, %v3367_v32  ;;  %v3582_v29 = vmul.f32 %v6640_v19, %v3367_v32  ;;  %v3583_v40 = vmul.f32 %v6650_v36, %v3368_v59  ;;  %v3416_v15 = vrot.slane %v5684_v22, %v6162_v24 }
 0xa2f   : > { %v3187_v48 = vrot.slane %v3186_v5, 2  ;;  %v3191_v53 = vsel %vm2245_vm2, %v3133_v41, 0.0  ;;  %v3727_v27 = vrot.slane %v3699_v34, %v6162_v24  ;;  %v3736_v19 = vrot.slane %v3728_v7, %v6162_v24  ;;  %v7353_v41 = vld [vmem:[#allocation18_spill] sm:$0xff] }
 0xa30   : > { %v3192_v21 = vrot.slane %v3191_v53, 4  ;;  %v3584_v38 = vmul.f32 %v7351_v30, %v3369_v18  ;;  %v3745_v26 = vcombine.low %v3582_v29, %v3583_v40  ;;  %v3424_v54 = vcombine.high %v3416_v15, %v3416_v15  ;;  %v7354_v18 = vld [vmem:[#allocation19_spill] sm:$0xff] }
 0xa31   : > { %v3188_v12 = vadd.f32 %v3187_v48, %v3186_v5  ;;  %v3729_v45 = vcombine.low %v3720_v13, %v3727_v27  ;;  %v3431_v57 = vrot.slane %v3416_v15, %v6162_v24  ;;  %v3792_v39 = vrot.slane %v3778_v47, %v6162_v24 }
 0xa32   : > { %v3193_v55 = vadd.f32 %v3192_v21, %v3191_v53  ;;  %v3746_v1 = vcombine.low %v3584_v38, %v3585_v31  ;;  %v3755_v23 = vrot.slane %v3745_v26, %v6162_v24  ;;  %v3445_v14 = vrot.slane %v3424_v54, %v6162_v24 }
 0xa33   : > { %v3189_v61 = vrot.slane %v3188_v12, 1  ;;  %v3743_v36 = vrot.slane %v3729_v45, %v6162_v24  ;;  %v3446_v2 = vcombine.high %v3431_v57, %v3431_v57  ;;  %v3591_v25 = vmul.f32 %v6757_v17, %v3431_v57 }
 0xa34   : > { %v3194_v16 = vrot.slane %v3193_v55, 2  ;;  %v3762_v52 = vrot.slane %v3746_v1, %v6162_v24  ;;  %v3409_v33 = vcombine.high %v5684_v22, %v5684_v22  ;;  %v3592_v7 = vmul.f32 %v6762_v51, %v3445_v14 }
 0xa35   : > { %v3744_v60 = vcombine.low %v3736_v19, %v3743_v36  ;;  %v3190_v4 = vadd.f32 %v3189_v61, %v3188_v12  ;;  %v3593_v28 = vmul.f32 %v7352_v3, %v3446_v2  ;;  %v3794_v43 = vcombine.low %v3590_v58, %v3591_v25 }
 0xa36   : > { %v3777_v44 = vcombine.low %v3755_v23, %v3762_v52  ;;  %v3195_v9 = vadd.f32 %v3194_v16, %v3193_v55  ;;  %v3423_v49 = vrot.slane %v3409_v33, %v6162_v24  ;;  %v3447_v58 = vcombine.high %v3445_v14, %v3445_v14 }
 0xa37   : > { %5466 = vmatmul.mubr.msk.f32.gmra.mrb[10].mxu0 %vm3892_vm4, %v3744_v60  ;;  %5685 = vrcp.f32 %v3190_v4  ;;  %v3795_v35 = vcombine.low %v3592_v7, %v3593_v28  ;;  %v3804_v13 = vrot.slane %v3794_v43, %v6162_v24 }
 0xa38   : > { %5468 = vmatprep.mubr.msk.f32.mxu0 %vm5825_vm1, %v7350_v20  ;;  %v3785_v37 = vrot.slane %v3777_v44, %v6162_v24  ;;  %v3196_v17 = vrot.slane %v3195_v9, 1  ;;  %v3438_v47 = vrot.slane %v3423_v49, %v6162_v24  ;;  %v3594_v5 = vmul.f32 %v7353_v41, %v3447_v58  ;;  %v5112_v49 = vld [vmem:[#allocation9] sm:$0xff]  ;;  %v5115_v58 = vld [vmem:[#allocation9 + $0x18] sm:$0xff] }
 0xa39   : > { %v3811_v51 = vrot.slane %v3795_v35, %v6162_v24 }
 0xa3a   : > { %v3793_v56 = vcombine.low %v3785_v37, %v3792_v39  ;;  %v3197_v32 = vadd.f32 %v3196_v17, %v3195_v9  ;;  %v3595_v29 = vmul.f32 %v7354_v18, %v3438_v47  ;;  %v7355_v47 = vmov 0.0|0.0  }
 0xa3b   : > { %v3826_v59 = vcombine.low %v3804_v13, %v3811_v51  ;;  %v5113_v13 = vld [vmem:[#allocation9 + $0x8] sm:$0xff]  ;;  %v5114_v51 = vld [vmem:[#allocation9 + $0x10] sm:$0xff] }
 0xa3c   : > { %5469 = vmatmul.mubr.msk.f32.gmra.mrb[12].mxu0 %vm3892_vm4, %v3793_v56  ;;  %5687 = vrcp.f32 %v3197_v32  ;;  %v3796_v27 = vcombine.low %v3594_v5, %v3595_v29  ;;  %v5537_v32 = vpack.c.bf16 %v5113_v13, %v5112_v49  ;;  %v4288_v29 = vld [vmem:[%s7323_s2 + $0x8] sm:$0x1f] }
 0xa3d   : > { %5471 = vmatprep.mubr.msk.f32.mxu0 %vm5825_vm1, %v7350_v20  ;;  %v3834_v39 = vrot.slane %v3826_v59, %v6162_v24  ;;  %v5540_v59 = vpack.c.bf16 %v5115_v58, %v5114_v51 }
 0xa3e   : > { %v3818_v54 = vrot.slane %v3796_v27, %v6162_v24  ;;  %5538 = vmatpush3.bf16.msra.mxu1 %v5537_v32 }
 0xa3f   : > { %5539 = vmatprep.subr.bf16.mxu1 %v7355_v47 }
 0xa41   : > { %v5686_v22 = vpop.eup %5685 }
 0xa42   : > { %v3455_v34 = vrot.slane %v5686_v22, %v6162_v24  ;;  %v3448_v31 = vcombine.high %v5686_v22, %v5686_v22  ;;  %5541 = vmatpush3.bf16.msra.mxu1 %v5540_v59 }
 0xa44   : > { %v3463_v40 = vcombine.high %v3455_v34, %v3455_v34  ;;  %v3470_v48 = vrot.slane %v3455_v34, %v6162_v24  ;;  %v3462_v53 = vrot.slane %v3448_v31, %v6162_v24 }
 0xa46   : > { %v3484_v21 = vrot.slane %v3463_v40, %v6162_v24  ;;  %v3596_v30 = vmul.f32 %v6852_v8, %v3470_v48  ;;  %v3477_v38 = vrot.slane %v3462_v53, %v6162_v24  ;;  %v3485_v26 = vcombine.high %v3470_v48, %v3470_v48  ;;  %v5688_v15 = vpop.eup %5687 }
 0xa47   : > { %v3487_v55 = vcombine.high %v5688_v15, %v5688_v15  ;;  %v3494_v1 = vrot.slane %v5688_v15, %v6162_v24 }
 0xa48   : > { %v3597_v12 = vmul.f32 %v6863_v50, %v3484_v21  ;;  %v3486_v45 = vcombine.high %v3484_v21, %v3484_v21  ;;  %v3598_v61 = vmul.f32 %v6866_v42, %v3485_v26  ;;  %v3600_v19 = vmul.f32 %v6876_v62, %v3477_v38 }
 0xa49   : > { %v3501_v57 = vrot.slane %v3487_v55, %v6162_v24  ;;  %v3502_v8 = vcombine.high %v3494_v1, %v3494_v1  ;;  %v3509_v16 = vrot.slane %v3494_v1, %v6162_v24  ;;  %v4349_v26 = vrot.slane %v4288_v29, %v6162_v24 }
 0xa4a   : > { %v3797_v36 = vcombine.low %v3596_v30, %v3597_v12  ;;  %v3599_v23 = vmul.f32 %v6870_v11, %v3486_v45 }
 0xa4b   : > { %v3516_v52 = vrot.slane %v3501_v57, %v6162_v24  ;;  %v3523_v14 = vrot.slane %v3502_v8, %v6162_v24  ;;  %v3524_v60 = vcombine.high %v3509_v16, %v3509_v16  ;;  %v3601_v4 = vmul.f32 %v6887_v0, %v3509_v16 }
 0xa4c   : > { %v3825_v50 = vrot.slane %v3797_v36, %v6162_v24  ;;  %v3843_v42 = vcombine.low %v3598_v61, %v3599_v23  ;;  %v4289_v36 = vld [vmem:[%s7323_s2 + $0x10] sm:$0x1f]  ;;  %v4357_v8 = vcombine.high %v4349_v26, %v4349_v26 }
 0xa4d   : > { %v3525_v62 = vcombine.high %v3523_v14, %v3523_v14  ;;  %v3602_v25 = vmul.f32 %v6895_v46, %v3523_v14  ;;  %v3603_v44 = vmul.f32 %v6902_v63, %v3524_v60  ;;  %v3844_v33 = vcombine.low %v3600_v19, %v3601_v4 }
 0xa4e   : > { %v3827_v2 = vcombine.low %v3818_v54, %v3825_v50  ;;  %v3853_v11 = vrot.slane %v3843_v42, %v6162_v24  ;;  %v3605_v28 = vmul.f32 %v6911_v6, %v3516_v52  ;;  %v4290_v50 = vld [vmem:[%s7323_s2 + $0x18] sm:$0x1f]  ;;  %v4291_v52 = vld [vmem:[%s7323_s2 + $0x20] sm:$0x1f]  ;;  %v4388_v4 = vrot.slane %v4289_v36, %v6162_v24 }
 0xa4f   : > { %v3604_v3 = vmul.f32 %v6907_v10, %v3525_v62  ;;  %v3845_v43 = vcombine.low %v3602_v25, %v3603_v44  ;;  %v3860_v0 = vrot.slane %v3844_v33, %v6162_v24  ;;  %v7034_v42 = vrot.slane %v4349_v26, %v6162_v24 }
 0xa50   : > { %v3841_v7 = vrot.slane %v3827_v2, %v6162_v24  ;;  %v4342_v62 = vcombine.high %v4288_v29, %v4288_v29  ;;  %v4381_v25 = vcombine.high %v4289_v36, %v4289_v36  ;;  %v4427_v44 = vrot.slane %v4290_v50, %v6162_v24 }
 0xa51   : > { %v3846_v37 = vcombine.low %v3604_v3, %v3605_v28  ;;  %v3875_v35 = vcombine.low %v3853_v11, %v3860_v0  ;;  %v3867_v46 = vrot.slane %v3845_v43, %v6162_v24  ;;  %v7039_v11 = vrot.slane %v4357_v8, %v6162_v24 }
 0xa52   : > { %v3842_v9 = vcombine.low %v3834_v39, %v3841_v7  ;;  %v4466_v39 = vrot.slane %v4291_v52, %v6162_v24  ;;  %v4396_v43 = vcombine.high %v4388_v4, %v4388_v4  ;;  %v4420_v0 = vcombine.high %v4290_v50, %v4290_v50 }
 0xa53   : > { %v3874_v63 = vrot.slane %v3846_v37, %v6162_v24  ;;  %v3883_v10 = vrot.slane %v3875_v35, %v6162_v24  ;;  %v7048_v35 = vrot.slane %v4342_v62, %v6162_v24 }
 0xa54   : > { %5472 = vmatmul.mubr.msk.f32.gmra.mrb[14].mxu0 %vm3892_vm4, %v3842_v9  ;;  %v4292_v9 = vld [vmem:[%s7323_s2 + $0x28] sm:$0x1f]  ;;  %v7063_v59 = vrot.slane %v4396_v43, %v6162_v24  ;;  %v7066_v47 = vrot.slane %v4420_v0, %v6162_v24 }
 0xa55   : > { %5474 = vmatprep.mubr.msk.f32.mxu0 %vm5825_vm1, %v7350_v20  ;;  %v3876_v17 = vcombine.low %v3867_v46, %v3874_v63  ;;  %v4287_v20 = vld [vmem:[%s7323_s2] sm:$0x1f]  ;;  %v4379_v46 = vcombine.high %v7034_v42, %v7034_v42  ;;  %v7053_v63 = vrot.slane %v4381_v25, %v6162_v24  ;;  %v4505_v32 = vrot.slane %v4292_v9, %v6162_v24 }
 0xa56   : > { %v4310_v22 = vrot.slane %v4287_v20, %v6162_v24  ;;  %v4303_v5 = vcombine.high %v4287_v20, %v4287_v20  ;;  %v7069_v20 = vrot.slane %v4427_v44, %v6162_v24  ;;  %v4449_v26 = vrot.slane %v7066_v47, %v6162_v24 }
 0xa57   : > { %v3890_v6 = vrot.slane %v3876_v17, %v6162_v24  ;;  %v7056_v17 = vrot.slane %v4388_v4, %v6162_v24 }
 0xa58   : > { %v4318_v41 = vcombine.high %v4310_v22, %v4310_v22  ;;  %v4325_v40 = vrot.slane %v4310_v22, %v6162_v24  ;;  %v4317_v27 = vrot.slane %v4303_v5, %v6162_v24  ;;  %v4371_v22 = vrot.slane %v7048_v35, %v6162_v24 }
 0xa59   : > { %v3891_v56 = vcombine.low %v3883_v10, %v3890_v6  ;;  %v4435_v10 = vcombine.high %v4427_v44, %v4427_v44  ;;  %v4474_v6 = vcombine.high %v4466_v39, %v4466_v39  ;;  %v4410_v5 = vrot.slane %v7053_v63, %v6162_v24 }
 0xa5a   : > { %v4339_v48 = vrot.slane %v4318_v41, %v6162_v24  ;;  %v4340_v45 = vcombine.high %v4325_v40, %v4325_v40  ;;  %v4332_v54 = vrot.slane %v4317_v27, %v6162_v24  ;;  %v4380_v41 = vcombine.high %v7039_v11, %v7039_v11 }
 0xa5b   : > { %5475 = vmatmul.mubr.msk.f32.gmra.mrb[16].mxu0 %vm3892_vm4, %v3891_v56  ;;  %v4459_v56 = vcombine.high %v4291_v52, %v4291_v52  ;;  %v7083_v29 = vrot.slane %v4435_v10, %v6162_v24 }
 0xa5c   : > { %v4341_v55 = vcombine.high %v4339_v48, %v4339_v48 }
 0xaf3   : > { %v3973_v34 = vpop.f32.mrb[8].mxu0 }
 0xaf4   : > { %v4002_v31 = vcombine.high %v3973_v34, %v3973_v34  ;;  %v4009_v18 = vrot.slane %v3973_v34, %v6162_v24  ;;  %v5464_v53 = vpop.f32.mrb[9].mxu0  ;;  %v7078_v34 = vrot.slane %v4466_v39, %v6162_v24 }
 0xaf6   : > { %v4016_v21 = vrot.slane %v4002_v31, %v6162_v24  ;;  %v4017_v30 = vcombine.high %v4009_v18, %v4009_v18  ;;  %v4025_v38 = vrot.slane %v4009_v18, %v6162_v24  ;;  %v4418_v18 = vcombine.high %v7056_v17, %v7056_v17 }
 0xaf8   : > { %v4039_v15 = vrot.slane %v4017_v30, %v6162_v24  ;;  %v4047_v12 = vcombine.high %v4025_v38, %v4025_v38  ;;  %v4032_v1 = vrot.slane %v4016_v21, %v6162_v24  ;;  %v4655_v57 = vmul.f32 %v4325_v40, %v4025_v38 }
 0xaf9   : > { %v4018_v33 = vcombine.high %v4016_v21, %v4016_v21  ;;  %v7086_v40 = vrot.slane %v4474_v6, %v6162_v24  ;;  %v7096_v21 = vrot.slane %v4459_v56, %v6162_v24  ;;  %v4513_v30 = vcombine.high %v4505_v32, %v4505_v32 }
 0xafa   : > { %v4049_v61 = vcombine.high %v4039_v15, %v4039_v15  ;;  %v4656_v19 = vmul.f32 %v4339_v48, %v4039_v15  ;;  %v4657_v16 = vmul.f32 %v4340_v45, %v4047_v12  ;;  %v4659_v14 = vmul.f32 %v4332_v54, %v4032_v1  ;;  %v7091_v48 = vld [vmem:[%s7323_s2 + $0x30] sm:$0x1f] }
 0xafb   : > { %v4046_v49 = vrot.slane %v4018_v33, %v6162_v24  ;;  %v4048_v13 = vcombine.high %v4032_v1, %v4032_v1  ;;  %v4419_v38 = vcombine.high %v7063_v59, %v7063_v59  ;;  %v4457_v15 = vcombine.high %v7069_v20, %v7069_v20 }
 0xafc   : > { %v4658_v23 = vmul.f32 %v4341_v55, %v4049_v61  ;;  %v4735_v60 = vcombine.low %v4655_v57, %v4656_v19  ;;  %v4757_v28 = vrot.slane %v4659_v14, %v6162_v24  ;;  %v4498_v12 = vcombine.high %v4292_v9, %v4292_v9 }
 0xafd   : > { %v4660_v53 = vmul.f32 %v7034_v42, %v4046_v49  ;;  %v4661_v27 = vmul.f32 %v7039_v11, %v4048_v13  ;;  %v4050_v45 = vcombine.high %v4046_v49, %v4046_v49  ;;  %v4496_v1 = vcombine.high %v7078_v34, %v7078_v34 }
 0xafe   : > { %v4736_v2 = vcombine.low %v4657_v16, %v4658_v23  ;;  %v4743_v7 = vrot.slane %v4735_v60, %v6162_v24  ;;  %v4772_v58 = vrot.slane %v4757_v28, %v6162_v24  ;;  %v7107_v54 = vrot.slane %v4505_v32, %v6162_v24 }
 0xaff   : > { %v7111_v61 = vrot.slane %v7091_v48, %v6162_v24  ;;  %v4458_v16 = vcombine.high %v7083_v29, %v7083_v29  ;;  %v4774_v23 = vcombine.low %v4660_v53, %v4661_v27  ;;  %v4497_v50 = vcombine.high %v7086_v40, %v7086_v40 }
 0xb00   : > { %v4750_v3 = vrot.slane %v4736_v2, %v6162_v24  ;;  %v4488_v52 = vrot.slane %v7096_v21, %v6162_v24  ;;  %v7122_v14 = vrot.slane %v4513_v30, %v6162_v24  ;;  %v7127_v2 = vrot.slane %v4498_v12, %v6162_v24 }
 0xb01   : > { %v4662_v25 = vmul.f32 %v4379_v46, %v4050_v45  ;;  %v4535_v44 = vcombine.high %v7107_v54, %v7107_v54  ;;  %v4552_v39 = vcombine.high %v7111_v61, %v7111_v61  ;;  %v7137_v28 = vrot.slane %v7111_v61, %v6162_v24 }
 0xb02   : > { %v4758_v37 = vcombine.low %v4743_v7, %v4750_v3  ;;  %v4782_v9 = vrot.slane %v4774_v23, %v6162_v24 }
 0xb04   : > { %v4765_v51 = vrot.slane %v4758_v37, %v6162_v24 }
 0xb06   : > { %v4773_v31 = vcombine.low %v4765_v51, %v4772_v58 }
 0xb08   : > { %v5056_v19 = vsel %vm5055_vm5, %v4773_v31, 0.0 }
 0xb09   : > { %v5057_v62 = vrot.slane %v5056_v19, 4 }
 0xb0a   : > { %v3978_v55 = vpop.f32.mrb[10].mxu0 }
 0xb0b   : > { %v4051_v36 = vcombine.high %v3978_v55, %v3978_v55  ;;  %v4058_v57 = vrot.slane %v3978_v55, %v6162_v24  ;;  %v5467_v8 = vpop.f32.mrb[11].mxu0  ;;  %v5058_v56 = vadd.f32 %v5057_v62, %v5056_v19 }
 0xb0d   : > { %v4065_v60 = vrot.slane %v4051_v36, %v6162_v24  ;;  %v4066_v4 = vcombine.high %v4058_v57, %v4058_v57  ;;  %v4074_v42 = vrot.slane %v4058_v57, %v6162_v24  ;;  %v5059_v19 = vrot.slane %v5058_v56, 2 }
 0xb0f   : > { %v4067_v33 = vcombine.high %v4065_v60, %v4065_v60  ;;  %v4081_v11 = vrot.slane %v4065_v60, %v6162_v24  ;;  %v4088_v7 = vrot.slane %v4066_v4, %v6162_v24  ;;  %v3983_v3 = vpop.f32.mrb[12].mxu0  ;;  %v4096_v43 = vcombine.high %v4074_v42, %v4074_v42 }
 0xb10   : > { %v4663_v0 = vmul.f32 %v4380_v41, %v4074_v42  ;;  %v4100_v37 = vcombine.high %v3983_v3, %v3983_v3  ;;  %v5470_v35 = vpop.f32.mrb[13].mxu0  ;;  %v4107_v6 = vrot.slane %v3983_v3, %v6162_v24 }
 0xb11   : > { %v4095_v46 = vrot.slane %v4067_v33, %v6162_v24  ;;  %v4097_v63 = vcombine.high %v4081_v11, %v4081_v11  ;;  %v4098_v10 = vcombine.high %v4088_v7, %v4088_v7  ;;  %v4664_v49 = vmul.f32 %v4371_v22, %v4088_v7  ;;  %v4294_v7 = vld [vmem:[%s7323_s2 + $0x38] sm:$0x1f] }
 0xb12   : > { %v4665_v13 = vmul.f32 %v7056_v17, %v4096_v43  ;;  %v4775_v51 = vcombine.low %v4662_v25, %v4663_v0  ;;  %v4667_v31 = vmul.f32 %v4418_v18, %v4081_v11  ;;  %v4114_v12 = vrot.slane %v4100_v37, %v6162_v24 }
 0xb13   : > { %v4099_v32 = vcombine.high %v4095_v46, %v4095_v46  ;;  %v4666_v58 = vmul.f32 %v7063_v59, %v4098_v10  ;;  %v4668_v41 = vmul.f32 %v4419_v38, %v4095_v46  ;;  %v4669_v53 = vmul.f32 %v4410_v5, %v4097_v63 }
 0xb14   : > { %v4789_v27 = vrot.slane %v4775_v51, %v6162_v24  ;;  %v4796_v30 = vrot.slane %v4664_v49, %v6162_v24  ;;  %v4115_v36 = vcombine.high %v4107_v6, %v4107_v6  ;;  %v4123_v22 = vrot.slane %v4107_v6, %v6162_v24 }
 0xb15   : > { %v4813_v45 = vcombine.low %v4665_v13, %v4666_v58  ;;  %v4814_v55 = vcombine.low %v4667_v31, %v4668_v41  ;;  %v4835_v57 = vrot.slane %v4669_v53, %v6162_v24  ;;  %v4116_v8 = vcombine.high %v4114_v12, %v4114_v12 }
 0xb16   : > { %v4797_v17 = vcombine.low %v4782_v9, %v4789_v27  ;;  %v4130_v18 = vrot.slane %v4114_v12, %v6162_v24  ;;  %v4137_v38 = vrot.slane %v4115_v36, %v6162_v24  ;;  %v4811_v60 = vrot.slane %v4796_v30, %v6162_v24 }
 0xb17   : > { %v4821_v59 = vrot.slane %v4813_v45, %v6162_v24  ;;  %v4828_v5 = vrot.slane %v4814_v55, %v6162_v24  ;;  %v4144_v4 = vrot.slane %v4116_v8, %v6162_v24  ;;  %v4145_v42 = vcombine.high %v4123_v22, %v4123_v22 }
 0xb18   : > { %v4804_v23 = vrot.slane %v4797_v17, %v6162_v24  ;;  %v4850_v25 = vrot.slane %v4835_v57, %v6162_v24  ;;  %v4147_v33 = vcombine.high %v4137_v38, %v4137_v38  ;;  %v4670_v11 = vmul.f32 %v7069_v20, %v4099_v32 }
 0xb19   : > { %v4836_v62 = vcombine.low %v4821_v59, %v4828_v5  ;;  %v4146_v43 = vcombine.high %v4130_v18, %v4130_v18  ;;  %v4148_v0 = vcombine.high %v4144_v4, %v4144_v4  ;;  %v4672_v9 = vmul.f32 %v4457_v15, %v4137_v38 }
 0xb1a   : > { %v4812_v3 = vcombine.low %v4804_v23, %v4811_v60  ;;  %v4671_v35 = vmul.f32 %v7083_v29, %v4123_v22  ;;  %v4673_v46 = vmul.f32 %v4458_v16, %v4145_v42  ;;  %v4674_v63 = vmul.f32 %v4449_v26, %v4147_v33 }
 0xb1b   : > { %v4843_v37 = vrot.slane %v4836_v62, %v6162_v24  ;;  %v4678_v6 = vmul.f32 %v4497_v50, %v4148_v0  ;;  %v4536_v20 = vcombine.high %v7122_v14, %v7122_v14  ;;  %v4583_v15 = vrot.slane %v4294_v7, %v6162_v24 }
 0xb1c   : > { %v5063_v10 = vsel %vm5055_vm5, %v4812_v3, 0.0  ;;  %v4852_v51 = vcombine.low %v4670_v11, %v4671_v35  ;;  %v4853_v29 = vcombine.low %v4672_v9, %v4673_v46  ;;  %v5060_v16 = vadd.f32 %v5059_v19, %v5058_v56 }
 0xb1d   : > { %v4851_v49 = vcombine.low %v4843_v37, %v4850_v25  ;;  %v5064_v13 = vrot.slane %v5063_v10, 4  ;;  %v4676_v32 = vmul.f32 %v7086_v40, %v4144_v4  ;;  %v4677_v47 = vmul.f32 %v4496_v1, %v4146_v43 }
 0xb1e   : > { %v4874_v26 = vrot.slane %v4674_v63, %v6162_v24  ;;  %v4860_v31 = vrot.slane %v4852_v51, %v6162_v24  ;;  %v4867_v41 = vrot.slane %v4853_v29, %v6162_v24  ;;  %v4527_v27 = vrot.slane %v7127_v2, %v6162_v24 }
 0xb1f   : > { %v5065_v58 = vadd.f32 %v5064_v13, %v5063_v10  ;;  %v5070_v50 = vsel %vm5055_vm5, %v4851_v49, 0.0  ;;  %v7193_v40 = vrot.slane %v4552_v39, %v6162_v24  ;;  %v4537_v1 = vcombine.high %v7091_v48, %v7091_v48 }
 0xb20   : > { %v5071_v53 = vrot.slane %v5070_v50, 4  ;;  %v4675_v30 = vmul.f32 %v7078_v34, %v4130_v18  ;;  %v4875_v12 = vcombine.low %v4860_v31, %v4867_v41  ;;  %v4892_v45 = vcombine.low %v4677_v47, %v4678_v6 }
 0xb21   : > { %v5066_v56 = vrot.slane %v5065_v58, 2  ;;  %v5061_v55 = vrot.slane %v5060_v16, 1  ;;  %v4576_v22 = vcombine.high %v4294_v7, %v4294_v7  ;;  %v4591_v19 = vcombine.high %v4583_v15, %v4583_v15 }
 0xb22   : > { %v5072_v36 = vadd.f32 %v5071_v53, %v5070_v50  ;;  %v4882_v57 = vrot.slane %v4875_v12, %v6162_v24  ;;  %v4889_v8 = vrot.slane %v4874_v26, %v6162_v24  ;;  %v4891_v61 = vcombine.low %v4675_v30, %v4676_v32 }
 0xb23   : > { %v5067_v17 = vadd.f32 %v5066_v56, %v5065_v58  ;;  %v7201_v59 = vrot.slane %v4537_v1, %v6162_v24  ;;  %v4574_v48 = vcombine.high %v7137_v28, %v7137_v28  ;;  %v4575_v34 = vcombine.high %v7193_v40, %v7193_v40 }
 0xb24   : > { %v5073_v39 = vrot.slane %v5072_v36, 2  ;;  %v4890_v18 = vcombine.low %v4882_v57, %v4889_v8  ;;  %v4906_v38 = vrot.slane %v4892_v45, %v6162_v24  ;;  %v7209_v23 = vrot.slane %v4583_v15, %v6162_v24 }
 0xb25   : > { %v5068_v5 = vrot.slane %v5067_v17, 1  ;;  %v7212_v4 = vrot.slane %v4576_v22, %v6162_v24  ;;  %v7215_v42 = vrot.slane %v4591_v19, %v6162_v24  ;;  %v5062_v62 = vadd.f32 %v5061_v55, %v5060_v16 }
 0xb26   : > { %v5074_v60 = vadd.f32 %v5073_v39, %v5072_v36  ;;  %v4899_v33 = vrot.slane %v4891_v61, %v6162_v24  ;;  %v5077_v11 = vsel %vm5055_vm5, %v4890_v18, 0.0  ;;  %v4566_v46 = vrot.slane %v7201_v59, %v6162_v24 }
 0xb27   : > { %v5069_v25 = vadd.f32 %v5068_v5, %v5067_v17  ;;  %v3988_v7 = vpop.f32.mrb[14].mxu0  ;;  %v5078_v43 = vrot.slane %v5077_v11, 4  ;;  %v4605_v13 = vrot.slane %v7212_v4, %v6162_v24  ;;  %v4613_v51 = vcombine.high %v7209_v23, %v7209_v23 }
 0xb28   : > { %v5075_v3 = vrot.slane %v5074_v60, 1  ;;  %v4149_v0 = vcombine.high %v3988_v7, %v3988_v7  ;;  %v4156_v9 = vrot.slane %v3988_v7, %v6162_v24  ;;  %v5473_v37 = vpop.f32.mrb[15].mxu0  ;;  %v4914_v35 = vcombine.low %v4899_v33, %v4906_v38 }
 0xb29   : > { %v5132_v63 = vsel %vm5131_vm6, %v5069_v25, %v5062_v62  ;;  %v5079_v10 = vadd.f32 %v5078_v43, %v5077_v11  ;;  %v4614_v29 = vcombine.high %v7215_v42, %v7215_v42 }
 0xb2a   : > { %v4163_v6 = vrot.slane %v4149_v0, %v6162_v24  ;;  %v4164_v15 = vcombine.high %v4156_v9, %v4156_v9  ;;  %v4172_v49 = vrot.slane %v4156_v9, %v6162_v24  ;;  %v5076_v16 = vadd.f32 %v5075_v3, %v5074_v60 }
 0xb2b   : > { %v5080_v32 = vrot.slane %v5079_v10, 2  ;;  %v4921_v41 = vrot.slane %v4914_v35, %v6162_v24 }
 0xb2c   : > { %v4165_v47 = vcombine.high %v4163_v6, %v4163_v6  ;;  %v4179_v26 = vrot.slane %v4163_v6, %v6162_v24  ;;  %v4186_v58 = vrot.slane %v4164_v15, %v6162_v24  ;;  %v4194_v50 = vcombine.high %v4172_v49, %v4172_v49 }
 0xb2d   : > { %v4679_v31 = vmul.f32 %v4488_v52, %v4172_v49  ;;  %v7237_v53 = vsel %vm5133_vm7, %v5076_v16, %v5132_v63  ;;  %v5081_v1 = vadd.f32 %v5080_v32, %v5079_v10 }
 0xb2e   : > { %v4193_v56 = vrot.slane %v4165_v47, %v6162_v24  ;;  %v4195_v30 = vcombine.high %v4179_v26, %v4179_v26  ;;  %v4196_v12 = vcombine.high %v4186_v58, %v4186_v58  ;;  %v4680_v45 = vmul.f32 %v7107_v54, %v4186_v58  ;;  %v3993_v52 = vpop.f32.mrb[16].mxu0 }
 0xb2f   : > { %v4681_v55 = vmul.f32 %v7122_v14, %v4194_v50  ;;  %v4683_v36 = vmul.f32 %v4536_v20, %v4179_v26  ;;  %v4913_v21 = vrot.slane %v4679_v31, %v6162_v24  ;;  %v5476_v8 = vpop.f32.mrb[17].mxu0  ;;  %v4198_v14 = vcombine.high %v3993_v52, %v3993_v52 }
 0xb30   : > { %v4197_v22 = vcombine.high %v4193_v56, %v4193_v56  ;;  %v4682_v19 = vmul.f32 %v4535_v44, %v4196_v12  ;;  %v4684_v17 = vmul.f32 %v4527_v27, %v4193_v56  ;;  %v4685_v57 = vmul.f32 %v7137_v28, %v4195_v30 }
 0xb31   : > { %v4928_v61 = vrot.slane %v4913_v21, %v6162_v24  ;;  %v4930_v39 = vcombine.low %v4680_v45, %v4681_v55  ;;  %v4205_v20 = vrot.slane %v3993_v52, %v6162_v24  ;;  %v5082_v54 = vrot.slane %v5081_v1, 1 }
 0xb32   : > { %v4686_v5 = vmul.f32 %v7193_v40, %v4197_v22  ;;  %v4931_v18 = vcombine.low %v4682_v19, %v4683_v36  ;;  %v4952_v38 = vrot.slane %v4684_v17, %v6162_v24  ;;  %v4212_v2 = vrot.slane %v4198_v14, %v6162_v24 }
 0xb33   : > { %v4929_v44 = vcombine.low %v4921_v41, %v4928_v61  ;;  %v4938_v60 = vrot.slane %v4930_v39, %v6162_v24  ;;  %v4213_v27 = vcombine.high %v4205_v20, %v4205_v20  ;;  %v4221_v11 = vrot.slane %v4205_v20, %v6162_v24 }
 0xb34   : > { %v4945_v62 = vrot.slane %v4931_v18, %v6162_v24  ;;  %v4967_v25 = vrot.slane %v4952_v38, %v6162_v24  ;;  %v4969_v33 = vcombine.low %v4685_v57, %v4686_v5  ;;  %v4214_v3 = vcombine.high %v4212_v2, %v4212_v2 }
 0xb35   : > { %v5084_v7 = vsel %vm5055_vm5, %v4929_v44, 0.0  ;;  %v4228_v43 = vrot.slane %v4212_v2, %v6162_v24  ;;  %v4235_v0 = vrot.slane %v4213_v27, %v6162_v24  ;;  %v4243_v35 = vcombine.high %v4221_v11, %v4221_v11 }
 0xb36   : > { %v4953_v9 = vcombine.low %v4938_v60, %v4945_v62  ;;  %v5085_v37 = vrot.slane %v5084_v7, 4  ;;  %v4687_v63 = vmul.f32 %v4574_v48, %v4221_v11  ;;  %v4242_v10 = vrot.slane %v4214_v3, %v6162_v24 }
 0xb37   : > { %v4244_v6 = vcombine.high %v4228_v43, %v4228_v43  ;;  %v4245_v15 = vcombine.high %v4235_v0, %v4235_v0  ;;  %v4688_v49 = vmul.f32 %v4575_v34, %v4235_v0  ;;  %v4689_v47 = vmul.f32 %v4566_v46, %v4243_v35  ;;  %v5303_v35 = vld [vmem:[%s7332_s11] ss:$0 sm:$0xff] }
 0xb38   : > { %v4960_v16 = vrot.slane %v4953_v9, %v6162_v24  ;;  %v5086_v32 = vadd.f32 %v5085_v37, %v5084_v7  ;;  %v4691_v26 = vmul.f32 %v7215_v42, %v4228_v43  ;;  %v4246_v58 = vcombine.high %v4242_v10, %v4242_v10 }
 0xb39   : > { %v4690_v28 = vmul.f32 %v7209_v23, %v4245_v15  ;;  %v4692_v48 = vmul.f32 %v4613_v51, %v4242_v10  ;;  %v4693_v50 = vmul.f32 %v4614_v29, %v4244_v6  ;;  %v4970_v56 = vcombine.low %v4687_v63, %v4688_v49 }
 0xb3a   : > { %v4968_v31 = vcombine.low %v4960_v16, %v4967_v25  ;;  %v5087_v41 = vrot.slane %v5086_v32, 2  ;;  %v4977_v40 = vrot.slane %v4969_v33, %v6162_v24  ;;  %v4694_v34 = vmul.f32 %v4605_v13, %v4246_v58 }
 0xb3b   : > { %v4991_v30 = vrot.slane %v4689_v47, %v6162_v24  ;;  %v5008_v59 = vcombine.low %v4690_v28, %v4691_v26  ;;  %v5009_v46 = vcombine.low %v4692_v48, %v4693_v50  ;;  %v4984_v23 = vrot.slane %v4970_v56, %v6162_v24 }
 0xb3c   : > { %v5088_v12 = vadd.f32 %v5087_v41, %v5086_v32  ;;  %v5091_v42 = vsel %vm5055_vm5, %v4968_v31, 0.0  ;;  %v5083_v51 = vadd.f32 %v5082_v54, %v5081_v1  ;;  %v5030_v4 = vrot.slane %v4694_v34, %v6162_v24 }
 0xb3d   : > { %v5092_v29 = vrot.slane %v5091_v42, 4  ;;  %v5016_v45 = vrot.slane %v5008_v59, %v6162_v24  ;;  %v5023_v55 = vrot.slane %v5009_v46, %v6162_v24  ;;  %v4992_v21 = vcombine.low %v4977_v40, %v4984_v23 }
 0xb3e   : > { %v5089_v36 = vrot.slane %v5088_v12, 1  ;;  %v5136_v13 = vsel %vm5135_vm8, %v5083_v51, %v7237_v53  ;;  %v5006_v17 = vrot.slane %v4991_v30, %v6162_v24  ;;  %v5045_v8 = vrot.slane %v5030_v4, %v6162_v24 }
 0xb3f   : > { %v5031_v52 = vcombine.low %v5016_v45, %v5023_v55  ;;  %v5093_v22 = vadd.f32 %v5092_v29, %v5091_v42  ;;  %v4999_v19 = vrot.slane %v4992_v21, %v6162_v24 }
 0xb40   : > { %v5090_v1 = vadd.f32 %v5089_v36, %v5088_v12 }
 0xb41   : > { %v5038_v57 = vrot.slane %v5031_v52, %v6162_v24  ;;  %v5094_v61 = vrot.slane %v5093_v22, 2  ;;  %v5007_v39 = vcombine.low %v4999_v19, %v5006_v17 }
 0xb42   : > { %v5138_v14 = vsel %vm5137_vm9, %v5090_v1, %v5136_v13 }
 0xb43   : > { %v5046_v20 = vcombine.low %v5038_v57, %v5045_v8  ;;  %v5095_v5 = vadd.f32 %v5094_v61, %v5093_v22  ;;  %v5098_v18 = vsel %vm5055_vm5, %v5007_v39, 0.0 }
 0xb44   : > { %v5099_v53 = vrot.slane %v5098_v18, 4 }
 0xb45   : > { %v5096_v38 = vrot.slane %v5095_v5, 1  ;;  %v5105_v54 = vsel %vm5055_vm5, %v5046_v20, 0.0 }
 0xb46   : > { %v5106_v44 = vrot.slane %v5105_v54, 4  ;;  %v5100_v2 = vadd.f32 %v5099_v53, %v5098_v18 }
 0xb47   : > { %v5097_v60 = vadd.f32 %v5096_v38, %v5095_v5 }
 0xb48   : > { %v5107_v27 = vadd.f32 %v5106_v44, %v5105_v54  ;;  %v5101_v62 = vrot.slane %v5100_v2, 2 }
 0xb49   : > { %v5140_v25 = vsel %vm5139_vm10, %v5097_v60, %v5138_v14 }
 0xb4a   : > { %v5108_v33 = vrot.slane %v5107_v27, 2  ;;  %v5102_v24 = vadd.f32 %v5101_v62, %v5100_v2 }
 0xb4c   : > { %v5109_v11 = vadd.f32 %v5108_v33, %v5107_v27  ;;  %v5103_v7 = vrot.slane %v5102_v24, 1 }
 0xb4e   : > { %v5110_v3 = vrot.slane %v5109_v11, 1  ;;  %v5104_v43 = vadd.f32 %v5103_v7, %v5102_v24 }
 0xb50   : > { %v5111_v0 = vadd.f32 %v5110_v3, %v5109_v11  ;;  %v5142_v9 = vsel %vm5141_vm11, %v5104_v43, %v5140_v25 }
 0xb52   : > { %v5144_v37 = vsel %vm5143_vm12, %v5111_v0, %v5142_v9 }
 0xb53   : > { %5486 = vmatmul.mubr.msk.f32.vlgmr.msra.gmra.mrb[16].mxu1 %vm103_vm0, %v5144_v37 }
 0xc23   :  { %111 = sbr.rel (!%p109_p4) target bundleno = 80 (0x50), region = 113 }
 0xc26   : > { %v5213_v63 = vpop.f32.mrb[16].mxu1 }
 0xc27   : > { %v5214_v10 = vadd.f32 %v5303_v35, %v5213_v63  ;;  %v5487_v6 = vpop.f32.mrb[17].mxu1 }
 0xc29   : > { %5218 = vst.msk [vmem:[%s5217_s5] sm:$0xff] %vm103_vm0, %v5214_v10 }
 0xc2a   :  { %5788 = shalt.err (!%p5785_p9)
}
 0xc2b   :  { %s5789_s30 = scalar_lea.hbm %s7335_s14, 768 }
 0xc2c   :  { %p5790_p10 = scmp.ne.s32.totalorder %s7335_s14, %s5789_s30  ;;  %p5793_p11 = scmp.lt.u32.totalorder %s5789_s30, %s7335_s14 }
 0xc2e   :  { %p5795_p12 = pnand %p5793_p11, %p5790_p10 }
 0xc30   :  { %5798 = shalt.err (!%p5795_p12)
}
 0xc31   :  { %5230 = dma.vmem_to_hbm [thread:$0]  %s5225_s15, 768, %s7335_s14, [#allocation5], %s5821_s7, %s5821_s7, %s5822_s26  }
 0xc32   :  { %5809 = dma.done.wait [#allocation5], 768  }
 0xc33   :  { %5810 = vsyncadd [#allocation5], 4294966528 }
 0xc34   :  { %5234 = vsyncpa [#allocation4], 1 }
 0xc35   :  { %5235 = vsyncpa [#allocation7], 1 }
 0xc36   :  { %5236 = vsyncpa [#allocation10], 1 }
 0xc37   :  { %5237 = vsyncpa [#allocation5], 1 }

</bundles_post_ra>
